<compile_context>
chip_gen: v6e
topology: v6e:2x2x1
jax: 0.10.0
libtpu: 0.0.40
codegen_flags: <defaults>
</compile_context>

<pallas_src>
import functools

import jax
import jax.numpy as jnp
from jax import lax
from jax.experimental import pallas as pl
from jax.experimental.pallas import tpu as pltpu


def _kmeans_kernel(x_ref, c0_ref, idx_ref, c_scr, *, n_iters, k, idx_bits):
    """All Lloyd iterations for a single batch element (x resident in VMEM).

    x_ref:   (1, N, DP)  f32  points, DP = D+1, last column == 1.0 (carries
                              ||c||^2 + pad into the assignment matmul and
                              cluster counts out of the update matmul)
    c0_ref:  (1, KP, DP) f32  initial centroids, rows >= k are zero padding
    idx_ref: (1, 1, N)   i32  final cluster assignment (written once)
    c_scr:   (KP, DP)    f32  VMEM scratch holding current centroids
    """
    x = x_ref[0]                                   # (N, DP)
    n, dp = x.shape
    kp = c_scr.shape[0]
    c_scr[...] = c0_ref[0]

    # Hoisted loop invariants (JAX does not CSE broadcast/iota inside loops).
    k_iota = lax.broadcasted_iota(jnp.int32, (n, kp), 1)            # (N, KP)
    k_iota_t = lax.broadcasted_iota(jnp.int32, (kp, n), 0)          # (KP, N)
    lane_is_last = lax.broadcasted_iota(jnp.int32, (kp, dp), 1) == dp - 1
    pad_add = jnp.where(                                            # (KP, DP)
        lax.broadcasted_iota(jnp.int32, (kp, dp), 0) >= k, 1e30, 0.0)
    low_mask = (1 << idx_bits) - 1
    clear_mask = jnp.int32(~low_mask)
    sign_flip = jnp.int32(0x7FFFFFFF)

    @pl.loop(0, n_iters)
    def _(it):
        c = c_scr[...]                                              # (KP, DP)

        # --- assignment: argmin_k ||x - c_k||^2 -----------------------------
        # ||x||^2 is constant per row and the ones-column cross terms are
        # uniform over live k -> both dropped.  Everything else is folded into
        # the SMALL centroid operand: cm[:, :D] = -2*c, cm[:, D] = ||c||^2+pad,
        # so dist = x_aug @ cm^T comes straight off the MXU with no VPU work on
        # the lane-dense (N, KP) tile.
        c2 = jnp.sum(c * c, axis=-1, keepdims=True)                 # (KP, 1)
        cm = jnp.where(lane_is_last, c2 + pad_add, -2.0 * c)        # (KP, DP)
        dist = lax.dot_general(x, cm, (((1,), (1,)), ((), ())),
                               preferred_element_type=jnp.float32)  # (N, KP) MXU

        # Fused argmin: single int32 lane-min over an order-preserving key with
        # the cluster index packed into the low idx_bits (torch-style smallest
        # index wins exact ties; near-ties within ~2^-(23-idx_bits) relative
        # collapse to the smaller index).
        bits = pltpu.bitcast(dist, jnp.int32)                       # (N, KP)
        key = jnp.where(bits < 0, bits ^ sign_flip, bits)           # monotone in dist
        packed = (key & clear_mask) | k_iota                        # (N, KP)
        idx = jnp.min(packed, axis=-1) & low_mask                   # (N,) i32

        @pl.when(it == n_iters - 1)
        def _():
            idx_ref[0, 0, :] = idx          # only the final assignment is output

        # --- update: mean of assigned points (keep old centroid if empty) ---
        # Skipped on the last iteration: that update is never consumed.
        @pl.when(it < n_iters - 1)
        def _():
            # One-hot built directly in (KP, N) so the csum matmul contracts the
            # MXU-native minor dim of the LHS (no (N,128) XLU transpose).
            onehot_t = (k_iota_t == idx[None, :]).astype(jnp.float32)   # (KP, N)
            csum = lax.dot_general(onehot_t, x, (((1,), (0,)), ((), ())),
                                   preferred_element_type=jnp.float32)  # (KP, DP)
            counts = csum[:, dp - 1:dp]                                 # (KP, 1)
            c_scr[...] = jnp.where(counts > 0.0,
                                   csum / jnp.maximum(counts, 1.0), c)


@functools.partial(jax.jit, static_argnames=("cluster_num", "n_iters"))
def kmeans_batched(x, cluster_num, n_iters=10):
    """Batched k-means; returns per-point cluster indices of shape (B, N)."""
    assert n_iters >= 1
    x = x.astype(jnp.float32)
    b, n, d = x.shape
    k = int(cluster_num)
    assert n >= k
    kp = max(128, ((k + 127) // 128) * 128)        # lane-dense padded K
    dp = d + 1
    idx_bits = max(1, (k - 1).bit_length())        # index field width in packed key

    # Ones column appended once, outside the iteration loop: it carries
    # ||c||^2 + pad into the assignment matmul and counts out of the update.
    # TODO(synk): this materializes one extra HBM copy of x per call; fuse the
    # ones column into the producer of x if the XLA profile shows this concat.
    x_aug = jnp.concatenate([x, jnp.ones((b, n, 1), jnp.float32)], axis=-1)

    # Deterministic init: first K points of each batch element; pad to KP rows.
    c0 = jnp.pad(x_aug[:, :k, :], ((0, 0), (0, kp - k), (0, 0)))

    # Generation-aware VMEM budget: raise above the 16/32 MiB scoped defaults,
    # but leave headroom below physical capacity (64 MiB per TC on v7x).
    try:
        vmem_cap = int(pltpu.get_tpu_info().vmem_capacity_bytes)
    except Exception:
        vmem_cap = 128 * 1024 * 1024
    vmem_limit = max(min(64 * 1024 * 1024, vmem_cap - 8 * 1024 * 1024),
                     16 * 1024 * 1024)

    # Keep x double-buffered when it fits; drop to a single buffer before
    # abandoning the resident-x strategy (matters on v7x's 64 MiB VMEM).
    x_block_bytes = n * dp * 4
    other_bytes = 3 * kp * dp * 4 + 8 * n * kp * 4 + 4 * n * 4 + (2 << 20)
    if 2 * x_block_bytes + other_bytes <= vmem_limit:
        x_spec = pl.BlockSpec((1, n, dp), lambda i: (i, 0, 0))
    else:
        x_spec = pl.BlockSpec((1, n, dp), lambda i: (i, 0, 0),
                              pipeline_mode=pl.Buffered(1))
    # TODO(synk): for N*DP too large even single-buffered, re-stream x per Lloyd
    # iteration with an in-kernel pltpu.emit_pipeline over N chunks (csum/counts
    # accumulated in the (KP, DP) scratch) rather than adding an N grid axis.

    kernel = functools.partial(_kmeans_kernel, n_iters=n_iters, k=k,
                               idx_bits=idx_bits)

    idx3 = pl.pallas_call(
        kernel,
        out_shape=jax.ShapeDtypeStruct((b, 1, n), jnp.int32),
        grid_spec=pltpu.PrefetchScalarGridSpec(
            num_scalar_prefetch=0,
            grid=(b,),
            in_specs=[
                x_spec,                                           # x (VMEM resident)
                pl.BlockSpec((1, kp, dp), lambda i: (i, 0, 0)),   # init centroids
            ],
            out_specs=pl.BlockSpec((1, 1, n), lambda i: (i, 0, 0)),
            scratch_shapes=[pltpu.VMEM((kp, dp), jnp.float32)],
        ),
        compiler_params=pltpu.CompilerParams(
            # grid=(b,) is the only parallel axis: on v7x (2 TCs/chip) both cores
            # are engaged only when b >= 2 — batch >= 2 problems per call upstream.
            dimension_semantics=("parallel",),
            vmem_limit_bytes=vmem_limit,
        ),
    )(x_aug, c0)

    return idx3.reshape(b, n)


_new_module_id = 0


class KMeans:
    """JAX/Pallas analog of canconv KMeans module (no learnable parameters)."""

    def __init__(self, cluster_num):
        global _new_module_id
        self.module_id = _new_module_id
        _new_module_id += 1
        self.cluster_num = cluster_num
        self.training = False  # eval mode => cache_indice is ignored

    def __call__(self, x, cache_indice=None, cluster_num=None):
        if not self.training:
            cache_indice = None
        if cluster_num is None:
            cluster_num = self.cluster_num
        # TODO(synk): training-time cache_indice warm-start (persistent per-module
        # cluster cache keyed by sample index) has no clean Pallas equivalent.
        return kmeans_batched(x, cluster_num)


def _kmeans_reference(x, k, n_iters=10):
    """Pure-JAX Lloyd reference mirroring the kernel's algorithm."""
    x = x.astype(jnp.float32)
    c = x[:, :k, :]
    idx = None
    for _ in range(n_iters):
        d2 = jnp.sum((x[:, :, None, :] - c[:, None, :, :]) ** 2, axis=-1)  # (B,N,K)
        idx = jnp.argmin(d2, axis=-1).astype(jnp.int32)
        onehot = jax.nn.one_hot(idx, k, dtype=jnp.float32)                 # (B,N,K)
        csum = jnp.einsum("bnk,bnd->bkd", onehot, x)
        counts = jnp.sum(onehot, axis=1)[..., None]                        # (B,K,1)
        c = jnp.where(counts > 0, csum / jnp.maximum(counts, 1.0), c)
    return idx


if __name__ == "__main__":
    key = jax.random.PRNGKey(0)
    B, H, W, C = 2, 16, 16, 32          # N = H*W = 256 spatial sites, D = 32 features
    N, D = H * W, C
    K = 4                               # cluster_num
    x = jax.random.normal(key, (B, N, D), dtype=jnp.float32)

    km = KMeans(cluster_num=K)
    idx = jax.block_until_ready(km(x))

    assert idx.shape == (B, N)
    assert idx.dtype == jnp.int32
    assert int(idx.min()) >= 0 and int(idx.max()) < K

    # Compare against the pure-JAX reference; fp-reordering near-ties are the
    # only legitimate source of disagreement, so require >= 99% exact match.
    idx_ref = jax.block_until_ready(_kmeans_reference(x, K))
    agreement = float(jnp.mean((idx == idx_ref).astype(jnp.float32)))
    assert agreement >= 0.99, f"agreement with reference too low: {agreement}"

    print("KERNEL_OK")
</pallas_src>

<mosaic_0001>
module attributes {stable_mosaic.version = 11 : i64} {
  func.func @_kmeans_kernel(%arg0: i32, %arg1: memref<1x256x33xf32, #tpu.memory_space<vmem>>, %arg2: memref<1x128x33xf32, #tpu.memory_space<vmem>>, %arg3: memref<1x1x256xi32, #tpu.memory_space<vmem>>, %arg4: memref<128x33xf32, #tpu.memory_space<vmem>>) attributes {dimension_semantics = [#tpu.dimension_semantics<parallel>], iteration_bounds = array<i64: 2>, scalar_prefetch = 0 : i64, scratch_operands = 1 : i64, tpu.core_type = #tpu.core_type<tc>, window_params = [{transform_indices = @transform_0, window_bounds = array<i64: 1, 256, 33>}, {transform_indices = @transform_1, window_bounds = array<i64: 1, 128, 33>}, {transform_indices = @transform_2, window_bounds = array<i64: 1, 1, 256>}]} {
    %c0 = arith.constant 0 : index
    %c0_0 = arith.constant 0 : index
    %c0_1 = arith.constant 0 : index
    %0 = vector.load %arg1[%c0, %c0_0, %c0_1] : memref<1x256x33xf32, #tpu.memory_space<vmem>>, vector<1x256x33xf32>
    %1 = vector.shape_cast %0 : vector<1x256x33xf32> to vector<256x33xf32>
    %c0_2 = arith.constant 0 : index
    %c0_3 = arith.constant 0 : index
    %c0_4 = arith.constant 0 : index
    %2 = vector.load %arg2[%c0_2, %c0_3, %c0_4] : memref<1x128x33xf32, #tpu.memory_space<vmem>>, vector<1x128x33xf32>
    %3 = vector.shape_cast %2 : vector<1x128x33xf32> to vector<128x33xf32>
    %c0_5 = arith.constant 0 : index
    %c0_6 = arith.constant 0 : index
    %4 = vector.load %arg4[%c0_5, %c0_6] : memref<128x33xf32, #tpu.memory_space<vmem>>, vector<128x33xf32>
    tpu.vector_store %arg4[%c0_5, %c0_6], %3 {strides = array<i32>} : memref<128x33xf32, #tpu.memory_space<vmem>>, vector<128x33xf32>,
    %5 = tpu.iota {dimensions = array<i32: 1>} : vector<256x128xi32>
    %6 = tpu.iota {dimensions = array<i32: 0>} : vector<128x256xi32>
    %7 = tpu.iota {dimensions = array<i32: 1>} : vector<128x33xi32>
    %c32_i32 = arith.constant 32 : i32
    %8 = vector.broadcast %c32_i32 : i32 to vector<128x33xi32>
    %9 = arith.cmpi eq, %7, %8 : vector<128x33xi32>
    %10 = tpu.iota {dimensions = array<i32: 0>} : vector<128x33xi32>
    %c4_i32 = arith.constant 4 : i32
    %11 = vector.broadcast %c4_i32 : i32 to vector<128x33xi32>
    %12 = arith.cmpi sge, %10, %11 : vector<128x33xi32>
    %cst = arith.constant 1.000000e+30 : f32
    %cst_7 = arith.constant 0.000000e+00 : f32
    %13 = vector.broadcast %cst : f32 to vector<128x33xf32>
    %14 = vector.broadcast %cst_7 : f32 to vector<128x33xf32>
    %15 = arith.select %12, %13, %14 : vector<128x33xi1>, vector<128x33xf32>
    %c2147483647_i32 = arith.constant 2147483647 : i32
    %c-4_i32 = arith.constant -4 : i32
    %c0_i32 = arith.constant 0 : i32
    %c10_i32 = arith.constant 10 : i32
    %16 = arith.addi %c0_i32, %c10_i32 : i32
    %c1_i32 = arith.constant 1 : i32
    scf.for %arg5 = %c0_i32 to %16 step %c1_i32  : i32 {
      %c1_i32_9 = arith.constant 1 : i32
      %17 = arith.muli %arg5, %c1_i32_9 : i32
      %c0_i32_10 = arith.constant 0 : i32
      %18 = arith.addi %c0_i32_10, %17 : i32
      %c0_11 = arith.constant 0 : index
      %c0_12 = arith.constant 0 : index
      %19 = vector.load %arg4[%c0_11, %c0_12] : memref<128x33xf32, #tpu.memory_space<vmem>>, vector<128x33xf32>
      %20 = arith.mulf %19, %19 : vector<128x33xf32>
      %cst_13 = arith.constant dense<0.000000e+00> : vector<128xf32>
      %21 = vector.multi_reduction <add>, %20, %cst_13 [1] : vector<128x33xf32> to vector<128xf32>
      %22 = vector.shape_cast %21 : vector<128xf32> to vector<128x1xf32>
      %23 = vector.broadcast %22 : vector<128x1xf32> to vector<128x33xf32>
      %24 = arith.addf %23, %15 : vector<128x33xf32>
      %cst_14 = arith.constant -2.000000e+00 : f32
      %25 = vector.broadcast %cst_14 : f32 to vector<128x33xf32>
      %26 = arith.mulf %25, %19 : vector<128x33xf32>
      %27 = arith.select %9, %24, %26 : vector<128x33xi1>, vector<128x33xf32>
      %cst_15 = arith.constant dense<0.000000e+00> : vector<256x128xf32>
      %28 = tpu.matmul %1, %27, %cst_15 {dimension_numbers = #tpu.dot_dimension_numbers<[1], [1], [0], [0], [0, 0, 1, 0], [], []>} : vector<256x33xf32>, vector<128x33xf32>, vector<256x128xf32> -> vector<256x128xf32>
      %29 = tpu.bitcast %28 : vector<256x128xf32> -> vector<256x128xi32>
      %c0_i32_16 = arith.constant 0 : i32
      %30 = vector.broadcast %c0_i32_16 : i32 to vector<256x128xi32>
      %31 = arith.cmpi slt, %29, %30 : vector<256x128xi32>
      %32 = vector.broadcast %c2147483647_i32 : i32 to vector<256x128xi32>
      %33 = arith.xori %29, %32 : vector<256x128xi32>
      %34 = arith.select %31, %33, %29 : vector<256x128xi1>, vector<256x128xi32>
      %35 = vector.broadcast %c-4_i32 : i32 to vector<256x128xi32>
      %36 = arith.andi %34, %35 : vector<256x128xi32>
      %37 = arith.ori %36, %5 : vector<256x128xi32>
      %cst_17 = arith.constant dense<2147483647> : vector<256xi32>
      %38 = vector.multi_reduction <minsi>, %37, %cst_17 [1] : vector<256x128xi32> to vector<256xi32>
      %c3_i32 = arith.constant 3 : i32
      %39 = vector.broadcast %c3_i32 : i32 to vector<256xi32>
      %40 = arith.andi %38, %39 : vector<256xi32>
      %c9_i32 = arith.constant 9 : i32
      %41 = arith.cmpi eq, %18, %c9_i32 : i32
      %42 = arith.extui %41 : i1 to i32
      %c0_i32_18 = arith.constant 0 : i32
      %43 = arith.cmpi ne, %42, %c0_i32_18 : i32
      scf.if %43 {
        %c0_21 = arith.constant 0 : index
        %c0_22 = arith.constant 0 : index
        %c0_23 = arith.constant 0 : index
        %47 = vector.load %arg3[%c0_21, %c0_22, %c0_23] : memref<1x1x256xi32, #tpu.memory_space<vmem>>, vector<1x1x256xi32>
        %48 = vector.shape_cast %47 : vector<1x1x256xi32> to vector<256xi32>
        %49 = vector.shape_cast %40 : vector<256xi32> to vector<1x1x256xi32>
        tpu.vector_store %arg3[%c0_21, %c0_22, %c0_23], %49 {strides = array<i32>} : memref<1x1x256xi32, #tpu.memory_space<vmem>>, vector<1x1x256xi32>,
      } else {
      }
      %c9_i32_19 = arith.constant 9 : i32
      %44 = arith.cmpi slt, %18, %c9_i32_19 : i32
      %45 = arith.extui %44 : i1 to i32
      %c0_i32_20 = arith.constant 0 : i32
      %46 = arith.cmpi ne, %45, %c0_i32_20 : i32
      scf.if %46 {
        %47 = vector.shape_cast %40 : vector<256xi32> to vector<1x256xi32>
        %48 = vector.broadcast %47 : vector<1x256xi32> to vector<128x256xi32>
        %49 = arith.cmpi eq, %6, %48 : vector<128x256xi32>
        %50 = arith.extui %49 : vector<128x256xi1> to vector<128x256xi32>
        %51 = arith.sitofp %50 : vector<128x256xi32> to vector<128x256xf32>
        %cst_21 = arith.constant dense<0.000000e+00> : vector<128x33xf32>
        %52 = tpu.matmul %51, %1, %cst_21 {dimension_numbers = #tpu.dot_dimension_numbers<[1], [0], [0], [1], [0, 0, 1, 1], [], []>} : vector<128x256xf32>, vector<256x33xf32>, vector<128x33xf32> -> vector<128x33xf32>
        %53 = vector.extract_strided_slice %52 {offsets = [0, 32], sizes = [128, 1], strides = [1, 1]} : vector<128x33xf32> to vector<128x1xf32>
        %cst_22 = arith.constant 0.000000e+00 : f32
        %54 = vector.broadcast %cst_22 : f32 to vector<128x1xf32>
        %55 = arith.cmpf ogt, %53, %54 : vector<128x1xf32>
        %cst_23 = arith.constant 1.000000e+00 : f32
        %56 = vector.broadcast %cst_23 : f32 to vector<128x1xf32>
        %57 = arith.maximumf %53, %56 : vector<128x1xf32>
        %58 = vector.broadcast %57 : vector<128x1xf32> to vector<128x33xf32>
        %59 = arith.divf %52, %58 : vector<128x33xf32>
        %60 = vector.shape_cast %55 : vector<128x1xi1> to vector<128x1xi1>
        %61 = vector.broadcast %60 : vector<128x1xi1> to vector<128x33xi1>
        %62 = arith.select %61, %59, %19 : vector<128x33xi1>, vector<128x33xf32>
        %c0_24 = arith.constant 0 : index
        %c0_25 = arith.constant 0 : index
        %63 = vector.load %arg4[%c0_24, %c0_25] : memref<128x33xf32, #tpu.memory_space<vmem>>, vector<128x33xf32>
        tpu.vector_store %arg4[%c0_24, %c0_25], %62 {strides = array<i32>} : memref<128x33xf32, #tpu.memory_space<vmem>>, vector<128x33xf32>,
      } else {
      }
    }
    %c10_i32_8 = arith.constant 10 : i32
    return
  }
  func.func @transform_0(%arg0: i32) -> (i32, i32, i32) {
    %c0_i32 = arith.constant 0 : i32
    %c0_i32_0 = arith.constant 0 : i32
    %c0_i32_1 = arith.constant 0 : i32
    return %arg0, %c0_i32, %c0_i32_0 : i32, i32, i32
  }
  func.func @transform_1(%arg0: i32) -> (i32, i32, i32) {
    %c0_i32 = arith.constant 0 : i32
    %c0_i32_0 = arith.constant 0 : i32
    %c0_i32_1 = arith.constant 0 : i32
    return %arg0, %c0_i32, %c0_i32_0 : i32, i32, i32
  }
  func.func @transform_2(%arg0: i32) -> (i32, i32, i32) {
    %c0_i32 = arith.constant 0 : i32
    %c0_i32_0 = arith.constant 0 : i32
    %c0_i32_1 = arith.constant 0 : i32
    return %arg0, %c0_i32, %c0_i32_0 : i32, i32, i32
  }
}

</mosaic_0001>

<bundles_post_ra>
// kernel: kmeans_batched.1
= control target key start
LH: loop header
LB: loop body
LE: loop exit
PB: predicated region body
PF: predicated region fallthrough
CT: control target
= control target key end

     0   :  { %s5626_s9 = smov 0   ;;  %s7865_s0 = inlined_call_operand.vmem [shape: f32[2,256,33], index: 0, kind: input, shape index: {}]   ;;  %s7866_s1 = inlined_call_operand.vmem [shape: f32[2,128,33], index: 1, kind: input, shape index: {}]   ;;  %s7867_s2 = inlined_call_operand.vmem [shape: s32[2,1,256], index: 2, kind: output, shape index: {}]  }
   0x1 LB: > { %s5131_s10 = sadd.s32 4294967295, %s5599_s9   ;;  %p5135_p0 = scmp.ge.s32.totalorder %s5599_s9, 1  ;;  %s5599_s9 = sphi %s5626_s9, %s12_s9  }
   0x2   : > { %p122_p1 = scmp.lt.s32.totalorder %s5599_s9, 3 }
   0x4   : > { %p123_p2 = pnand %p5135_p0, %p122_p1 }
   0x5   : > { %p148_p3 = scmp.lt.s32.totalorder (!%p123_p2), %s5131_s10, 1  ;;  %s5837_s23 = smov (!%p123_p2), 0  }
   0x6   : > { %126 = sbr.rel (%p123_p2) target bundleno = 1571 (0x623), region = 28 }
   0xb   : > { %v7868_v0 = vlaneseq  ;;  %s8180_s10 = smov (!%p148_p3, %s5131_s10), 1  ;;  %v5605_v33 = vmov 0.0   ;;  %vm210_vm2 = vcmask 269312  }
   0xc   : > { %s5257_s11 = sshll.u32 %s8180_s10, 8  ;;  %s5140_s15 = sshll.u32 %s8180_s10, 1 }
   0xd   : > { %v5637_v1 = vshrl.u32 %v7868_v0, 7  ;;  %v5640_v2 = vand.u32 127, %v7868_v0  ;;  %s5658_s14 = scalar_lea.vmem %s7865_s0, %s5257_s11  ;;  %s5691_s18 = scalar_lea.vmem %s7867_s2, %s5140_s15 }
   0xe   : > { %v5674_v11 = vld [vmem:[%s5658_s14] sm:$0xff]  ;;  %v5677_v12 = vld [vmem:[%s5658_s14 + $0x8] sm:$0xff]  ;;  %v5680_v13 = vld [vmem:[%s5658_s14 + $0x10] sm:$0xff]  ;;  %s5258_s19 = sshll.u32 %s8180_s10, 7 }
   0xf   : > { %7962 = vst [vmem:[#allocation3_spill] sm:$0xff] %v5637_v1  ;;  %7963 = vst [vmem:[#allocation4_spill] sm:$0xff] %v5640_v2  ;;  %v5644_v3 = vadd.s32 8, %v5637_v1  ;;  %v5647_v4 = vadd.s32 16, %v5637_v1  ;;  %v5650_v5 = vadd.s32 24, %v5637_v1  ;;  %v5653_v6 = vadd.s32 32, %v5637_v1  ;;  %s5770_s22 = scalar_lea.vmem %s7866_s1, %s5258_s19 }
  0x10   : > { %v5661_v7 = vadd.s32 40, %v5637_v1  ;;  %v5664_v8 = vadd.s32 48, %v5637_v1  ;;  %v5667_v9 = vadd.s32 56, %v5637_v1  ;;  %v5670_v10 = vadd.s32 64, %v5637_v1  ;;  %7972 = vst [vmem:[#allocation13_spill] sm:$0xff] %v5674_v11  ;;  %7973 = vst [vmem:[#allocation14_spill] sm:$0xff] %v5677_v12 }
  0x11   : > { %7964 = vst [vmem:[#allocation5_spill] sm:$0xff] %v5644_v3  ;;  %7965 = vst [vmem:[#allocation6_spill] sm:$0xff] %v5647_v4  ;;  %v5683_v14 = vadd.s32 72, %v5637_v1  ;;  %v5686_v15 = vadd.s32 80, %v5637_v1  ;;  %v5694_v16 = vld [vmem:[%s5658_s14 + $0x18] sm:$0xff]  ;;  %v5697_v17 = vld [vmem:[%s5658_s14 + $0x20] sm:$0xff] }
  0x12   : > { %7966 = vst [vmem:[#allocation7_spill] sm:$0xff] %v5650_v5  ;;  %7967 = vst [vmem:[#allocation8_spill] sm:$0xff] %v5653_v6  ;;  %v5700_v18 = vld [vmem:[%s5658_s14 + $0x28] sm:$0xff]  ;;  %v5703_v19 = vadd.s32 88, %v5637_v1  ;;  %v5706_v20 = vadd.s32 96, %v5637_v1  ;;  %v5709_v21 = vadd.s32 104, %v5637_v1 }
  0x13   : > { %7968 = vst [vmem:[#allocation9_spill] sm:$0xff] %v5661_v7  ;;  %7969 = vst [vmem:[#allocation10_spill] sm:$0xff] %v5664_v8  ;;  %v5712_v22 = vld [vmem:[%s5658_s14 + $0x30] sm:$0xff]  ;;  %v5715_v23 = vld [vmem:[%s5658_s14 + $0x38] sm:$0xff]  ;;  %v5721_v25 = vadd.s32 112, %v5637_v1  ;;  %v5724_v26 = vadd.s32 120, %v5637_v1 }
  0x14   : > { %7970 = vst [vmem:[#allocation11_spill] sm:$0xff] %v5667_v9  ;;  %7971 = vst [vmem:[#allocation12_spill] sm:$0xff] %v5670_v10  ;;  %v5718_v24 = vld [vmem:[%s5658_s14 + $0x40] sm:$0xff]  ;;  %vm246_vm0 = vcmp.eq.s32.totalorder %v5640_v2, 32  ;;  %v5728_v27 = vld [vmem:[%s5658_s14 + $0x48] sm:$0xff]  ;;  %vm247_vm1 = vcmp.ge.s32.totalorder %v5637_v1, 4 }
  0x15   : > { %7974 = vst [vmem:[#allocation15_spill] sm:$0xff] %v5680_v13  ;;  %7975 = vst [vmem:[#allocation16_spill] sm:$0xff] %v5683_v14  ;;  %v5731_v28 = vld [vmem:[%s5658_s14 + $0x50] sm:$0xff]  ;;  %v5734_v29 = vld [vmem:[%s5658_s14 + $0x58] sm:$0xff]  ;;  %v5747_v34 = vsel %vm247_vm1, 1e+30, %v5605_v33 }
  0x16   : > { %7976 = vst [vmem:[#allocation17_spill] sm:$0xff] %v5686_v15  ;;  %7977 = vst [vmem:[#allocation18_spill] sm:$0xff] %v5694_v16  ;;  %v5739_v30 = vld [vmem:[%s5658_s14 + $0x60] sm:$0xff]  ;;  %v5742_v31 = vld [vmem:[%s5658_s14 + $0x68] sm:$0xff] }
  0x17   : > { %7978 = vst [vmem:[#allocation19_spill] sm:$0xff] %v5697_v17  ;;  %7979 = vst [vmem:[#allocation20_spill] sm:$0xff] %v5700_v18  ;;  %v5745_v32 = vld [vmem:[%s5658_s14 + $0x70] sm:$0xff]  ;;  %v5750_v35 = vld [vmem:[%s5658_s14 + $0x78] sm:$0xff] }
  0x18   : > { %7980 = vst [vmem:[#allocation21_spill] sm:$0xff] %v5703_v19  ;;  %7981 = vst [vmem:[#allocation22_spill] sm:$0xff] %v5706_v20  ;;  %v5753_v36 = vld [vmem:[%s5658_s14 + $0x80] sm:$0xff]  ;;  %v5756_v37 = vld [vmem:[%s5658_s14 + $0x88] sm:$0xff] }
  0x19   : > { %7982 = vst [vmem:[#allocation23_spill] sm:$0xff] %v5709_v21  ;;  %7983 = vst [vmem:[#allocation24_spill] sm:$0xff] %v5712_v22  ;;  %v5759_v38 = vld [vmem:[%s5658_s14 + $0x90] sm:$0xff]  ;;  %v5762_v39 = vld [vmem:[%s5658_s14 + $0x98] sm:$0xff] }
  0x1a   : > { %7984 = vst [vmem:[#allocation25_spill] sm:$0xff] %v5715_v23  ;;  %7985 = vst [vmem:[#allocation26_spill] sm:$0xff] %v5718_v24  ;;  %v5765_v40 = vld [vmem:[%s5658_s14 + $0xa0] sm:$0xff]  ;;  %v5773_v41 = vld [vmem:[%s5658_s14 + $0xa8] sm:$0xff] }
  0x1b   : > { %7986 = vst [vmem:[#allocation27_spill] sm:$0xff] %v5721_v25  ;;  %7987 = vst [vmem:[#allocation28_spill] sm:$0xff] %v5724_v26  ;;  %v5776_v42 = vld [vmem:[%s5658_s14 + $0xb0] sm:$0xff]  ;;  %v5779_v43 = vld [vmem:[%s5658_s14 + $0xb8] sm:$0xff] }
  0x1c   : > { %7988 = vst [vmem:[#allocation29_spill] sm:$0xff] %v5728_v27  ;;  %7989 = vst [vmem:[#allocation30_spill] sm:$0xff] %v5731_v28  ;;  %v5782_v44 = vld [vmem:[%s5658_s14 + $0xc0] sm:$0xff]  ;;  %v5785_v45 = vld [vmem:[%s5658_s14 + $0xc8] sm:$0xff] }
  0x1d   : > { %7990 = vst [vmem:[#allocation31_spill] sm:$0xff] %v5734_v29  ;;  %7991 = vst [vmem:[#allocation32_spill] sm:$0xff] %v5739_v30  ;;  %v5788_v46 = vld [vmem:[%s5658_s14 + $0xd0] sm:$0xff]  ;;  %v5791_v47 = vld [vmem:[%s5658_s14 + $0xd8] sm:$0xff] }
  0x1e   : > { %7992 = vst [vmem:[#allocation33_spill] sm:$0xff] %v5742_v31  ;;  %7993 = vst [vmem:[#allocation34_spill] sm:$0xff] %v5745_v32  ;;  %v5794_v48 = vld [vmem:[%s5658_s14 + $0xe0] sm:$0xff]  ;;  %v5797_v49 = vld [vmem:[%s5658_s14 + $0xe8] sm:$0xff] }
  0x1f   : > { %7994 = vst [vmem:[#allocation35_spill] sm:$0xff] %v5747_v34  ;;  %7995 = vst [vmem:[#allocation36_spill] sm:$0xff] %v5750_v35  ;;  %v5800_v50 = vld [vmem:[%s5658_s14 + $0xf0] sm:$0xff]  ;;  %v5803_v51 = vld [vmem:[%s5658_s14 + $0xf8] sm:$0xff] }
  0x20   : > { %7996 = vst [vmem:[#allocation37_spill] sm:$0xff] %v5753_v36  ;;  %7997 = vst [vmem:[#allocation38_spill] sm:$0xff] %v5756_v37  ;;  %v194_v52 = vld [vmem:[%s5770_s22] sm:$0xff]  ;;  %v195_v53 = vld [vmem:[%s5770_s22 + $0x8] sm:$0xff] }
  0x21   : > { %7998 = vst [vmem:[#allocation39_spill] sm:$0xff] %v5759_v38  ;;  %7999 = vst [vmem:[#allocation40_spill] sm:$0xff] %v5762_v39  ;;  %v196_v54 = vld [vmem:[%s5770_s22 + $0x10] sm:$0xff]  ;;  %v197_v55 = vld [vmem:[%s5770_s22 + $0x18] sm:$0xff] }
  0x22   : > { %8000 = vst [vmem:[#allocation41_spill] sm:$0xff] %v5765_v40  ;;  %8001 = vst [vmem:[#allocation42_spill] sm:$0xff] %v5773_v41  ;;  %v198_v56 = vld [vmem:[%s5770_s22 + $0x20] sm:$0xff]  ;;  %v199_v57 = vld [vmem:[%s5770_s22 + $0x28] sm:$0xff] }
  0x23   : > { %8002 = vst [vmem:[#allocation43_spill] sm:$0xff] %v5776_v42  ;;  %8003 = vst [vmem:[#allocation44_spill] sm:$0xff] %v5779_v43  ;;  %v200_v58 = vld [vmem:[%s5770_s22 + $0x30] sm:$0xff]  ;;  %v201_v59 = vld [vmem:[%s5770_s22 + $0x38] sm:$0xff] }
  0x24   : > { %8004 = vst [vmem:[#allocation45_spill] sm:$0xff] %v5782_v44  ;;  %8005 = vst [vmem:[#allocation46_spill] sm:$0xff] %v5785_v45  ;;  %v202_v60 = vld [vmem:[%s5770_s22 + $0x40] sm:$0xff]  ;;  %v203_v61 = vld [vmem:[%s5770_s22 + $0x48] sm:$0xff] }
  0x25   : > { %8006 = vst [vmem:[#allocation47_spill] sm:$0xff] %v5788_v46  ;;  %8007 = vst [vmem:[#allocation48_spill] sm:$0xff] %v5791_v47  ;;  %v204_v62 = vld [vmem:[%s5770_s22 + $0x50] sm:$0xff]  ;;  %v205_v63 = vld [vmem:[%s5770_s22 + $0x58] sm:$0xff] }
  0x26   : > { %8008 = vst [vmem:[#allocation49_spill] sm:$0xff] %v5794_v48  ;;  %8009 = vst [vmem:[#allocation50_spill] sm:$0xff] %v5797_v49  ;;  %v206_v33 = vld [vmem:[%s5770_s22 + $0x60] sm:$0xff] }
  0x27   : > { %8010 = vst [vmem:[#allocation51_spill] sm:$0xff] %v5800_v50  ;;  %8011 = vst [vmem:[#allocation52_spill] sm:$0xff] %v5803_v51 }
  0x28   : > { %211 = vst.msk [vmem:[#allocation2] sm:$0xff] %vm210_vm2, %v194_v52  ;;  %212 = vst.msk [vmem:[#allocation2 + $0x8] sm:$0xff] %vm210_vm2, %v195_v53  ;;  %v207_v52 = vld [vmem:[%s5770_s22 + $0x68] sm:$0xff]  ;;  %v208_v53 = vld [vmem:[%s5770_s22 + $0x70] sm:$0xff] }
  0x29   : > { %213 = vst.msk [vmem:[#allocation2 + $0x10] sm:$0xff] %vm210_vm2, %v196_v54  ;;  %214 = vst.msk [vmem:[#allocation2 + $0x18] sm:$0xff] %vm210_vm2, %v197_v55  ;;  %v209_v54 = vld [vmem:[%s5770_s22 + $0x78] sm:$0xff] }
  0x2a   : > { %215 = vst.msk [vmem:[#allocation2 + $0x20] sm:$0xff] %vm210_vm2, %v198_v56  ;;  %216 = vst.msk [vmem:[#allocation2 + $0x28] sm:$0xff] %vm210_vm2, %v199_v57 }
  0x2b   : > { %217 = vst.msk [vmem:[#allocation2 + $0x30] sm:$0xff] %vm210_vm2, %v200_v58  ;;  %218 = vst.msk [vmem:[#allocation2 + $0x38] sm:$0xff] %vm210_vm2, %v201_v59 }
  0x2c   : > { %219 = vst.msk [vmem:[#allocation2 + $0x40] sm:$0xff] %vm210_vm2, %v202_v60  ;;  %220 = vst.msk [vmem:[#allocation2 + $0x48] sm:$0xff] %vm210_vm2, %v203_v61 }
  0x2d   : > { %221 = vst.msk [vmem:[#allocation2 + $0x50] sm:$0xff] %vm210_vm2, %v204_v62  ;;  %222 = vst.msk [vmem:[#allocation2 + $0x58] sm:$0xff] %vm210_vm2, %v205_v63 }
  0x2e   : > { %223 = vst.msk [vmem:[#allocation2 + $0x60] sm:$0xff] %vm210_vm2, %v206_v33  ;;  %224 = vst.msk [vmem:[#allocation2 + $0x68] sm:$0xff] %vm210_vm2, %v207_v52 }
  0x2f   : > { %225 = vst.msk [vmem:[#allocation2 + $0x70] sm:$0xff] %vm210_vm2, %v208_v53  ;;  %226 = vst.msk [vmem:[#allocation2 + $0x78] sm:$0xff] %vm210_vm2, %v209_v54 }
  0x30 LB: >> { %v8012_v2 = vld [vmem:[#allocation4_spill] sm:$0xff]  ;;  %v8016_v11 = vld [vmem:[#allocation13_spill] sm:$0xff]  ;;  %v5916_v5 = vld [vmem:[#allocation2] sm:$0xff]  ;;  %p5189_p4 = scmp.ne.s32.totalorder %s5603_s23, 9  ;;  %s5603_s23 = sphi %s5837_s23, %s284_s23  }
  0x31   : >> { %5419 = vmatprep.mubr.msk.f32.mxu0 %vm210_vm2, %v8016_v11  ;;  %v8017_v36 = vld [vmem:[#allocation37_spill] sm:$0xff]  ;;  %v5896_v7 = vld [vmem:[#allocation2 + $0x20] sm:$0xff]  ;;  %8030 = vst [vmem:[#allocation68_spill] sm:$0xff] %v5916_v5  ;;  %v8032_v12 = vld [vmem:[#allocation14_spill] sm:$0xff] }
  0x32   : >> { %5443 = vmatprep.mubr.msk.f32.mxu1 %vm210_vm2, %v8017_v36  ;;  %8026 = vst [vmem:[#allocation64_spill] sm:$0xff] %v5896_v7  ;;  %v5906_v6 = vld [vmem:[#allocation2 + $0x10] sm:$0xff]  ;;  %v8031_v34 = vld [vmem:[#allocation35_spill] sm:$0xff]  ;;  %v8033_v37 = vld [vmem:[#allocation38_spill] sm:$0xff] }
  0x33   : >> { %v5874_v25 = vld [vmem:[#allocation2 + $0x48] sm:$0xff]  ;;  %v5876_v8 = vld [vmem:[#allocation2 + $0x40] sm:$0xff]  ;;  %8028 = vst [vmem:[#allocation66_spill] sm:$0xff] %v5906_v6  ;;  %v8036_v16 = vld [vmem:[#allocation18_spill] sm:$0xff] }
  0x34   : >> { %v5862_v63 = vld [vmem:[#allocation2 + $0x58] sm:$0xff]  ;;  %v5865_v52 = vld [vmem:[#allocation2 + $0x50] sm:$0xff]  ;;  %8021 = vst [vmem:[#allocation59_spill] sm:$0xff] %v5874_v25  ;;  %8022 = vst [vmem:[#allocation60_spill] sm:$0xff] %v5876_v8 }
  0x35   : >> { %v5846_v57 = vld [vmem:[#allocation2 + $0x68] sm:$0xff]  ;;  %v5856_v60 = vld [vmem:[#allocation2 + $0x60] sm:$0xff]  ;;  %8019 = vst [vmem:[#allocation57_spill] sm:$0xff] %v5862_v63  ;;  %8020 = vst [vmem:[#allocation58_spill] sm:$0xff] %v5865_v52  ;;  %v312_v0 = vmul.f32 %v5862_v63, %v5862_v63  ;;  %v311_v9 = vmul.f32 %v5865_v52, %v5865_v52 }
  0x36   : >> { %v5842_v55 = vld [vmem:[#allocation2 + $0x78] sm:$0xff]  ;;  %v5844_v56 = vld [vmem:[#allocation2 + $0x70] sm:$0xff]  ;;  %8015 = vst [vmem:[#allocation55_spill] sm:$0xff] %v5846_v57  ;;  %8018 = vst [vmem:[#allocation56_spill] sm:$0xff] %v5856_v60  ;;  %v314_v61 = vmul.f32 %v5846_v57, %v5846_v57  ;;  %v313_v62 = vmul.f32 %v5856_v60, %v5856_v60 }
  0x37   : >> { %8013 = vst [vmem:[#allocation53_spill] sm:$0xff] %v5842_v55  ;;  %8014 = vst [vmem:[#allocation54_spill] sm:$0xff] %v5844_v56  ;;  %v316_v58 = vmul.f32 %v5842_v55, %v5842_v55  ;;  %v315_v59 = vmul.f32 %v5844_v56, %v5844_v56  ;;  %v395_v14 = vmul.f32 -2.0, %v5844_v56  ;;  %v8034_v13 = vld [vmem:[#allocation15_spill] sm:$0xff]  ;;  %v8037_v39 = vld [vmem:[#allocation40_spill] sm:$0xff] }
  0x38   : >> { %v356_v53 = vsel %vm210_vm2, %v314_v61, 0.0  ;;  %v353_v26 = vsel %vm210_vm2, %v313_v62, 0.0  ;;  %v347_v61 = vsel %vm210_vm2, %v311_v9, 0.0  ;;  %v5884_v62 = vld [vmem:[#allocation2 + $0x38] sm:$0xff]  ;;  %v5894_v9 = vld [vmem:[#allocation2 + $0x28] sm:$0xff]  ;;  %v8035_v38 = vld [vmem:[#allocation39_spill] sm:$0xff] }
  0x39   : >> { %v362_v33 = vsel %vm210_vm2, %v316_v58, 0.0  ;;  %v359_v54 = vsel %vm210_vm2, %v315_v59, 0.0  ;;  %357 = vadd.xlane.f32.xlu1 %v356_v53  ;;  %v350_v58 = vsel %vm210_vm2, %v312_v0, 0.0  ;;  %v310_v59 = vmul.f32 %v5874_v25, %v5874_v25  ;;  %8023 = vst [vmem:[#allocation61_spill] sm:$0xff] %v5884_v62  ;;  %v5886_v53 = vld [vmem:[#allocation2 + $0x30] sm:$0xff]  ;;  %8025 = vst [vmem:[#allocation63_spill] sm:$0xff] %v5894_v9 }
  0x3a   : >> { %363 = vadd.xlane.f32.xlu0 %v362_v33  ;;  %v309_v33 = vmul.f32 %v5876_v8, %v5876_v8  ;;  %8024 = vst [vmem:[#allocation62_spill] sm:$0xff] %v5886_v53  ;;  %v8038_v17 = vld [vmem:[#allocation19_spill] sm:$0xff]  ;;  %v8039_v40 = vld [vmem:[#allocation41_spill] sm:$0xff]  ;;  %v8040_v18 = vld [vmem:[#allocation20_spill] sm:$0xff] }
  0x3b   : >> { %v344_v21 = vsel %vm210_vm2, %v310_v59, 0.0  ;;  %v8041_v41 = vld [vmem:[#allocation42_spill] sm:$0xff]  ;;  %v8042_v22 = vld [vmem:[#allocation24_spill] sm:$0xff]  ;;  %v8043_v42 = vld [vmem:[#allocation43_spill] sm:$0xff] }
  0x3c   : >> { %v341_v0 = vsel %vm210_vm2, %v309_v33, 0.0  ;;  %v5904_v33 = vld [vmem:[#allocation2 + $0x18] sm:$0xff]  ;;  %v8044_v23 = vld [vmem:[#allocation25_spill] sm:$0xff]  ;;  %v8045_v43 = vld [vmem:[#allocation44_spill] sm:$0xff] }
  0x3d   : >> { %354 = vadd.xlane.f32.xlu1 %v353_v26  ;;  %v308_v26 = vmul.f32 %v5884_v62, %v5884_v62  ;;  %8027 = vst [vmem:[#allocation65_spill] sm:$0xff] %v5904_v33  ;;  %v8046_v24 = vld [vmem:[#allocation26_spill] sm:$0xff]  ;;  %v8047_v44 = vld [vmem:[#allocation45_spill] sm:$0xff]  ;;  %v8051_v46 = vld [vmem:[#allocation47_spill] sm:$0xff] }
  0x3e   : >> { %360 = vadd.xlane.f32.xlu0 %v359_v54  ;;  %v307_v54 = vmul.f32 %v5886_v53, %v5886_v53  ;;  %v8048_v27 = vld [vmem:[#allocation29_spill] sm:$0xff]  ;;  %v8049_v45 = vld [vmem:[#allocation46_spill] sm:$0xff]  ;;  %v8052_v29 = vld [vmem:[#allocation31_spill] sm:$0xff] }
  0x3f   : >> { %v338_v20 = vsel %vm210_vm2, %v308_v26, 0.0  ;;  %v8050_v28 = vld [vmem:[#allocation30_spill] sm:$0xff]  ;;  %v8053_v47 = vld [vmem:[#allocation48_spill] sm:$0xff]  ;;  %v8055_v48 = vld [vmem:[#allocation49_spill] sm:$0xff] }
  0x40   : >> { %v335_v59 = vsel %vm210_vm2, %v307_v54, 0.0  ;;  %v5914_v54 = vld [vmem:[#allocation2 + $0x8] sm:$0xff]  ;;  %v8056_v31 = vld [vmem:[#allocation33_spill] sm:$0xff]  ;;  %v8057_v49 = vld [vmem:[#allocation50_spill] sm:$0xff] }
  0x41   : >> { %348 = vadd.xlane.f32.xlu1 %v347_v61  ;;  %v305_v61 = vmul.f32 %v5896_v7, %v5896_v7  ;;  %8029 = vst [vmem:[#allocation67_spill] sm:$0xff] %v5914_v54  ;;  %v8054_v30 = vld [vmem:[#allocation32_spill] sm:$0xff]  ;;  %v8058_v32 = vld [vmem:[#allocation34_spill] sm:$0xff]  ;;  %v8059_v50 = vld [vmem:[#allocation51_spill] sm:$0xff] }
  0x42   : >> { %351 = vadd.xlane.f32.xlu0 %v350_v58  ;;  %v306_v58 = vmul.f32 %v5894_v9, %v5894_v9  ;;  %v8060_v35 = vld [vmem:[#allocation36_spill] sm:$0xff] }
  0x43   : >> { %v329_v26 = vsel %vm210_vm2, %v305_v61, 0.0  ;;  %v8061_v51 = vld [vmem:[#allocation52_spill] sm:$0xff] }
  0x44   : >> { %v332_v19 = vsel %vm210_vm2, %v306_v58, 0.0 }
  0x45   : >> { %342 = vadd.xlane.f32.xlu1 %v341_v0  ;;  %v303_v0 = vmul.f32 %v5906_v6, %v5906_v6 }
  0x46   : >> { %345 = vadd.xlane.f32.xlu0 %v344_v21  ;;  %v304_v21 = vmul.f32 %v5904_v33, %v5904_v33 }
  0x47   : >> { %v323_v58 = vsel %vm210_vm2, %v303_v0, 0.0  ;;  %v394_v0 = vmul.f32 -2.0, %v5846_v57 }
  0x48   : >> { %v326_v15 = vsel %vm210_vm2, %v304_v21, 0.0 }
  0x49   : >> { %336 = vadd.xlane.f32.xlu1 %v335_v59  ;;  %v301_v59 = vmul.f32 %v5916_v5, %v5916_v5 }
  0x4a   : >> { %339 = vadd.xlane.f32.xlu0 %v338_v20  ;;  %v302_v20 = vmul.f32 %v5914_v54, %v5914_v54 }
  0x4b   : >> { %v317_v4 = vsel %vm210_vm2, %v301_v59, 0.0  ;;  %v393_v59 = vmul.f32 -2.0, %v5856_v60 }
  0x4c   : >> { %v320_v61 = vsel %vm210_vm2, %v302_v20, 0.0 }
  0x4d   : >> { %330 = vadd.xlane.f32.xlu1 %v329_v26 }
  0x4e   : >> { %333 = vadd.xlane.f32.xlu0 %v332_v19  ;;  %v396_v19 = vmul.f32 -2.0, %v5842_v55 }
  0x51   : >> { %324 = vadd.xlane.f32.xlu1 %v323_v58 }
  0x52   : >> { %327 = vadd.xlane.f32.xlu0 %v326_v15 }
  0x55   : >> { %318 = vadd.xlane.f32.xlu1 %v317_v4 }
  0x56   : >> { %321 = vadd.xlane.f32.xlu0 %v320_v61 }
  0xc2   : >> { %v358_v3 = vpop.xlane.xlu1 %357 }
  0xc3   : >> { %v364_v26 = vpop.xlane.xlu0 %363  ;;  %v378_v15 = vadd.f32 1e+30, %v358_v3 }
  0xc4   : >> { %v380_v21 = vadd.f32 1e+30, %v364_v26 }
  0xc6   : >> { %v412_v11 = vsel %vm246_vm0, %v380_v21, %v396_v19  ;;  %v355_v4 = vpop.xlane.xlu1 %354  ;;  %v410_v19 = vsel %vm246_vm0, %v378_v15, %v394_v0  ;;  %v391_v15 = vmul.f32 -2.0, %v5865_v52 }
  0xc7   : >> { %5387 = vmatprep.subr.msk.mxu0 %vm210_vm2, %v412_v11  ;;  %5467 = vmatprep.subr.msk.mxu1 %vm210_vm2, %v412_v11  ;;  %v361_v20 = vpop.xlane.xlu0 %360  ;;  %v377_v3 = vadd.f32 1e+30, %v355_v4 }
  0xc8   : >> { %v379_v58 = vadd.f32 1e+30, %v361_v20  ;;  %5388 = vmatpush3.xpose.msk.msra.mxu0 %vm210_vm2, %v412_v11  ;;  %5483 = vmatpush3.xpose.msk.msra.mxu1 %vm210_vm2, %v412_v11  ;;  %v392_v11 = vmul.f32 -2.0, %v5862_v63 }
  0xca   : >> { %v411_v61 = vsel %vm246_vm0, %v379_v58, %v395_v14  ;;  %v409_v14 = vsel %vm246_vm0, %v377_v3, %v393_v59  ;;  %v349_v0 = vpop.xlane.xlu1 %348  ;;  %v390_v59 = vmul.f32 -2.0, %v5874_v25 }
  0xcb   : >> { %5389 = vmatprep.subr.msk.mxu0 %vm210_vm2, %v411_v61  ;;  %5468 = vmatprep.subr.msk.mxu1 %vm210_vm2, %v411_v61  ;;  %v352_v26 = vpop.xlane.xlu0 %351  ;;  %v375_v58 = vadd.f32 1e+30, %v349_v0  ;;  %v388_v0 = vmul.f32 -2.0, %v5884_v62 }
  0xcc   : >> { %5390 = vmatpush3.xpose.msk.msra.mxu0 %vm210_vm2, %v411_v61  ;;  %5484 = vmatpush3.xpose.msk.msra.mxu1 %vm210_vm2, %v411_v61  ;;  %v376_v21 = vadd.f32 1e+30, %v352_v26  ;;  %v389_v26 = vmul.f32 -2.0, %v5876_v8 }
  0xcd   : >> { %5391 = vmatprep.subr.msk.mxu0 %vm210_vm2, %v410_v19  ;;  %5469 = vmatprep.subr.msk.mxu1 %vm210_vm2, %v410_v19  ;;  %v407_v61 = vsel %vm246_vm0, %v375_v58, %v391_v15 }
  0xce   : >> { %v408_v20 = vsel %vm246_vm0, %v376_v21, %v392_v11  ;;  %v343_v3 = vpop.xlane.xlu1 %342 }
  0xcf   : >> { %v346_v4 = vpop.xlane.xlu0 %345 }
  0xd0   : >> { %5392 = vmatpush3.xpose.msk.msra.mxu0 %vm210_vm2, %v410_v19  ;;  %5485 = vmatpush3.xpose.msk.msra.mxu1 %vm210_vm2, %v410_v19  ;;  %v374_v19 = vadd.f32 1e+30, %v346_v4  ;;  %v387_v4 = vmul.f32 -2.0, %v5886_v53 }
  0xd1   : >> { %5393 = vmatprep.subr.msk.mxu0 %vm210_vm2, %v409_v14  ;;  %5470 = vmatprep.subr.msk.mxu1 %vm210_vm2, %v409_v14 }
  0xd2   : >> { %v406_v11 = vsel %vm246_vm0, %v374_v19, %v390_v59  ;;  %v337_v58 = vpop.xlane.xlu1 %336 }
  0xd3   : >> { %v340_v21 = vpop.xlane.xlu0 %339 }
  0xd4   : >> { %5394 = vmatpush3.xpose.msk.msra.mxu0 %vm210_vm2, %v409_v14  ;;  %5486 = vmatpush3.xpose.msk.msra.mxu1 %vm210_vm2, %v409_v14  ;;  %v373_v14 = vadd.f32 1e+30, %v343_v3  ;;  %v386_v3 = vmul.f32 -2.0, %v5894_v9 }
  0xd5   : >> { %5395 = vmatprep.subr.msk.mxu0 %vm210_vm2, %v408_v20  ;;  %5471 = vmatprep.subr.msk.mxu1 %vm210_vm2, %v408_v20 }
  0xd6   : >> { %v405_v15 = vsel %vm246_vm0, %v373_v14, %v389_v26  ;;  %v331_v14 = vpop.xlane.xlu1 %330 }
  0xd7   : >> { %v334_v19 = vpop.xlane.xlu0 %333 }
  0xd8   : >> { %5396 = vmatpush3.xpose.msk.msra.mxu0 %vm210_vm2, %v408_v20  ;;  %5487 = vmatpush3.xpose.msk.msra.mxu1 %vm210_vm2, %v408_v20  ;;  %v372_v20 = vadd.f32 1e+30, %v340_v21  ;;  %v385_v21 = vmul.f32 -2.0, %v5896_v7 }
  0xd9   : >> { %5397 = vmatprep.subr.msk.mxu0 %vm210_vm2, %v407_v61  ;;  %5472 = vmatprep.subr.msk.mxu1 %vm210_vm2, %v407_v61 }
  0xda   : >> { %v404_v59 = vsel %vm246_vm0, %v372_v20, %v388_v0 }
  0xdb   : >> { %v328_v20 = vpop.xlane.xlu0 %327 }
  0xdc   : >> { %5398 = vmatpush3.xpose.msk.msra.mxu0 %vm210_vm2, %v407_v61  ;;  %5488 = vmatpush3.xpose.msk.msra.mxu1 %vm210_vm2, %v407_v61  ;;  %v371_v61 = vadd.f32 1e+30, %v337_v58  ;;  %v384_v58 = vmul.f32 -2.0, %v5904_v33 }
  0xdd   : >> { %5399 = vmatprep.subr.msk.mxu0 %vm210_vm2, %v406_v11  ;;  %5473 = vmatprep.subr.msk.mxu1 %vm210_vm2, %v406_v11 }
  0xde   : >> { %v403_v26 = vsel %vm246_vm0, %v371_v61, %v387_v4  ;;  %v325_v61 = vpop.xlane.xlu1 %324 }
  0xe0   : >> { %5400 = vmatpush3.xpose.msk.msra.mxu0 %vm210_vm2, %v406_v11  ;;  %5489 = vmatpush3.xpose.msk.msra.mxu1 %vm210_vm2, %v406_v11  ;;  %v370_v11 = vadd.f32 1e+30, %v334_v19  ;;  %v383_v19 = vmul.f32 -2.0, %v5906_v6 }
  0xe1   : >> { %5401 = vmatprep.subr.msk.mxu0 %vm210_vm2, %v405_v15  ;;  %5474 = vmatprep.subr.msk.mxu1 %vm210_vm2, %v405_v15 }
  0xe2   : >> { %v402_v0 = vsel %vm246_vm0, %v370_v11, %v386_v3  ;;  %v322_v11 = vpop.xlane.xlu0 %321 }
  0xe4   : >> { %5402 = vmatpush3.xpose.msk.msra.mxu0 %vm210_vm2, %v405_v15  ;;  %5490 = vmatpush3.xpose.msk.msra.mxu1 %vm210_vm2, %v405_v15  ;;  %v369_v15 = vadd.f32 1e+30, %v331_v14  ;;  %v382_v14 = vmul.f32 -2.0, %v5914_v54 }
  0xe5   : >> { %5403 = vmatprep.subr.msk.mxu0 %vm210_vm2, %v404_v59  ;;  %5475 = vmatprep.subr.msk.mxu1 %vm210_vm2, %v404_v59 }
  0xe6   : >> { %v401_v4 = vsel %vm246_vm0, %v369_v15, %v385_v21  ;;  %v319_v15 = vpop.xlane.xlu1 %318 }
  0xe8   : >> { %5404 = vmatpush3.xpose.msk.msra.mxu0 %vm210_vm2, %v404_v59  ;;  %5491 = vmatpush3.xpose.msk.msra.mxu1 %vm210_vm2, %v404_v59  ;;  %v368_v59 = vadd.f32 1e+30, %v328_v20  ;;  %v381_v20 = vmul.f32 -2.0, %v5916_v5 }
  0xe9   : >> { %5405 = vmatprep.subr.msk.mxu0 %vm210_vm2, %v403_v26  ;;  %5476 = vmatprep.subr.msk.mxu1 %vm210_vm2, %v403_v26 }
  0xea   : >> { %v400_v3 = vsel %vm246_vm0, %v368_v59, %v384_v58 }
  0xec   : >> { %5406 = vmatpush3.xpose.msk.msra.mxu0 %vm210_vm2, %v403_v26  ;;  %5492 = vmatpush3.xpose.msk.msra.mxu1 %vm210_vm2, %v403_v26  ;;  %v367_v26 = vadd.f32 1e+30, %v325_v61 }
  0xed   : >> { %5407 = vmatprep.subr.msk.mxu0 %vm210_vm2, %v402_v0  ;;  %5477 = vmatprep.subr.msk.mxu1 %vm210_vm2, %v402_v0 }
  0xee   : >> { %v399_v21 = vsel %vm246_vm0, %v367_v26, %v383_v19 }
  0xf0   : >> { %5408 = vmatpush3.xpose.msk.msra.mxu0 %vm210_vm2, %v402_v0  ;;  %5493 = vmatpush3.xpose.msk.msra.mxu1 %vm210_vm2, %v402_v0  ;;  %v366_v0 = vadd.f32 1e+30, %v322_v11 }
  0xf1   : >> { %5409 = vmatprep.subr.msk.mxu0 %vm210_vm2, %v401_v4  ;;  %5478 = vmatprep.subr.msk.mxu1 %vm210_vm2, %v401_v4 }
  0xf2   : >> { %v398_v58 = vsel %vm246_vm0, %v366_v0, %v382_v14 }
  0xf4   : >> { %5410 = vmatpush3.xpose.msk.msra.mxu0 %vm210_vm2, %v401_v4  ;;  %5494 = vmatpush3.xpose.msk.msra.mxu1 %vm210_vm2, %v401_v4  ;;  %v365_v4 = vadd.f32 %v319_v15, %v8031_v34 }
  0xf5   : >> { %5411 = vmatprep.subr.msk.mxu0 %vm210_vm2, %v400_v3  ;;  %5479 = vmatprep.subr.msk.mxu1 %vm210_vm2, %v400_v3 }
  0xf6   : >> { %v397_v59 = vsel %vm246_vm0, %v365_v4, %v381_v20 }
  0xf8   : >> { %5412 = vmatpush3.xpose.msk.msra.mxu0 %vm210_vm2, %v400_v3  ;;  %5495 = vmatpush3.xpose.msk.msra.mxu1 %vm210_vm2, %v400_v3 }
  0xf9   : >> { %5413 = vmatprep.subr.msk.mxu0 %vm210_vm2, %v399_v21  ;;  %5480 = vmatprep.subr.msk.mxu1 %vm210_vm2, %v399_v21 }
  0xfc   : >> { %5414 = vmatpush3.xpose.msk.msra.mxu0 %vm210_vm2, %v399_v21  ;;  %5496 = vmatpush3.xpose.msk.msra.mxu1 %vm210_vm2, %v399_v21 }
  0xfd   : >> { %5415 = vmatprep.subr.msk.mxu0 %vm210_vm2, %v398_v58  ;;  %5481 = vmatprep.subr.msk.mxu1 %vm210_vm2, %v398_v58 }
 0x100   : >> { %5416 = vmatpush3.xpose.msk.msra.mxu0 %vm210_vm2, %v398_v58  ;;  %5497 = vmatpush3.xpose.msk.msra.mxu1 %vm210_vm2, %v398_v58 }
 0x101   : >> { %5417 = vmatprep.subr.msk.mxu0 %vm210_vm2, %v397_v59  ;;  %5482 = vmatprep.subr.msk.mxu1 %vm210_vm2, %v397_v59 }
 0x104   : >> { %5418 = vmatpush3.xpose.msk.msra.mxu0 %vm210_vm2, %v397_v59  ;;  %5498 = vmatpush3.xpose.msk.msra.mxu1 %vm210_vm2, %v397_v59 }
 0x107   : >> { %5420 = vmatmul.mubr.msk.f32.vlgmr.msra.gmra.mxu0 %vm210_vm2, %v8032_v12  ;;  %5444 = vmatmul.mubr.msk.f32.vlgmr.msra.gmra.mxu1 %vm210_vm2, %v8033_v37 }
 0x108   : >> { %5422 = vmatprep.mubr.msk.f32.mxu0 %vm210_vm2, %v8034_v13  ;;  %5446 = vmatprep.mubr.msk.f32.mxu1 %vm210_vm2, %v8035_v38 }
 0x10b   : >> { %5423 = vmatmul.mubr.msk.f32.gmra.mxu0 %vm210_vm2, %v8036_v16  ;;  %5447 = vmatmul.mubr.msk.f32.gmra.mxu1 %vm210_vm2, %v8037_v39 }
 0x10c   : >> { %5425 = vmatprep.mubr.msk.f32.mxu0 %vm210_vm2, %v8038_v17  ;;  %5449 = vmatprep.mubr.msk.f32.mxu1 %vm210_vm2, %v8039_v40 }
 0x10f   : >> { %5426 = vmatmul.mubr.msk.f32.gmra.mxu0 %vm210_vm2, %v8040_v18  ;;  %5450 = vmatmul.mubr.msk.f32.gmra.mxu1 %vm210_vm2, %v8041_v41 }
 0x110   : >> { %5428 = vmatprep.mubr.msk.f32.mxu0 %vm210_vm2, %v8042_v22  ;;  %5452 = vmatprep.mubr.msk.f32.mxu1 %vm210_vm2, %v8043_v42 }
 0x113   : >> { %5429 = vmatmul.mubr.msk.f32.gmra.mxu0 %vm210_vm2, %v8044_v23  ;;  %5453 = vmatmul.mubr.msk.f32.gmra.mxu1 %vm210_vm2, %v8045_v43 }
 0x114   : >> { %5431 = vmatprep.mubr.msk.f32.mxu0 %vm210_vm2, %v8046_v24  ;;  %5455 = vmatprep.mubr.msk.f32.mxu1 %vm210_vm2, %v8047_v44 }
 0x117   : >> { %5432 = vmatmul.mubr.msk.f32.gmra.mxu0 %vm210_vm2, %v8048_v27  ;;  %5456 = vmatmul.mubr.msk.f32.gmra.mxu1 %vm210_vm2, %v8049_v45 }
 0x118   : >> { %5434 = vmatprep.mubr.msk.f32.mxu0 %vm210_vm2, %v8050_v28  ;;  %5458 = vmatprep.mubr.msk.f32.mxu1 %vm210_vm2, %v8051_v46 }
 0x11b   : >> { %5435 = vmatmul.mubr.msk.f32.gmra.mxu0 %vm210_vm2, %v8052_v29  ;;  %5459 = vmatmul.mubr.msk.f32.gmra.mxu1 %vm210_vm2, %v8053_v47 }
 0x11c   : >> { %5437 = vmatprep.mubr.msk.f32.mxu0 %vm210_vm2, %v8054_v30  ;;  %5461 = vmatprep.mubr.msk.f32.mxu1 %vm210_vm2, %v8055_v48 }
 0x11f   : >> { %5438 = vmatmul.mubr.msk.f32.gmra.mxu0 %vm210_vm2, %v8056_v31  ;;  %5462 = vmatmul.mubr.msk.f32.gmra.mxu1 %vm210_vm2, %v8057_v49 }
 0x120   : >> { %5440 = vmatprep.mubr.msk.f32.mxu0 %vm210_vm2, %v8058_v32  ;;  %5464 = vmatprep.mubr.msk.f32.mxu1 %vm210_vm2, %v8059_v50 }
 0x123   : >> { %5441 = vmatmul.mubr.msk.f32.gmra.mxu0 %vm210_vm2, %v8060_v35  ;;  %5465 = vmatmul.mubr.msk.f32.gmra.mxu1 %vm210_vm2, %v8061_v51 }
 0x1c7   : >> { %v5421_v61 = vpop.f32.mrf.mxu0  ;;  %v5445_v19 = vpop.f32.mrf.mxu1 }
 0x1c8   : >> { %vm815_vm3 = vcmp.lt.s32.totalorder %v5421_v61, 0  ;;  %v847_v3 = vxor.u32 2147483647, %v5421_v61  ;;  %v863_v26 = vxor.u32 2147483647, %v5445_v19  ;;  %vm831_vm4 = vcmp.lt.s32.totalorder %v5445_v19, 0 }
 0x1c9   : >> { %v623_v11 = vpop.f32.mrf.mxu0  ;;  %v703_v14 = vpop.f32.mrf.mxu1 }
 0x1ca   : >> { %v879_v21 = vsel %vm815_vm3, %v847_v3, %v5421_v61  ;;  %vm814_vm5 = vcmp.lt.s32.totalorder %v623_v11, 0  ;;  %v846_v0 = vxor.u32 2147483647, %v623_v11  ;;  %vm830_vm6 = vcmp.lt.s32.totalorder %v703_v14, 0 }
 0x1cb   : >> { %v911_v15 = vand.u32 4294967292, %v879_v21  ;;  %v862_v20 = vxor.u32 2147483647, %v703_v14  ;;  %v5424_v58 = vpop.f32.mrf.mxu0  ;;  %v5448_v4 = vpop.f32.mrf.mxu1  ;;  %v895_v59 = vsel %vm831_vm4, %v863_v26, %v5445_v19 }
 0x1cc   : >> { %v878_v34 = vsel %vm814_vm5, %v846_v0, %v623_v11  ;;  %vm817_vm7 = vcmp.lt.s32.totalorder %v5424_v58, 0  ;;  %v849_v55 = vxor.u32 2147483647, %v5424_v58  ;;  %v865_v57 = vxor.u32 2147483647, %v5448_v4 }
 0x1cd   : >> { %v910_v56 = vand.u32 4294967292, %v878_v34  ;;  %v894_v62 = vsel %vm830_vm6, %v862_v20, %v703_v14  ;;  %v633_v60 = vpop.f32.mrf.mxu0  ;;  %v713_v53 = vpop.f32.mrf.mxu1  ;;  %v6100_v63 = vor.u32 %v911_v15, %v8012_v2  ;;  %vm833_vm9 = vcmp.lt.s32.totalorder %v5448_v4, 0 }
 0x1ce   : >> { %v881_v61 = vsel %vm817_vm7, %v849_v55, %v5424_v58  ;;  %vm816_vm8 = vcmp.lt.s32.totalorder %v633_v60, 0  ;;  %v848_v3 = vxor.u32 2147483647, %v633_v60  ;;  %vm832_vm10 = vcmp.lt.s32.totalorder %v713_v53, 0 }
 0x1cf   : >> { %v864_v21 = vxor.u32 2147483647, %v713_v53  ;;  %v5427_v52 = vpop.f32.mrf.mxu0  ;;  %v927_v9 = vand.u32 4294967292, %v895_v59  ;;  %v926_v19 = vand.u32 4294967292, %v894_v62  ;;  %v989_v11 = vshra.s32 %v6100_v63, 16  ;;  %v5451_v34 = vpop.f32.mrf.mxu1 }
 0x1d0   : >> { %v880_v26 = vsel %vm816_vm8, %v848_v3, %v633_v60  ;;  %v913_v14 = vand.u32 4294967292, %v881_v61  ;;  %v897_v0 = vsel %vm833_vm9, %v865_v57, %v5448_v4  ;;  %v851_v20 = vxor.u32 2147483647, %v5427_v52 }
 0x1d1   : >> { %v6104_v7 = vor.u32 %v910_v56, %v8012_v2  ;;  %v643_v15 = vpop.f32.mrf.mxu0  ;;  %v896_v55 = vsel %vm832_vm10, %v864_v21, %v713_v53  ;;  %v6106_v58 = vcvt.s32.f32 %v989_v11  ;;  %vm819_vm11 = vcmp.lt.s32.totalorder %v5427_v52, 0  ;;  %v723_v56 = vpop.f32.mrf.mxu1 }
 0x1d2   : >> { %v850_v33 = vxor.u32 2147483647, %v643_v15  ;;  %v912_v54 = vand.u32 4294967292, %v880_v26  ;;  %vm818_vm12 = vcmp.lt.s32.totalorder %v643_v15, 0  ;;  %v867_v60 = vxor.u32 2147483647, %v5451_v34 }
 0x1d3   : >> { %v975_v59 = vshra.s32 %v6104_v7, 16  ;;  %v5430_v62 = vpop.f32.mrf.mxu0  ;;  %992 = vmin.xlane.f32.xlu1 %v6106_v58  ;;  %vm835_vm13 = vcmp.lt.s32.totalorder %v5451_v34, 0  ;;  %v6111_v57 = vor.u32 %v927_v9, %v8012_v2  ;;  %v929_v4 = vand.u32 4294967292, %v897_v0  ;;  %v5454_v8 = vpop.f32.mrf.mxu1 }
 0x1d4   : >> { %v928_v61 = vand.u32 4294967292, %v896_v55  ;;  %v883_v53 = vsel %vm819_vm11, %v851_v20, %v5427_v52  ;;  %v882_v21 = vsel %vm818_vm12, %v850_v33, %v643_v15  ;;  %v6117_v11 = vor.u32 %v926_v19, %v8012_v2 }
 0x1d5   : >> { %v6113_v3 = vcvt.s32.f32 %v975_v59  ;;  %v1213_v26 = vshra.s32 %v6111_v57, 16  ;;  %v6120_v6 = vor.u32 %v913_v14, %v8012_v2  ;;  %v899_v9 = vsel %vm835_vm13, %v867_v60, %v5451_v34  ;;  %v653_v52 = vpop.f32.mrf.mxu0 }
 0x1d6   : >> { %vm834_vm14 = vcmp.lt.s32.totalorder %v723_v56, 0  ;;  %v866_v25 = vxor.u32 2147483647, %v723_v56  ;;  %v6124_v0 = vor.u32 %v912_v54, %v8012_v2  ;;  %v1199_v33 = vshra.s32 %v6117_v11, 16  ;;  %v733_v54 = vpop.f32.mrf.mxu1 }
 0x1d7   : >> { %978 = vmin.xlane.f32.xlu0 %v6113_v3  ;;  %v6126_v20 = vcvt.s32.f32 %v1213_v26  ;;  %v1017_v19 = vshra.s32 %v6120_v6, 16  ;;  %v853_v15 = vxor.u32 2147483647, %v5430_v62  ;;  %v915_v55 = vand.u32 4294967292, %v883_v53  ;;  %v5433_v5 = vpop.f32.mrf.mxu0 }
 0x1d8   : >> { %vm821_vm15 = vcmp.lt.s32.totalorder %v5430_v62, 0  ;;  %v914_v14 = vand.u32 4294967292, %v882_v21  ;;  %v6131_v59 = vcvt.s32.f32 %v1199_v33  ;;  %v1003_v34 = vshra.s32 %v6124_v0, 16 }
 0x1d9   : >> { %1216 = vmin.xlane.f32.xlu1 %v6126_v20  ;;  %v852_v60 = vxor.u32 2147483647, %v653_v52  ;;  %v931_v36 = vand.u32 4294967292, %v899_v9  ;;  %v898_v26 = vsel %vm834_vm14, %v866_v25, %v723_v56  ;;  %vm820_vm1 = vcmp.lt.s32.totalorder %v653_v52, 0 }
 0x1da   : >> { %v6136_v12 = vor.u32 %v929_v4, %v8012_v2  ;;  %v6139_v53 = vcvt.s32.f32 %v1017_v19  ;;  %v885_v21 = vsel %vm821_vm15, %v853_v15, %v5430_v62  ;;  %v869_v10 = vxor.u32 2147483647, %v5454_v8  ;;  %v663_v62 = vpop.f32.mrf.mxu0  ;;  %v5457_v19 = vpop.f32.mrf.mxu1 }
 0x1db   : >> { %1202 = vmin.xlane.f32.xlu0 %v6131_v59  ;;  %v6142_v33 = vor.u32 %v928_v61, %v8012_v2  ;;  %vm837_vm3 = vcmp.lt.s32.totalorder %v5454_v8, 0  ;;  %v868_v13 = vxor.u32 2147483647, %v733_v54  ;;  %v6146_v9 = vor.u32 %v915_v55, %v8012_v2 }
 0x1dc   : >> { %v1241_v37 = vshra.s32 %v6136_v12, 16  ;;  %v6149_v25 = vcvt.s32.f32 %v1003_v34  ;;  %v884_v56 = vsel %vm820_vm1, %v852_v60, %v653_v52  ;;  %vm836_vm4 = vcmp.lt.s32.totalorder %v733_v54, 0  ;;  %v743_v40 = vpop.f32.mrf.mxu1 }
 0x1dd   : >> { %1020 = vmin.xlane.f32.xlu1 %v6139_v53  ;;  %v1227_v4 = vshra.s32 %v6142_v33, 16  ;;  %v930_v15 = vand.u32 4294967292, %v898_v26  ;;  %v917_v61 = vand.u32 4294967292, %v885_v21  ;;  %v855_v38 = vxor.u32 2147483647, %v5433_v5 }
 0x1de   : >> { %v6153_v16 = vor.u32 %v914_v14, %v8012_v2  ;;  %v901_v55 = vsel %vm837_vm3, %v869_v10, %v5454_v8  ;;  %v6157_v39 = vcvt.s32.f32 %v1241_v37  ;;  %v1045_v34 = vshra.s32 %v6146_v9, 16  ;;  %v5436_v8 = vpop.f32.mrf.mxu0 }
 0x1df   : >> { %1006 = vmin.xlane.f32.xlu0 %v6149_v25  ;;  %vm823_vm5 = vcmp.lt.s32.totalorder %v5433_v5, 0  ;;  %v916_v52 = vand.u32 4294967292, %v884_v56  ;;  %v900_v60 = vsel %vm836_vm4, %v868_v13, %v733_v54  ;;  %v854_v17 = vxor.u32 2147483647, %v663_v62 }
 0x1e0   : >> { %v6161_v26 = vcvt.s32.f32 %v1227_v4  ;;  %v1031_v21 = vshra.s32 %v6153_v16, 16  ;;  %vm822_vm6 = vcmp.lt.s32.totalorder %v663_v62, 0  ;;  %v6165_v14 = vor.u32 %v931_v36, %v8012_v2 }
 0x1e1   : >> { %1244 = vmin.xlane.f32.xlu1 %v6157_v39  ;;  %v933_v10 = vand.u32 4294967292, %v901_v55  ;;  %v887_v37 = vsel %vm823_vm5, %v855_v38, %v5433_v5  ;;  %v6168_v18 = vor.u32 %v930_v15, %v8012_v2  ;;  %v6171_v13 = vcvt.s32.f32 %v1045_v34  ;;  %v673_v55 = vpop.f32.mrf.mxu0  ;;  %v5460_v34 = vpop.f32.mrf.mxu1 }
 0x1e2   : >> { %v871_v54 = vxor.u32 2147483647, %v5457_v19  ;;  %v1269_v56 = vshra.s32 %v6165_v14, 16  ;;  %v6175_v4 = vor.u32 %v917_v61, %v8012_v2  ;;  %v932_v41 = vand.u32 4294967292, %v900_v60 }
 0x1e3   : >> { %1230 = vmin.xlane.f32.xlu0 %v6161_v26  ;;  %v886_v36 = vsel %vm822_vm6, %v854_v17, %v663_v62  ;;  %vm839_vm7 = vcmp.lt.s32.totalorder %v5457_v19, 0  ;;  %v870_v22 = vxor.u32 2147483647, %v743_v40  ;;  %v6178_v5 = vcvt.s32.f32 %v1031_v21  ;;  %v753_v44 = vpop.f32.mrf.mxu1 }
 0x1e4   : >> { %vm838_vm8 = vcmp.lt.s32.totalorder %v743_v40, 0  ;;  %v1255_v38 = vshra.s32 %v6168_v18, 16  ;;  %v6182_v15 = vor.u32 %v916_v52, %v8012_v2  ;;  %v919_v42 = vand.u32 4294967292, %v887_v37 }
 0x1e5   : >> { %1048 = vmin.xlane.f32.xlu1 %v6171_v13  ;;  %v857_v23 = vxor.u32 2147483647, %v5436_v8  ;;  %v903_v61 = vsel %vm839_vm7, %v871_v54, %v5457_v19  ;;  %v6185_v17 = vcvt.s32.f32 %v1269_v56  ;;  %v1073_v62 = vshra.s32 %v6175_v4, 16  ;;  %v5439_v54 = vpop.f32.mrf.mxu0  ;;  %v5463_v47 = vpop.f32.mrf.mxu1 }
 0x1e6   : >> { %vm825_vm9 = vcmp.lt.s32.totalorder %v5436_v8, 0  ;;  %v918_v60 = vand.u32 4294967292, %v886_v36  ;;  %v902_v21 = vsel %vm838_vm8, %v870_v22, %v743_v40  ;;  %v856_v43 = vxor.u32 2147483647, %v673_v55 }
 0x1e7   : >> { %1034 = vmin.xlane.f32.xlu0 %v6178_v5  ;;  %v6189_v24 = vor.u32 %v933_v10, %v8012_v2  ;;  %v6192_v52 = vcvt.s32.f32 %v1255_v38  ;;  %v1059_v37 = vshra.s32 %v6182_v15, 16  ;;  %vm824_vm10 = vcmp.lt.s32.totalorder %v673_v55, 0  ;;  %v763_v31 = vpop.f32.mrf.mxu1 }
 0x1e8   : >> { %v6196_v19 = vor.u32 %v932_v41, %v8012_v2  ;;  %v935_v56 = vand.u32 4294967292, %v903_v61  ;;  %v889_v27 = vsel %vm825_vm9, %v857_v23, %v5436_v8  ;;  %v873_v36 = vxor.u32 2147483647, %v5460_v34  ;;  %v683_v61 = vpop.f32.mrf.mxu0 }
 0x1e9   : >> { %1272 = vmin.xlane.f32.xlu1 %v6185_v17  ;;  %v6199_v22 = vcvt.s32.f32 %v1073_v62  ;;  %vm841_vm11 = vcmp.lt.s32.totalorder %v5460_v34, 0  ;;  %v1297_v40 = vshra.s32 %v6189_v24, 16  ;;  %v6203_v10 = vor.u32 %v919_v42, %v8012_v2 }
 0x1ea   : >> { %v934_v38 = vand.u32 4294967292, %v902_v21  ;;  %v888_v45 = vsel %vm824_vm10, %v856_v43, %v673_v55  ;;  %v872_v28 = vxor.u32 2147483647, %v753_v44  ;;  %v6206_v41 = vcvt.s32.f32 %v1059_v37 }
 0x1eb   : >> { %1258 = vmin.xlane.f32.xlu0 %v6192_v52  ;;  %vm840_vm12 = vcmp.lt.s32.totalorder %v753_v44, 0  ;;  %v1283_v23 = vshra.s32 %v6196_v19, 16  ;;  %v6210_v8 = vor.u32 %v918_v60, %v8012_v2  ;;  %v921_v62 = vand.u32 4294967292, %v889_v27 }
 0x1ec   : >> { %v905_v46 = vsel %vm841_vm11, %v873_v36, %v5460_v34  ;;  %v859_v29 = vxor.u32 2147483647, %v5439_v54  ;;  %v6213_v42 = vcvt.s32.f32 %v1297_v40  ;;  %v1101_v43 = vshra.s32 %v6203_v10, 16 }
 0x1ed   : >> { %1076 = vmin.xlane.f32.xlu1 %v6199_v22  ;;  %vm827_vm13 = vcmp.lt.s32.totalorder %v5439_v54, 0  ;;  %v6217_v55 = vor.u32 %v935_v56, %v8012_v2  ;;  %v920_v21 = vand.u32 4294967292, %v888_v45  ;;  %v904_v37 = vsel %vm840_vm12, %v872_v28, %v753_v44  ;;  %v5442_v45 = vpop.f32.mrf.mxu0 }
 0x1ee   : >> { %v858_v30 = vxor.u32 2147483647, %v683_v61  ;;  %v6220_v60 = vcvt.s32.f32 %v1283_v23  ;;  %v1087_v27 = vshra.s32 %v6210_v8, 16  ;;  %vm826_vm14 = vcmp.lt.s32.totalorder %v683_v61, 0 }
 0x1ef   : >> { %1062 = vmin.xlane.f32.xlu0 %v6206_v41  ;;  %v6224_v34 = vor.u32 %v934_v38, %v8012_v2  ;;  %v937_v36 = vand.u32 4294967292, %v905_v46  ;;  %v891_v40 = vsel %vm827_vm13, %v859_v29, %v5439_v54  ;;  %v875_v48 = vxor.u32 2147483647, %v5463_v47 }
 0x1f0   : >> { %v6227_v56 = vcvt.s32.f32 %v1101_v43  ;;  %vm843_vm15 = vcmp.lt.s32.totalorder %v5463_v47, 0  ;;  %v1325_v28 = vshra.s32 %v6217_v55, 16  ;;  %v6231_v44 = vor.u32 %v921_v62, %v8012_v2 }
 0x1f1   : >> { %1300 = vmin.xlane.f32.xlu1 %v6213_v42  ;;  %v936_v23 = vand.u32 4294967292, %v904_v37  ;;  %v890_v49 = vsel %vm826_vm14, %v858_v30, %v683_v61  ;;  %v6234_v38 = vcvt.s32.f32 %v1087_v27  ;;  %v874_v29 = vxor.u32 2147483647, %v763_v31  ;;  %v693_v61 = vpop.f32.mrf.mxu0  ;;  %v5466_v37 = vpop.f32.mrf.mxu1 }
 0x1f2   : >> { %8062 = vst [vmem:[#allocation69_spill] sm:$0xff] %v6231_v44  ;;  %v1311_v46 = vshra.s32 %v6224_v34, 16  ;;  %v6238_v54 = vor.u32 %v920_v21, %v8012_v2  ;;  %v923_v43 = vand.u32 4294967292, %v891_v40  ;;  %v907_v32 = vsel %vm843_vm15, %v875_v48, %v5463_v47 }
 0x1f3   : >> { %1286 = vmin.xlane.f32.xlu0 %v6220_v60  ;;  %vm842_vm1 = vcmp.lt.s32.totalorder %v763_v31, 0  ;;  %v861_v50 = vxor.u32 2147483647, %v5442_v45  ;;  %v6241_v62 = vcvt.s32.f32 %v1325_v28  ;;  %v1129_v30 = vshra.s32 %v6231_v44, 16 }
 0x1f4   : >> { %vm829_vm3 = vcmp.lt.s32.totalorder %v5442_v45, 0  ;;  %v6245_v27 = vor.u32 %v937_v36, %v8012_v2  ;;  %v922_v35 = vand.u32 4294967292, %v890_v49  ;;  %v906_v21 = vsel %vm842_vm1, %v874_v29, %v763_v31  ;;  %v773_v36 = vpop.f32.mrf.mxu1 }
 0x1f5   : >> { %1104 = vmin.xlane.f32.xlu1 %v6227_v56  ;;  %v6248_v40 = vcvt.s32.f32 %v1311_v46  ;;  %v1115_v47 = vshra.s32 %v6238_v54, 16  ;;  %v6252_v48 = vor.u32 %v936_v23, %v8012_v2  ;;  %v939_v28 = vand.u32 4294967292, %v907_v32 }
 0x1f6   : >> { %8063 = vst [vmem:[#allocation70_spill] sm:$0xff] %v6245_v27  ;;  %v893_v51 = vsel %vm829_vm3, %v861_v50, %v5442_v45  ;;  %v860_v1 = vxor.u32 2147483647, %v693_v61  ;;  %v6255_v44 = vcvt.s32.f32 %v1129_v30  ;;  %vm828_vm4 = vcmp.lt.s32.totalorder %v693_v61, 0 }
 0x1f7   : >> { %1090 = vmin.xlane.f32.xlu0 %v6234_v38  ;;  %8064 = vst [vmem:[#allocation71_spill] sm:$0xff] %v6248_v40  ;;  %8065 = vst [vmem:[#allocation72_spill] sm:$0xff] %v6252_v48  ;;  %v1353_v49 = vshra.s32 %v6245_v27, 16  ;;  %v6259_v31 = vor.u32 %v923_v43, %v8012_v2  ;;  %v938_v29 = vand.u32 4294967292, %v906_v21  ;;  %v877_v46 = vxor.u32 2147483647, %v5466_v37 }
 0x1f8   : >> { %8066 = vst [vmem:[#allocation73_spill] sm:$0xff] %v6255_v44  ;;  %v6262_v23 = vcvt.s32.f32 %v1115_v47  ;;  %vm845_vm5 = vcmp.lt.s32.totalorder %v5466_v37, 0  ;;  %v1339_v32 = vshra.s32 %v6252_v48, 16  ;;  %v6266_v50 = vor.u32 %v922_v35, %v8012_v2 }
 0x1f9   : >> { %1328 = vmin.xlane.f32.xlu1 %v6241_v62  ;;  %v925_v45 = vand.u32 4294967292, %v893_v51  ;;  %v892_v30 = vsel %vm828_vm4, %v860_v1, %v693_v61  ;;  %v6269_v27 = vcvt.s32.f32 %v1353_v49  ;;  %vm844_vm6 = vcmp.lt.s32.totalorder %v773_v36, 0 }
 0x1fa   : >> { %v1157_v43 = vshra.s32 %v6259_v31, 16  ;;  %v6273_v21 = vor.u32 %v939_v28, %v8012_v2  ;;  %v909_v47 = vsel %vm845_vm5, %v877_v46, %v5466_v37  ;;  %v6276_v48 = vcvt.s32.f32 %v1339_v32 }
 0x1fb   : >> { %1314 = vmin.xlane.f32.xlu0 %v6248_v40  ;;  %v876_v40 = vxor.u32 2147483647, %v773_v36  ;;  %v1143_v35 = vshra.s32 %v6266_v50, 16  ;;  %v6280_v1 = vor.u32 %v938_v29, %v8012_v2  ;;  %v941_v61 = vand.u32 4294967292, %v909_v47 }
 0x1fc   : >> { %v6283_v49 = vcvt.s32.f32 %v1157_v43  ;;  %v1381_v28 = vshra.s32 %v6273_v21, 16  ;;  %v6287_v37 = vor.u32 %v925_v45, %v8012_v2 }
 0x1fd   : >> { %1132 = vmin.xlane.f32.xlu1 %v6255_v44  ;;  %v924_v44 = vand.u32 4294967292, %v892_v30  ;;  %v908_v51 = vsel %vm844_vm6, %v876_v40, %v773_v36  ;;  %v6293_v30 = vcvt.s32.f32 %v1143_v35  ;;  %v1367_v40 = vshra.s32 %v6280_v1, 16 }
 0x1fe   : >> { %v940_v32 = vand.u32 4294967292, %v908_v51  ;;  %v6297_v36 = vcvt.s32.f32 %v1381_v28  ;;  %v1185_v29 = vshra.s32 %v6287_v37, 16  ;;  %v6301_v43 = vor.u32 %v941_v61, %v8012_v2 }
 0x1ff   : >> { %1118 = vmin.xlane.f32.xlu0 %v6262_v23  ;;  %v6290_v46 = vor.u32 %v924_v44, %v8012_v2  ;;  %v6307_v44 = vcvt.s32.f32 %v1367_v40 }
 0x200   : >> { %8067 = vst [vmem:[#allocation74_spill] sm:$0xff] %v6301_v43  ;;  %v6304_v45 = vor.u32 %v940_v32, %v8012_v2  ;;  %v6311_v35 = vcvt.s32.f32 %v1185_v29  ;;  %v1409_v51 = vshra.s32 %v6301_v43, 16  ;;  %v988_v29 = vand.u32 65535, %v6100_v63 }
 0x201   : >> { %1356 = vmin.xlane.f32.xlu1 %v6269_v27  ;;  %v1171_v47 = vshra.s32 %v6290_v46, 16  ;;  %v974_v2 = vand.u32 65535, %v6104_v7  ;;  %v1198_v63 = vand.u32 65535, %v6117_v11 }
 0x202   : >> { %8068 = vst [vmem:[#allocation75_spill] sm:$0xff] %v6304_v45  ;;  %v1395_v61 = vshra.s32 %v6304_v45, 16  ;;  %v6319_v32 = vcvt.s32.f32 %v1409_v51  ;;  %v1212_v51 = vand.u32 65535, %v6111_v57 }
 0x203   : >> { %1342 = vmin.xlane.f32.xlu0 %v6276_v48  ;;  %v6315_v28 = vcvt.s32.f32 %v1171_v47  ;;  %v990_v47 = vcvt.s32.f32 %v988_v29 }
 0x204   : >> { %8070 = vst [vmem:[#allocation77_spill] sm:$0xff] %v6319_v32  ;;  %v6322_v40 = vcvt.s32.f32 %v1395_v61  ;;  %v976_v61 = vcvt.s32.f32 %v974_v2  ;;  %v1214_v29 = vcvt.s32.f32 %v1212_v51  ;;  %v1002_v2 = vand.u32 65535, %v6124_v0 }
 0x205   : >> { %1160 = vmin.xlane.f32.xlu1 %v6283_v49  ;;  %8069 = vst [vmem:[#allocation76_spill] sm:$0xff] %v6315_v28  ;;  %v1226_v0 = vand.u32 65535, %v6142_v33  ;;  %v1030_v33 = vand.u32 65535, %v6153_v16  ;;  %v1254_v16 = vand.u32 65535, %v6168_v18  ;;  %v1058_v18 = vand.u32 65535, %v6182_v15 }
 0x206   : >> { %8071 = vst [vmem:[#allocation78_spill] sm:$0xff] %v6322_v40  ;;  %v1004_v51 = vcvt.s32.f32 %v1002_v2  ;;  %v1282_v15 = vand.u32 65535, %v6196_v19  ;;  %v1086_v19 = vand.u32 65535, %v6210_v8  ;;  %v1310_v8 = vand.u32 65535, %v6224_v34 }
 0x207   : >> { %1146 = vmin.xlane.f32.xlu0 %v6293_v30  ;;  %v1114_v34 = vand.u32 65535, %v6238_v54 }
 0x209   : >> { %1384 = vmin.xlane.f32.xlu1 %v6297_v36 }
 0x20b   : >> { %1370 = vmin.xlane.f32.xlu0 %v6307_v44 }
 0x20d   : >> { %1188 = vmin.xlane.f32.xlu1 %v6311_v35 }
 0x20f   : >> { %1174 = vmin.xlane.f32.xlu0 %v6315_v28 }
 0x211   : >> { %1412 = vmin.xlane.f32.xlu1 %v6319_v32  ;;  %v1016_v32 = vand.u32 65535, %v6120_v6 }
 0x213   : >> { %1398 = vmin.xlane.f32.xlu0 %v6322_v40 }
 0x25c   : >> { %v6327_v43 = vpop.xlane.xlu1 %992 }
 0x25d   : >> { %vm994_vm7 = vcmp.eq.f32.partialorder %v6106_v58, %v6327_v43 }
 0x25e   : >> { %v995_v45 = vsel %vm994_vm7, %v990_v47, inf  ;;  %v1240_v47 = vand.u32 65535, %v6136_v12  ;;  %v1044_v12 = vand.u32 65535, %v6146_v9  ;;  %v1268_v9 = vand.u32 65535, %v6165_v14 }
 0x25f   : >> { %996 = vmin.xlane.f32.xlu1 %v995_v45  ;;  %v1200_v45 = vcvt.s32.f32 %v1198_v63  ;;  %v1072_v14 = vand.u32 65535, %v6175_v4  ;;  %v1296_v4 = vand.u32 65535, %v6189_v24  ;;  %v1100_v24 = vand.u32 65535, %v6203_v10 }
 0x260   : >> { %v6332_v28 = vpop.xlane.xlu0 %978  ;;  %v1324_v10 = vand.u32 65535, %v6217_v55 }
 0x261   : >> { %vm980_vm8 = vcmp.eq.f32.partialorder %v6113_v3, %v6332_v28 }
 0x262   : >> { %v981_v40 = vsel %vm980_vm8, %v976_v61, inf  ;;  %v6337_v7 = vpop.xlane.xlu1 %1216 }
 0x263   : >> { %982 = vmin.xlane.f32.xlu0 %v981_v40  ;;  %vm1218_vm9 = vcmp.eq.f32.partialorder %v6126_v20, %v6337_v7  ;;  %v1018_v40 = vcvt.s32.f32 %v1016_v32  ;;  %v1242_v32 = vcvt.s32.f32 %v1240_v47  ;;  %v1270_v47 = vcvt.s32.f32 %v1268_v9 }
 0x264   : >> { %v6342_v58 = vpop.xlane.xlu0 %1202  ;;  %v1219_v57 = vsel %vm1218_vm9, %v1214_v29, inf  ;;  %v1228_v29 = vcvt.s32.f32 %v1226_v0  ;;  %v1102_v9 = vcvt.s32.f32 %v1100_v24 }
 0x265   : >> { %1220 = vmin.xlane.f32.xlu1 %v1219_v57  ;;  %vm1204_vm10 = vcmp.eq.f32.partialorder %v6131_v59, %v6342_v58 }
 0x266   : >> { %v6347_v3 = vpop.xlane.xlu1 %1020  ;;  %v1205_v11 = vsel %vm1204_vm10, %v1200_v45, inf  ;;  %v1046_v45 = vcvt.s32.f32 %v1044_v12  ;;  %v1060_v12 = vcvt.s32.f32 %v1058_v18 }
 0x267   : >> { %1206 = vmin.xlane.f32.xlu0 %v1205_v11  ;;  %vm1022_vm11 = vcmp.eq.f32.partialorder %v6139_v53, %v6347_v3  ;;  %v1032_v11 = vcvt.s32.f32 %v1030_v33 }
 0x268   : >> { %v6352_v6 = vpop.xlane.xlu0 %1006  ;;  %v1023_v20 = vsel %vm1022_vm11, %v1018_v40, inf }
 0x269   : >> { %1024 = vmin.xlane.f32.xlu1 %v1023_v20  ;;  %vm1008_vm12 = vcmp.eq.f32.partialorder %v6149_v25, %v6352_v6 }
 0x26a   : >> { %v6357_v59 = vpop.xlane.xlu1 %1244  ;;  %v1009_v61 = vsel %vm1008_vm12, %v1004_v51, inf  ;;  %v1256_v51 = vcvt.s32.f32 %v1254_v16 }
 0x26b   : >> { %1010 = vmin.xlane.f32.xlu0 %v1009_v61  ;;  %vm1246_vm13 = vcmp.eq.f32.partialorder %v6157_v39, %v6357_v59  ;;  %v1074_v61 = vcvt.s32.f32 %v1072_v14 }
 0x26c   : >> { %v6362_v53 = vpop.xlane.xlu0 %1230  ;;  %v1247_v63 = vsel %vm1246_vm13, %v1242_v32, inf }
 0x26d   : >> { %1248 = vmin.xlane.f32.xlu1 %v1247_v63  ;;  %vm1232_vm14 = vcmp.eq.f32.partialorder %v6161_v26, %v6362_v53 }
 0x26e   : >> { %v6367_v25 = vpop.xlane.xlu1 %1048  ;;  %v1233_v57 = vsel %vm1232_vm14, %v1228_v29, inf  ;;  %v1298_v29 = vcvt.s32.f32 %v1296_v4 }
 0x26f   : >> { %1234 = vmin.xlane.f32.xlu0 %v1233_v57  ;;  %vm1050_vm15 = vcmp.eq.f32.partialorder %v6171_v13, %v6367_v25  ;;  %v1284_v57 = vcvt.s32.f32 %v1282_v15  ;;  %v1116_v15 = vcvt.s32.f32 %v1114_v34 }
 0x270   : >> { %v6372_v39 = vpop.xlane.xlu0 %1034  ;;  %v1051_v2 = vsel %vm1050_vm15, %v1046_v45, inf }
 0x271   : >> { %1052 = vmin.xlane.f32.xlu1 %v1051_v2  ;;  %vm1036_vm1 = vcmp.eq.f32.partialorder %v6178_v5, %v6372_v39 }
 0x272   : >> { %v6377_v26 = vpop.xlane.xlu1 %1272  ;;  %v1037_v40 = vsel %vm1036_vm1, %v1032_v11, inf  ;;  %v1088_v11 = vcvt.s32.f32 %v1086_v19 }
 0x273   : >> { %1038 = vmin.xlane.f32.xlu0 %v1037_v40  ;;  %vm1274_vm3 = vcmp.eq.f32.partialorder %v6185_v17, %v6377_v26  ;;  %v1326_v40 = vcvt.s32.f32 %v1324_v10  ;;  %v1142_v10 = vand.u32 65535, %v6266_v50  ;;  %v1366_v50 = vand.u32 65535, %v6280_v1 }
 0x274   : >> { %v6382_v13 = vpop.xlane.xlu0 %1258  ;;  %v1275_v20 = vsel %vm1274_vm3, %v1270_v47, inf  ;;  %v8072_v47 = vld [vmem:[#allocation69_spill] sm:$0xff]  ;;  %v1170_v1 = vand.u32 65535, %v6290_v46 }
 0x275   : >> { %1276 = vmin.xlane.f32.xlu1 %v1275_v20  ;;  %vm1260_vm4 = vcmp.eq.f32.partialorder %v6192_v52, %v6382_v13  ;;  %v1128_v55 = vand.u32 65535, %v8072_v47  ;;  %v1312_v20 = vcvt.s32.f32 %v1310_v8 }
 0x276   : >> { %v6387_v5 = vpop.xlane.xlu1 %1076  ;;  %v1261_v0 = vsel %vm1260_vm4, %v1256_v51, inf  ;;  %v8073_v51 = vld [vmem:[#allocation71_spill] sm:$0xff] }
 0x277   : >> { %1262 = vmin.xlane.f32.xlu0 %v1261_v0  ;;  %vm1078_vm5 = vcmp.eq.f32.partialorder %v6199_v22, %v6387_v5  ;;  %v1130_v0 = vcvt.s32.f32 %v1128_v55 }
 0x278   : >> { %v6392_v17 = vpop.xlane.xlu0 %1062  ;;  %v1079_v32 = vsel %vm1078_vm5, %v1074_v61, inf  ;;  %v8074_v61 = vld [vmem:[#allocation70_spill] sm:$0xff] }
 0x279   : >> { %1080 = vmin.xlane.f32.xlu1 %v1079_v32  ;;  %vm1064_vm6 = vcmp.eq.f32.partialorder %v6206_v41, %v6392_v17  ;;  %v1352_v4 = vand.u32 65535, %v8074_v61  ;;  %v8075_v32 = vld [vmem:[#allocation73_spill] sm:$0xff]  ;;  %v8078_v61 = vld [vmem:[#allocation75_spill] sm:$0xff] }
 0x27a   : >> { %v6397_v52 = vpop.xlane.xlu1 %1300  ;;  %v1065_v63 = vsel %vm1064_vm6, %v1060_v12, inf  ;;  %v1394_v46 = vand.u32 65535, %v8078_v61 }
 0x27b   : >> { %1066 = vmin.xlane.f32.xlu0 %v1065_v63  ;;  %vm1302_vm7 = vcmp.eq.f32.partialorder %v6213_v42, %v6397_v52  ;;  %v8076_v63 = vld [vmem:[#allocation72_spill] sm:$0xff] }
 0x27c   : >> { %v6402_v22 = vpop.xlane.xlu0 %1286  ;;  %v1303_v33 = vsel %vm1302_vm7, %v1298_v29, inf  ;;  %v1338_v54 = vand.u32 65535, %v8076_v63 }
 0x27d   : >> { %1304 = vmin.xlane.f32.xlu1 %v1303_v33  ;;  %vm1288_vm8 = vcmp.eq.f32.partialorder %v6220_v60, %v6402_v22  ;;  %v1354_v33 = vcvt.s32.f32 %v1352_v4  ;;  %v8079_v4 = vld [vmem:[#allocation76_spill] sm:$0xff] }
 0x27e   : >> { %v6407_v41 = vpop.xlane.xlu1 %1104  ;;  %v1289_v45 = vsel %vm1288_vm8, %v1284_v57, inf  ;;  %v1156_v57 = vand.u32 65535, %v6259_v31  ;;  %v1380_v31 = vand.u32 65535, %v6273_v21  ;;  %v1184_v21 = vand.u32 65535, %v6287_v37 }
 0x27f   : >> { %1290 = vmin.xlane.f32.xlu0 %v1289_v45  ;;  %vm1106_vm9 = vcmp.eq.f32.partialorder %v6227_v56, %v6407_v41 }
 0x280   : >> { %v6412_v42 = vpop.xlane.xlu0 %1090  ;;  %v1107_v2 = vsel %vm1106_vm9, %v1102_v9, inf  ;;  %v1340_v9 = vcvt.s32.f32 %v1338_v54  ;;  %v1382_v47 = vcvt.s32.f32 %v1380_v31  ;;  %v1186_v34 = vcvt.s32.f32 %v1184_v21 }
 0x281   : >> { %1108 = vmin.xlane.f32.xlu1 %v1107_v2  ;;  %vm1092_vm10 = vcmp.eq.f32.partialorder %v6234_v38, %v6412_v42  ;;  %v1396_v54 = vcvt.s32.f32 %v1394_v46  ;;  %v1027_v21 = vcvt.f32.s32 %v6347_v3 }
 0x282   : >> { %v6417_v60 = vpop.xlane.xlu1 %1328  ;;  %v1093_v16 = vsel %vm1092_vm10, %v1088_v11, inf  ;;  %v1158_v11 = vcvt.s32.f32 %v1156_v57  ;;  %v999_v57 = vcvt.f32.s32 %v6327_v43 }
 0x283   : >> { %1094 = vmin.xlane.f32.xlu0 %v1093_v16  ;;  %vm1330_vm11 = vcmp.eq.f32.partialorder %v6241_v62, %v6417_v60  ;;  %v1144_v16 = vcvt.s32.f32 %v1142_v10 }
 0x284   : >> { %v6422_v56 = vpop.xlane.xlu0 %1314  ;;  %v1331_v14 = vsel %vm1330_vm11, %v1326_v40, inf  ;;  %v1000_v10 = vshll.u32 %v999_v57, 16 }
 0x285   : >> { %1332 = vmin.xlane.f32.xlu1 %v1331_v14  ;;  %vm1316_vm12 = vcmp.eq.f32.partialorder %v8073_v51, %v6422_v56  ;;  %v1368_v14 = vcvt.s32.f32 %v1366_v50  ;;  %v8077_v51 = vld [vmem:[#allocation74_spill] sm:$0xff] }
 0x286   : >> { %v6427_v38 = vpop.xlane.xlu1 %1132  ;;  %v1317_v18 = vsel %vm1316_vm12, %v1312_v20, inf  ;;  %v1408_v37 = vand.u32 65535, %v8077_v51 }
 0x287   : >> { %1318 = vmin.xlane.f32.xlu0 %v1317_v18  ;;  %vm1134_vm13 = vcmp.eq.f32.partialorder %v8075_v32, %v6427_v38 }
 0x288   : >> { %v6432_v62 = vpop.xlane.xlu0 %1118  ;;  %v1135_v12 = vsel %vm1134_vm13, %v1130_v0, inf  ;;  %v1172_v0 = vcvt.s32.f32 %v1170_v1 }
 0x289   : >> { %1136 = vmin.xlane.f32.xlu1 %v1135_v12  ;;  %vm1120_vm14 = vcmp.eq.f32.partialorder %v6262_v23, %v6432_v62  ;;  %v1410_v12 = vcvt.s32.f32 %v1408_v37 }
 0x28a   : >> { %v6437_v29 = vpop.xlane.xlu1 %1356  ;;  %v1121_v24 = vsel %vm1120_vm14, %v1116_v15, inf  ;;  %v8080_v15 = vld [vmem:[#allocation77_spill] sm:$0xff] }
 0x28b   : >> { %1122 = vmin.xlane.f32.xlu0 %v1121_v24  ;;  %vm1358_vm15 = vcmp.eq.f32.partialorder %v6269_v27, %v6437_v29  ;;  %v8081_v24 = vld [vmem:[#allocation78_spill] sm:$0xff] }
 0x28c   : >> { %v6442_v19 = vpop.xlane.xlu0 %1342  ;;  %v1359_v45 = vsel %vm1358_vm15, %v1354_v33, inf }
 0x28d   : >> { %1360 = vmin.xlane.f32.xlu1 %v1359_v45  ;;  %vm1344_vm1 = vcmp.eq.f32.partialorder %v6276_v48, %v6442_v19  ;;  %v985_v45 = vcvt.f32.s32 %v6332_v28  ;;  %v1013_v28 = vcvt.f32.s32 %v6352_v6 }
 0x28e   : >> { %v6447_v23 = vpop.xlane.xlu1 %1160  ;;  %v1345_v2 = vsel %vm1344_vm1, %v1340_v9, inf }
 0x28f   : >> { %1346 = vmin.xlane.f32.xlu0 %v1345_v2  ;;  %vm1162_vm3 = vcmp.eq.f32.partialorder %v6283_v49, %v6447_v23 }
 0x290   : >> { %v6452_v27 = vpop.xlane.xlu0 %1146  ;;  %v1163_v8 = vsel %vm1162_vm3, %v1158_v11, inf  ;;  %v1223_v11 = vcvt.f32.s32 %v6337_v7 }
 0x291   : >> { %1164 = vmin.xlane.f32.xlu1 %v1163_v8  ;;  %vm1148_vm4 = vcmp.eq.f32.partialorder %v6293_v30, %v6452_v27 }
 0x292   : >> { %v6457_v48 = vpop.xlane.xlu1 %1384  ;;  %v1149_v40 = vsel %vm1148_vm4, %v1144_v16, inf  ;;  %v986_v16 = vshll.u32 %v985_v45, 16  ;;  %v1224_v43 = vshll.u32 %v1223_v11, 16 }
 0x293   : >> { %1150 = vmin.xlane.f32.xlu0 %v1149_v40  ;;  %vm1386_vm5 = vcmp.eq.f32.partialorder %v6297_v36, %v6457_v48  ;;  %v1209_v40 = vcvt.f32.s32 %v6342_v58  ;;  %v1251_v58 = vcvt.f32.s32 %v6357_v59 }
 0x294   : >> { %v6462_v49 = vpop.xlane.xlu0 %1370  ;;  %v1387_v55 = vsel %vm1386_vm5, %v1382_v47, inf }
 0x295   : >> { %1388 = vmin.xlane.f32.xlu1 %v1387_v55  ;;  %vm1372_vm6 = vcmp.eq.f32.partialorder %v6307_v44, %v6462_v49  ;;  %v1210_v7 = vshll.u32 %v1209_v40, 16 }
 0x296   : >> { %v6467_v30 = vpop.xlane.xlu1 %1188  ;;  %v1373_v20 = vsel %vm1372_vm6, %v1368_v14, inf }
 0x297   : >> { %1374 = vmin.xlane.f32.xlu0 %v1373_v20  ;;  %vm1190_vm7 = vcmp.eq.f32.partialorder %v6311_v35, %v6467_v30 }
 0x298   : >> { %v6472_v36 = vpop.xlane.xlu0 %1174  ;;  %v1191_v18 = vsel %vm1190_vm7, %v1186_v34, inf }
 0x299   : >> { %1192 = vmin.xlane.f32.xlu1 %v1191_v18  ;;  %vm1176_vm8 = vcmp.eq.f32.partialorder %v8079_v4, %v6472_v36  ;;  %v1028_v18 = vshll.u32 %v1027_v21, 16  ;;  %v1014_v4 = vshll.u32 %v1013_v28, 16 }
 0x29a   : >> { %v6477_v44 = vpop.xlane.xlu1 %1412  ;;  %v1177_v32 = vsel %vm1176_vm8, %v1172_v0, inf }
 0x29b   : >> { %1178 = vmin.xlane.f32.xlu0 %v1177_v32  ;;  %vm1414_vm9 = vcmp.eq.f32.partialorder %v8080_v15, %v6477_v44 }
 0x29c   : >> { %v6481_v63 = vpop.xlane.xlu0 %1398  ;;  %v1415_v35 = vsel %vm1414_vm9, %v1410_v12, inf  ;;  %v1237_v12 = vcvt.f32.s32 %v6362_v53 }
 0x29d   : >> { %1416 = vmin.xlane.f32.xlu1 %v1415_v35  ;;  %vm1400_vm10 = vcmp.eq.f32.partialorder %v8081_v24, %v6481_v63 }
 0x29e   : >> { %v1401_v33 = vsel %vm1400_vm10, %v1396_v54, inf  ;;  %v1055_v54 = vcvt.f32.s32 %v6367_v25 }
 0x29f   : >> { %1402 = vmin.xlane.f32.xlu0 %v1401_v33  ;;  %v1252_v33 = vshll.u32 %v1251_v58, 16 }
 0x2e8   : >> { %v997_v9 = vpop.xlane.xlu1 %996 }
 0x2e9   : >> { %v998_v2 = vcvt.f32.s32 %v997_v9  ;;  %v1041_v9 = vcvt.f32.s32 %v6372_v39 }
 0x2eb   : >> { %v1001_v31 = vadd.s32 %v1000_v10, %v998_v2  ;;  %v1238_v2 = vshll.u32 %v1237_v12, 16 }
 0x2ec   : >> { %v983_v8 = vpop.xlane.xlu0 %982 }
 0x2ed   : >> { %v984_v50 = vcvt.f32.s32 %v983_v8  ;;  %v6489_v47 = vand.u32 3, %v1001_v31  ;;  %v1056_v8 = vshll.u32 %v1055_v54, 16 }
 0x2ee   : >> { %v1221_v14 = vpop.xlane.xlu1 %1220 }
 0x2ef   : >> { %v987_v55 = vadd.s32 %v986_v16, %v984_v50  ;;  %v1222_v1 = vcvt.f32.s32 %v1221_v14  ;;  %v1279_v50 = vcvt.f32.s32 %v6377_v26 }
 0x2f0   : >> { %v1207_v34 = vpop.xlane.xlu0 %1206 }
 0x2f1   : >> { %v6493_v20 = vand.u32 3, %v987_v55  ;;  %v1225_v51 = vadd.s32 %v1224_v43, %v1222_v1  ;;  %v1208_v37 = vcvt.f32.s32 %v1207_v34  ;;  %v1042_v55 = vshll.u32 %v1041_v9, 16 }
 0x2f2   : >> { %v1025_v0 = vpop.xlane.xlu1 %1024  ;;  %v1265_v43 = vcvt.f32.s32 %v6382_v13  ;;  %v1083_v34 = vcvt.f32.s32 %v6387_v5 }
 0x2f3   : >> { %8082 = vst [vmem:[#allocation69_spill] sm:$0xff] %v6493_v20  ;;  %v6496_v61 = vand.u32 3, %v1225_v51  ;;  %v1211_v46 = vadd.s32 %v1210_v7, %v1208_v37  ;;  %v1026_v3 = vcvt.f32.s32 %v1025_v0  ;;  %v1280_v51 = vshll.u32 %v1279_v50, 16 }
 0x2f4   : >> { %v1011_v32 = vpop.xlane.xlu0 %1010  ;;  %v1069_v0 = vcvt.f32.s32 %v6392_v17 }
 0x2f5   : >> { %v6499_v15 = vand.u32 3, %v1211_v46  ;;  %v1029_v6 = vadd.s32 %v1028_v18, %v1026_v3  ;;  %v1012_v35 = vcvt.f32.s32 %v1011_v32  ;;  %v1266_v46 = vshll.u32 %v1265_v43, 16 }
 0x2f6   : >> { %v1249_v24 = vpop.xlane.xlu1 %1248  ;;  %v1084_v32 = vshll.u32 %v1083_v34, 16 }
 0x2f7   : >> { %v6502_v57 = vand.u32 3, %v1029_v6  ;;  %v1015_v45 = vadd.s32 %v1014_v4, %v1012_v35  ;;  %v1250_v59 = vcvt.f32.s32 %v1249_v24  ;;  %v1307_v6 = vcvt.f32.s32 %v6397_v52 }
 0x2f8   : >> { %v1235_v10 = vpop.xlane.xlu0 %1234  ;;  %v1070_v24 = vshll.u32 %v1069_v0, 16 }
 0x2f9   : >> { %v6505_v11 = vand.u32 3, %v1015_v45  ;;  %v1253_v31 = vadd.s32 %v1252_v33, %v1250_v59  ;;  %v1236_v53 = vcvt.f32.s32 %v1235_v10  ;;  %v1293_v45 = vcvt.f32.s32 %v6402_v22 }
 0x2fa   : >> { %v1053_v16 = vpop.xlane.xlu1 %1052  ;;  %v1111_v10 = vcvt.f32.s32 %v6407_v41 }
 0x2fb   : >> { %8083 = vst [vmem:[#allocation71_spill] sm:$0xff] %v6505_v11  ;;  %v6508_v40 = vand.u32 3, %v1253_v31  ;;  %v1239_v25 = vadd.s32 %v1238_v2, %v1236_v53  ;;  %v1054_v21 = vcvt.f32.s32 %v1053_v16  ;;  %v1308_v31 = vshll.u32 %v1307_v6, 16 }
 0x2fc   : >> { %v1039_v14 = vpop.xlane.xlu0 %1038  ;;  %v1097_v16 = vcvt.f32.s32 %v6412_v42 }
 0x2fd   : >> { %v6511_v1 = vand.u32 3, %v1239_v25  ;;  %v1057_v39 = vadd.s32 %v1056_v8, %v1054_v21  ;;  %v1040_v28 = vcvt.f32.s32 %v1039_v14  ;;  %v1294_v25 = vshll.u32 %v1293_v45, 16 }
 0x2fe   : >> { %v1277_v7 = vpop.xlane.xlu1 %1276  ;;  %v1112_v14 = vshll.u32 %v1111_v10, 16 }
 0x2ff   : >> { %v6514_v37 = vand.u32 3, %v1057_v39  ;;  %v1043_v18 = vadd.s32 %v1042_v55, %v1040_v28  ;;  %v1278_v26 = vcvt.f32.s32 %v1277_v7  ;;  %v1335_v39 = vcvt.f32.s32 %v6417_v60 }
 0x300   : >> { %v1263_v58 = vpop.xlane.xlu0 %1262  ;;  %v1098_v7 = vshll.u32 %v1097_v16, 16 }
 0x301   : >> { %v6517_v3 = vand.u32 3, %v1043_v18  ;;  %v1281_v4 = vadd.s32 %v1280_v51, %v1278_v26  ;;  %v1264_v13 = vcvt.f32.s32 %v1263_v58  ;;  %v1321_v18 = vcvt.f32.s32 %v6422_v56 }
 0x302   : >> { %v1081_v12 = vpop.xlane.xlu1 %1080  ;;  %v1139_v58 = vcvt.f32.s32 %v6427_v38 }
 0x303   : >> { %v6520_v35 = vand.u32 3, %v1281_v4  ;;  %v1267_v5 = vadd.s32 %v1266_v46, %v1264_v13  ;;  %v1082_v54 = vcvt.f32.s32 %v1081_v12  ;;  %v1336_v4 = vshll.u32 %v1335_v39, 16 }
 0x304   : >> { %v1067_v33 = vpop.xlane.xlu0 %1066  ;;  %v1125_v12 = vcvt.f32.s32 %v6432_v62 }
 0x305   : >> { %v6523_v59 = vand.u32 3, %v1267_v5  ;;  %v1085_v17 = vadd.s32 %v1084_v32, %v1082_v54  ;;  %v1068_v9 = vcvt.f32.s32 %v1067_v33  ;;  %v1322_v5 = vshll.u32 %v1321_v18, 16 }
 0x306   : >> { %v1305_v2 = vpop.xlane.xlu1 %1304  ;;  %v1140_v33 = vshll.u32 %v1139_v58, 16 }
 0x307   : >> { %v6526_v53 = vand.u32 3, %v1085_v17  ;;  %v1071_v8 = vadd.s32 %v1070_v24, %v1068_v9  ;;  %v1306_v52 = vcvt.f32.s32 %v1305_v2  ;;  %v1363_v17 = vcvt.f32.s32 %v6437_v29 }
 0x308   : >> { %v1291_v50 = vpop.xlane.xlu0 %1290  ;;  %v1126_v2 = vshll.u32 %v1125_v12, 16 }
 0x309   : >> { %v6529_v21 = vand.u32 3, %v1071_v8  ;;  %v1309_v55 = vadd.s32 %v1308_v31, %v1306_v52  ;;  %v1292_v22 = vcvt.f32.s32 %v1291_v50  ;;  %v1349_v8 = vcvt.f32.s32 %v6442_v19 }
 0x30a   : >> { %v1109_v43 = vpop.xlane.xlu1 %1108  ;;  %v1167_v50 = vcvt.f32.s32 %v6447_v23 }
 0x30b   : >> { %v6532_v28 = vand.u32 3, %v1309_v55  ;;  %v1295_v41 = vadd.s32 %v1294_v25, %v1292_v22  ;;  %v1110_v34 = vcvt.f32.s32 %v1109_v43  ;;  %v1364_v55 = vshll.u32 %v1363_v17, 16 }
 0x30c   : >> { %v1095_v51 = vpop.xlane.xlu0 %1094  ;;  %v1153_v43 = vcvt.f32.s32 %v6452_v27 }
 0x30d   : >> { %v6535_v26 = vand.u32 3, %v1295_v41  ;;  %v1113_v42 = vadd.s32 %v1112_v14, %v1110_v34  ;;  %v1096_v0 = vcvt.f32.s32 %v1095_v51  ;;  %v1350_v41 = vshll.u32 %v1349_v8, 16 }
 0x30e   : >> { %v1333_v46 = vpop.xlane.xlu1 %1332  ;;  %v1168_v51 = vshll.u32 %v1167_v50, 16 }
 0x30f   : >> { %v6538_v13 = vand.u32 3, %v1113_v42  ;;  %v1099_v32 = vadd.s32 %v1098_v7, %v1096_v0  ;;  %v1334_v60 = vcvt.f32.s32 %v1333_v46  ;;  %v1391_v42 = vcvt.f32.s32 %v6457_v48 }
 0x310   : >> { %v1319_v6 = vpop.xlane.xlu0 %1318  ;;  %v1154_v46 = vshll.u32 %v1153_v43, 16 }
 0x311   : >> { %8084 = vst [vmem:[#allocation70_spill] sm:$0xff] %v6538_v13  ;;  %v6541_v54 = vand.u32 3, %v1099_v32  ;;  %v1337_v24 = vadd.s32 %v1336_v4, %v1334_v60  ;;  %v1320_v56 = vcvt.f32.s32 %v1319_v6  ;;  %v1377_v32 = vcvt.f32.s32 %v6462_v49 }
 0x312   : >> { %v1137_v45 = vpop.xlane.xlu1 %1136  ;;  %v1195_v6 = vcvt.f32.s32 %v6467_v30 }
 0x313   : >> { %8085 = vst [vmem:[#allocation73_spill] sm:$0xff] %v6541_v54  ;;  %v6544_v9 = vand.u32 3, %v1337_v24  ;;  %v1323_v38 = vadd.s32 %v1322_v5, %v1320_v56  ;;  %v1138_v10 = vcvt.f32.s32 %v1137_v45  ;;  %v1392_v24 = vshll.u32 %v1391_v42, 16 }
 0x314   : >> { %v1123_v31 = vpop.xlane.xlu0 %1122  ;;  %v1181_v45 = vcvt.f32.s32 %v6472_v36 }
 0x315   : >> { %v6547_v52 = vand.u32 3, %v1323_v38  ;;  %v1141_v62 = vadd.s32 %v1140_v33, %v1138_v10  ;;  %v1124_v16 = vcvt.f32.s32 %v1123_v31  ;;  %v1378_v38 = vshll.u32 %v1377_v32, 16 }
 0x316   : >> { %v1361_v25 = vpop.xlane.xlu1 %1360  ;;  %v1196_v31 = vshll.u32 %v1195_v6, 16 }
 0x317   : >> { %v6550_v22 = vand.u32 3, %v1141_v62  ;;  %v1127_v14 = vadd.s32 %v1126_v2, %v1124_v16  ;;  %v1362_v29 = vcvt.f32.s32 %v1361_v25  ;;  %v1419_v62 = vcvt.f32.s32 %v6477_v44 }
 0x318   : >> { %v1347_v39 = vpop.xlane.xlu0 %1346  ;;  %v1182_v25 = vshll.u32 %v1181_v45, 16 }
 0x319   : >> { %8086 = vst [vmem:[#allocation72_spill] sm:$0xff] %v6550_v22  ;;  %v6553_v34 = vand.u32 3, %v1127_v14  ;;  %v1365_v7 = vadd.s32 %v1364_v55, %v1362_v29  ;;  %v1348_v19 = vcvt.f32.s32 %v1347_v39  ;;  %v1405_v14 = vcvt.f32.s32 %v6481_v63 }
 0x31a   : >> { %v1165_v18 = vpop.xlane.xlu1 %1164 }
 0x31b   : >> { %8087 = vst [vmem:[#allocation74_spill] sm:$0xff] %v6553_v34  ;;  %v6556_v0 = vand.u32 3, %v1365_v7  ;;  %v1351_v23 = vadd.s32 %v1350_v41, %v1348_v19  ;;  %v1166_v58 = vcvt.f32.s32 %v1165_v18  ;;  %v1420_v41 = vshll.u32 %v1419_v62, 16 }
 0x31c   : >> { %v1151_v4 = vpop.xlane.xlu0 %1150  ;;  %v1406_v44 = vshll.u32 %v1405_v14, 16 }
 0x31d   : >> { %v6559_v60 = vand.u32 3, %v1351_v23  ;;  %v1169_v27 = vadd.s32 %v1168_v51, %v1166_v58  ;;  %v1152_v12 = vcvt.f32.s32 %v1151_v4 }
 0x31e   : >> { %v1389_v5 = vpop.xlane.xlu1 %1388 }
 0x31f   : >> { %v6562_v56 = vand.u32 3, %v1169_v27  ;;  %v1155_v33 = vadd.s32 %v1154_v46, %v1152_v12  ;;  %v1390_v48 = vcvt.f32.s32 %v1389_v5 }
 0x320   : >> { %v1375_v17 = vpop.xlane.xlu0 %1374 }
 0x321   : >> { %8088 = vst [vmem:[#allocation75_spill] sm:$0xff] %v6562_v56  ;;  %v6565_v10 = vand.u32 3, %v1155_v33  ;;  %v1393_v2 = vadd.s32 %v1392_v24, %v1390_v48  ;;  %v1376_v49 = vcvt.f32.s32 %v1375_v17 }
 0x322   : >> { %v1193_v8 = vpop.xlane.xlu1 %1192 }
 0x323   : >> { %8089 = vst [vmem:[#allocation76_spill] sm:$0xff] %v6565_v10  ;;  %v6568_v16 = vand.u32 3, %v1393_v2  ;;  %v1379_v30 = vadd.s32 %v1378_v38, %v1376_v49  ;;  %v1194_v50 = vcvt.f32.s32 %v1193_v8 }
 0x324   : >> { %v1179_v55 = vpop.xlane.xlu0 %1178 }
 0x325   : >> { %v6571_v29 = vand.u32 3, %v1379_v30  ;;  %v1197_v36 = vadd.s32 %v1196_v31, %v1194_v50  ;;  %v1180_v43 = vcvt.f32.s32 %v1179_v55 }
 0x326   : >> { %v1417_v39 = vpop.xlane.xlu1 %1416 }
 0x327   : >> { %v6573_v7 = vand.u32 3, %v1197_v36  ;;  %v1183_v19 = vadd.s32 %v1182_v25, %v1180_v43  ;;  %v1418_v51 = vcvt.f32.s32 %v1417_v39 }
 0x328   : >> { %v1403_v18 = vpop.xlane.xlu0 %1402 }
 0x329   : >> { %8090 = vst [vmem:[#allocation77_spill] sm:$0xff] %v6573_v7  ;;  %v6575_v42 = vand.u32 3, %v1183_v19  ;;  %v1421_v23 = vadd.s32 %v1420_v41, %v1418_v51  ;;  %v1404_v58 = vcvt.f32.s32 %v1403_v18 }
 0x32b   : >> { %8091 = vst [vmem:[#allocation78_spill] sm:$0xff] %v6575_v42  ;;  %v6577_v46 = vand.u32 3, %v1421_v23  ;;  %v1407_v4 = vadd.s32 %v1406_v44, %v1404_v58  ;;  %1457 = sbr.rel (%p5189_p4) target bundleno = 1129 (0x469), region = 39 }
 0x32d   : >> { %8092 = vst [vmem:[#allocation79_spill] sm:$0xff] %v6577_v46  ;;  %v6579_v63 = vand.u32 3, %v1407_v4 }
 0x32f   : >> { %8093 = vst [vmem:[#allocation80_spill] sm:$0xff] %v6579_v63 }
 0x330   : >> { %v8094_v32 = vld [vmem:[#allocation3_spill] sm:$0xff]  ;;  %v5606_v5 = vmov 0   ;;  %v5607_v14 = vmov 1966171168   ;;  %vm4155_vm11 = vcmask 130112   ;;  %vm4162_vm12 = vcmask 195712  }
 0x331   : >> { %v6583_v27 = vsub.s32 0, %v8094_v32  ;;  %v6586_v12 = vsub.s32 1, %v8094_v32  ;;  %v6589_v6 = vsub.s32 2, %v8094_v32  ;;  %5554 = vset.pattern.permute.xlu1 %v5606_v5  ;;  %5553 = vset.pattern.permute.xlu0 %v5606_v5  ;;  %v6592_v24 = vsub.s32 3, %v8094_v32 }
 0x332   : >> { %v6595_v33 = vsub.s32 4, %v8094_v32  ;;  %v6598_v48 = vsub.s32 5, %v8094_v32  ;;  %v6601_v45 = vsub.s32 6, %v8094_v32  ;;  %v6604_v17 = vsub.s32 7, %v8094_v32 }
 0x333   : >> { %v1525_v38 = vrot.slane %v6505_v11, %v6583_v27  ;;  %v1529_v2 = vrot.slane %v6505_v11, %v6586_v12  ;;  %v1533_v49 = vrot.slane %v6505_v11, %v6589_v6  ;;  %v1537_v31 = vrot.slane %v6505_v11, %v6592_v24 }
 0x334   : >> { %v1541_v8 = vrot.slane %v6505_v11, %v6595_v33  ;;  %v1545_v62 = vrot.slane %v6505_v11, %v6598_v48  ;;  %v1549_v30 = vrot.slane %v6505_v11, %v6601_v45  ;;  %v1553_v50 = vrot.slane %v6505_v11, %v6604_v17 }
 0x335   : >> { %v2580_v25 = vcombine.low %v1525_v38, %v1529_v2  ;;  %v1461_v55 = vrot.slane %v6493_v20, %v6583_v27  ;;  %v2487_v36 = vunpack.c.l.s4 %v5607_v14  ;;  %v2581_v43 = vcombine.low %v1533_v49, %v1537_v31 }
 0x336   : >> { %v2582_v39 = vcombine.low %v1541_v8, %v1545_v62  ;;  %v1465_v41 = vrot.slane %v6493_v20, %v6586_v12  ;;  %v2583_v19 = vcombine.low %v1549_v30, %v1553_v50  ;;  %v1469_v51 = vrot.slane %v6493_v20, %v6589_v6 }
 0x337   : >> { %v1473_v18 = vrot.slane %v6493_v20, %v6592_v24  ;;  %v1477_v44 = vrot.slane %v6493_v20, %v6595_v33  ;;  %v2488_v23 = vunpack.c.0.s8 %v2487_v36  ;;  %v1481_v58 = vrot.slane %v6493_v20, %v6598_v48 }
 0x338   : >> { %v1485_v4 = vrot.slane %v6493_v20, %v6601_v45  ;;  %v1489_v5 = vrot.slane %v6493_v20, %v6604_v17  ;;  %v2482_v38 = vcombine.low %v1461_v55, %v1465_v41  ;;  %v1557_v49 = vrot.slane %v6502_v57, %v6583_v27 }
 0x339   : >> { %v2483_v2 = vcombine.low %v1469_v51, %v1473_v18  ;;  %v1561_v31 = vrot.slane %v6502_v57, %v6586_v12  ;;  %v6643_v8 = vsub.s32 %v2488_v23, %v8094_v32  ;;  %v2484_v62 = vcombine.low %v1477_v44, %v1481_v58 }
 0x33a   : >> { %v2485_v30 = vcombine.low %v1485_v4, %v1489_v5  ;;  %v1565_v50 = vrot.slane %v6502_v57, %v6589_v6  ;;  %v1569_v14 = vrot.slane %v6502_v57, %v6592_v24  ;;  %v1573_v55 = vrot.slane %v6502_v57, %v6595_v33 }
 0x33b   : >> { %v1577_v36 = vrot.slane %v6502_v57, %v6598_v48  ;;  %v1581_v41 = vrot.slane %v6502_v57, %v6601_v45  ;;  %v2590_v51 = vrot.slane %v2580_v25, %v6643_v8  ;;  %v2597_v18 = vrot.slane %v2581_v43, %v6643_v8 }
 0x33c   : >> { %v2604_v44 = vrot.slane %v2582_v39, %v6643_v8  ;;  %v2611_v23 = vrot.slane %v2583_v19, %v6643_v8  ;;  %v2492_v58 = vrot.slane %v2482_v38, %v6643_v8  ;;  %v2499_v4 = vrot.slane %v2483_v2, %v6643_v8 }
 0x33d   : >> { %v2506_v5 = vrot.slane %v2484_v62, %v6643_v8  ;;  %v2513_v11 = vrot.slane %v2485_v30, %v6643_v8  ;;  %v2612_v20 = vcombine.low %v2590_v51, %v2597_v18  ;;  %v1585_v7 = vrot.slane %v6502_v57, %v6604_v17 }
 0x33e   : >> { %v2613_v32 = vcombine.low %v2604_v44, %v2611_v23  ;;  %v2629_v25 = vcombine.low %v1557_v49, %v1561_v31  ;;  %v2514_v46 = vcombine.low %v2492_v58, %v2499_v4  ;;  %v2630_v42 = vcombine.low %v1565_v50, %v1569_v14 }
 0x33f   : >> { %v2515_v43 = vcombine.low %v2506_v5, %v2513_v11  ;;  %v2631_v39 = vcombine.low %v1573_v55, %v1577_v36  ;;  %v2620_v19 = vrot.slane %v2612_v20, %v6643_v8  ;;  %v2632_v63 = vcombine.low %v1581_v41, %v1585_v7 }
 0x340   : >> { %v2627_v38 = vrot.slane %v2613_v32, %v6643_v8  ;;  %v2639_v2 = vrot.slane %v2629_v25, %v6643_v8  ;;  %v2522_v62 = vrot.slane %v2514_v46, %v6643_v8  ;;  %v2646_v51 = vrot.slane %v2630_v42, %v6643_v8 }
 0x341   : >> { %v2529_v30 = vrot.slane %v2515_v43, %v6643_v8  ;;  %v2653_v18 = vrot.slane %v2631_v39, %v6643_v8  ;;  %v2660_v11 = vrot.slane %v2632_v63, %v6643_v8  ;;  %v1493_v31 = vrot.slane %v6489_v47, %v6583_v27 }
 0x342   : >> { %v2628_v49 = vcombine.low %v2620_v19, %v2627_v38  ;;  %v1497_v20 = vrot.slane %v6489_v47, %v6586_v12  ;;  %v2661_v32 = vcombine.low %v2639_v2, %v2646_v51  ;;  %v1501_v46 = vrot.slane %v6489_v47, %v6589_v6 }
 0x343   : >> { %v2530_v7 = vcombine.low %v2522_v62, %v2529_v30  ;;  %v1505_v50 = vrot.slane %v6489_v47, %v6592_v24  ;;  %v2662_v42 = vcombine.low %v2653_v18, %v2660_v11  ;;  %v1509_v14 = vrot.slane %v6489_v47, %v6595_v33 }
 0x344   : >> { %4057 = vperm.xlu1 %5554, %v2628_v49   ;;  %v1513_v63 = vrot.slane %v6489_v47, %v6598_v48  ;;  %v1517_v55 = vrot.slane %v6489_v47, %v6601_v45  ;;  %v2669_v36 = vrot.slane %v2661_v32, %v6643_v8  ;;  %v1521_v41 = vrot.slane %v6489_v47, %v6604_v17 }
 0x345   : >> { %4051 = vperm.xlu0 %5553, %v2530_v7   ;;  %v2531_v44 = vcombine.low %v1493_v31, %v1497_v20  ;;  %v2532_v23 = vcombine.low %v1501_v46, %v1505_v50  ;;  %v2676_v58 = vrot.slane %v2662_v42, %v6643_v8  ;;  %v1621_v5 = vrot.slane %v6514_v37, %v6583_v27 }
 0x346   : >> { %v2533_v4 = vcombine.low %v1509_v14, %v1513_v63  ;;  %v1625_v25 = vrot.slane %v6514_v37, %v6586_v12  ;;  %v2534_v43 = vcombine.low %v1517_v55, %v1521_v41  ;;  %v1629_v38 = vrot.slane %v6514_v37, %v6589_v6 }
 0x347   : >> { %v2541_v39 = vrot.slane %v2531_v44, %v6643_v8  ;;  %v2548_v19 = vrot.slane %v2532_v23, %v6643_v8  ;;  %v2677_v2 = vcombine.low %v2669_v36, %v2676_v58  ;;  %v1633_v30 = vrot.slane %v6514_v37, %v6592_v24 }
 0x348   : >> { %v2555_v62 = vrot.slane %v2533_v4, %v6643_v8  ;;  %v1637_v51 = vrot.slane %v6514_v37, %v6595_v33  ;;  %v2562_v18 = vrot.slane %v2534_v43, %v6643_v8  ;;  %v1641_v11 = vrot.slane %v6514_v37, %v6598_v48 }
 0x349   : >> { %v2563_v49 = vcombine.low %v2541_v39, %v2548_v19  ;;  %v1645_v31 = vrot.slane %v6514_v37, %v6601_v45  ;;  %4060 = vperm.xlu1 %5554, %v2677_v2   ;;  %v1649_v20 = vrot.slane %v6514_v37, %v6604_v17  ;;  %v2727_v7 = vcombine.low %v1621_v5, %v1625_v25 }
 0x34a   : >> { %v2728_v32 = vcombine.low %v1629_v38, %v1633_v30  ;;  %v1589_v46 = vrot.slane %v6517_v3, %v6583_v27  ;;  %v2564_v50 = vcombine.low %v2555_v62, %v2562_v18  ;;  %v2729_v14 = vcombine.low %v1637_v51, %v1641_v11 }
 0x34b   : >> { %v2571_v42 = vrot.slane %v2563_v49, %v6643_v8  ;;  %v1593_v63 = vrot.slane %v6517_v3, %v6586_v12  ;;  %v2730_v55 = vcombine.low %v1645_v31, %v1649_v20  ;;  %v2737_v36 = vrot.slane %v2727_v7, %v6643_v8 }
 0x34c   : >> { %v2744_v41 = vrot.slane %v2728_v32, %v6643_v8  ;;  %v1597_v44 = vrot.slane %v6517_v3, %v6589_v6  ;;  %v2578_v23 = vrot.slane %v2564_v50, %v6643_v8  ;;  %v2751_v58 = vrot.slane %v2729_v14, %v6643_v8 }
 0x34d   : >> { %v1601_v4 = vrot.slane %v6517_v3, %v6592_v24  ;;  %v1605_v5 = vrot.slane %v6517_v3, %v6595_v33  ;;  %v2758_v25 = vrot.slane %v2730_v55, %v6643_v8  ;;  %v1609_v39 = vrot.slane %v6517_v3, %v6598_v48 }
 0x34e   : >> { %v2759_v43 = vcombine.low %v2737_v36, %v2744_v41  ;;  %v1613_v19 = vrot.slane %v6517_v3, %v6601_v45  ;;  %v2579_v38 = vcombine.low %v2571_v42, %v2578_v23  ;;  %v1617_v2 = vrot.slane %v6517_v3, %v6604_v17 }
 0x34f   : >> { %v2678_v62 = vcombine.low %v1589_v46, %v1593_v63  ;;  %v2679_v30 = vcombine.low %v1597_v44, %v1601_v4  ;;  %v2760_v51 = vcombine.low %v2751_v58, %v2758_v25  ;;  %v2680_v49 = vcombine.low %v1605_v5, %v1609_v39 }
 0x350   : >> { %v2767_v18 = vrot.slane %v2759_v43, %v6643_v8  ;;  %v1685_v11 = vrot.slane %v6526_v53, %v6583_v27  ;;  %4054 = vperm.xlu0 %5553, %v2579_v38   ;;  %v2681_v31 = vcombine.low %v1613_v19, %v1617_v2  ;;  %v1689_v32 = vrot.slane %v6526_v53, %v6586_v12 }
 0x351   : >> { %v2688_v20 = vrot.slane %v2678_v62, %v6643_v8  ;;  %v2695_v7 = vrot.slane %v2679_v30, %v6643_v8  ;;  %v2774_v50 = vrot.slane %v2760_v51, %v6643_v8  ;;  %v2702_v46 = vrot.slane %v2680_v49, %v6643_v8 }
 0x352   : >> { %v1693_v42 = vrot.slane %v6526_v53, %v6589_v6  ;;  %v1697_v14 = vrot.slane %v6526_v53, %v6592_v24  ;;  %v2709_v63 = vrot.slane %v2681_v31, %v6643_v8  ;;  %v1701_v36 = vrot.slane %v6526_v53, %v6595_v33 }
 0x353   : >> { %v2710_v55 = vcombine.low %v2688_v20, %v2695_v7  ;;  %v1705_v41 = vrot.slane %v6526_v53, %v6598_v48  ;;  %v2775_v44 = vcombine.low %v2767_v18, %v2774_v50  ;;  %v1709_v23 = vrot.slane %v6526_v53, %v6601_v45 }
 0x354   : >> { %v1713_v58 = vrot.slane %v6526_v53, %v6604_v17  ;;  %v2825_v4 = vcombine.low %v1685_v11, %v1689_v32  ;;  %v2711_v5 = vcombine.low %v2702_v46, %v2709_v63  ;;  %v2826_v43 = vcombine.low %v1693_v42, %v1697_v14 }
 0x355   : >> { %v2718_v25 = vrot.slane %v2710_v55, %v6643_v8  ;;  %v2827_v39 = vcombine.low %v1701_v36, %v1705_v41  ;;  %4066 = vperm.xlu1 %5554, %v2775_v44   ;;  %v1653_v2 = vrot.slane %v6529_v21, %v6583_v27  ;;  %v1657_v62 = vrot.slane %v6529_v21, %v6586_v12 }
 0x356   : >> { %v2828_v19 = vcombine.low %v1709_v23, %v1713_v58  ;;  %v2835_v38 = vrot.slane %v2825_v4, %v6643_v8  ;;  %v2725_v30 = vrot.slane %v2711_v5, %v6643_v8  ;;  %v2842_v51 = vrot.slane %v2826_v43, %v6643_v8 }
 0x357   : >> { %v2849_v18 = vrot.slane %v2827_v39, %v6643_v8  ;;  %v1661_v49 = vrot.slane %v6529_v21, %v6589_v6  ;;  %v1665_v31 = vrot.slane %v6529_v21, %v6592_v24  ;;  %v1669_v20 = vrot.slane %v6529_v21, %v6595_v33 }
 0x358   : >> { %v2856_v11 = vrot.slane %v2828_v19, %v6643_v8  ;;  %v1673_v7 = vrot.slane %v6529_v21, %v6598_v48  ;;  %v2726_v32 = vcombine.low %v2718_v25, %v2725_v30  ;;  %v2857_v50 = vcombine.low %v2835_v38, %v2842_v51 }
 0x359   : >> { %v1677_v46 = vrot.slane %v6529_v21, %v6601_v45  ;;  %v1681_v42 = vrot.slane %v6529_v21, %v6604_v17  ;;  %v2776_v63 = vcombine.low %v1653_v2, %v1657_v62  ;;  %v2777_v55 = vcombine.low %v1661_v49, %v1665_v31 }
 0x35a   : >> { %v2858_v14 = vcombine.low %v2849_v18, %v2856_v11  ;;  %v2778_v36 = vcombine.low %v1669_v20, %v1673_v7  ;;  %4063 = vperm.xlu0 %5553, %v2726_v32   ;;  %v2865_v41 = vrot.slane %v2857_v50, %v6643_v8  ;;  %v1749_v23 = vrot.slane %v6538_v13, %v6583_v27 }
 0x35b   : >> { %v2779_v44 = vcombine.low %v1677_v46, %v1681_v42  ;;  %v1753_v58 = vrot.slane %v6538_v13, %v6586_v12  ;;  %v2786_v5 = vrot.slane %v2776_v63, %v6643_v8  ;;  %v2793_v25 = vrot.slane %v2777_v55, %v6643_v8 }
 0x35c   : >> { %v2872_v4 = vrot.slane %v2858_v14, %v6643_v8  ;;  %v2800_v43 = vrot.slane %v2778_v36, %v6643_v8  ;;  %v1757_v19 = vrot.slane %v6538_v13, %v6589_v6  ;;  %v1761_v38 = vrot.slane %v6538_v13, %v6592_v24 }
 0x35d   : >> { %v2807_v39 = vrot.slane %v2779_v44, %v6643_v8  ;;  %v1765_v2 = vrot.slane %v6538_v13, %v6595_v33  ;;  %v2808_v30 = vcombine.low %v2786_v5, %v2793_v25  ;;  %v1769_v51 = vrot.slane %v6538_v13, %v6598_v48 }
 0x35e   : >> { %v2873_v62 = vcombine.low %v2865_v41, %v2872_v4  ;;  %v1773_v18 = vrot.slane %v6538_v13, %v6601_v45  ;;  %v1777_v11 = vrot.slane %v6538_v13, %v6604_v17  ;;  %v2923_v31 = vcombine.low %v1749_v23, %v1753_v58 }
 0x35f   : >> { %v2809_v49 = vcombine.low %v2800_v43, %v2807_v39  ;;  %v2924_v20 = vcombine.low %v1757_v19, %v1761_v38  ;;  %v2816_v7 = vrot.slane %v2808_v30, %v6643_v8  ;;  %v2925_v32 = vcombine.low %v1765_v2, %v1769_v51 }
 0x360   : >> { %4072 = vperm.xlu1 %5554, %v2873_v62   ;;  %v1717_v50 = vrot.slane %v6541_v54, %v6583_v27  ;;  %v1721_v46 = vrot.slane %v6541_v54, %v6586_v12  ;;  %v2926_v14 = vcombine.low %v1773_v18, %v1777_v11  ;;  %v2933_v63 = vrot.slane %v2923_v31, %v6643_v8 }
 0x361   : >> { %v2823_v42 = vrot.slane %v2809_v49, %v6643_v8  ;;  %v2940_v55 = vrot.slane %v2924_v20, %v6643_v8  ;;  %v2947_v36 = vrot.slane %v2925_v32, %v6643_v8  ;;  %v1725_v41 = vrot.slane %v6541_v54, %v6589_v6 }
 0x362   : >> { %v1729_v44 = vrot.slane %v6541_v54, %v6592_v24  ;;  %v1733_v23 = vrot.slane %v6541_v54, %v6595_v33  ;;  %v2954_v4 = vrot.slane %v2926_v14, %v6643_v8  ;;  %v1737_v25 = vrot.slane %v6541_v54, %v6598_v48 }
 0x363   : >> { %v2824_v58 = vcombine.low %v2816_v7, %v2823_v42  ;;  %v2955_v5 = vcombine.low %v2933_v63, %v2940_v55  ;;  %v1741_v43 = vrot.slane %v6541_v54, %v6601_v45  ;;  %v1745_v39 = vrot.slane %v6541_v54, %v6604_v17 }
 0x364   : >> { %v2874_v19 = vcombine.low %v1717_v50, %v1721_v46  ;;  %v2875_v38 = vcombine.low %v1725_v41, %v1729_v44  ;;  %v2956_v2 = vcombine.low %v2947_v36, %v2954_v4  ;;  %v2876_v30 = vcombine.low %v1733_v23, %v1737_v25 }
 0x365   : >> { %4069 = vperm.xlu0 %5553, %v2824_v58   ;;  %v2963_v62 = vrot.slane %v2955_v5, %v6643_v8  ;;  %v1973_v51 = vrot.slane %v6499_v15, %v6583_v27  ;;  %v2877_v18 = vcombine.low %v1741_v43, %v1745_v39  ;;  %v1977_v31 = vrot.slane %v6499_v15, %v6586_v12 }
 0x366   : >> { %v2884_v49 = vrot.slane %v2874_v19, %v6643_v8  ;;  %v2891_v11 = vrot.slane %v2875_v38, %v6643_v8  ;;  %v2970_v20 = vrot.slane %v2956_v2, %v6643_v8  ;;  %v2898_v7 = vrot.slane %v2876_v30, %v6643_v8 }
 0x367   : >> { %v1981_v32 = vrot.slane %v6499_v15, %v6589_v6  ;;  %v1985_v50 = vrot.slane %v6499_v15, %v6592_v24  ;;  %v2905_v46 = vrot.slane %v2877_v18, %v6643_v8  ;;  %v1989_v14 = vrot.slane %v6499_v15, %v6595_v33 }
 0x368   : >> { %v2906_v42 = vcombine.low %v2884_v49, %v2891_v11  ;;  %v1993_v63 = vrot.slane %v6499_v15, %v6598_v48  ;;  %v2971_v55 = vcombine.low %v2963_v62, %v2970_v20  ;;  %v1997_v36 = vrot.slane %v6499_v15, %v6601_v45 }
 0x369   : >> { %v2001_v41 = vrot.slane %v6499_v15, %v6604_v17  ;;  %v3266_v44 = vcombine.low %v1973_v51, %v1977_v31  ;;  %v2907_v23 = vcombine.low %v2898_v7, %v2905_v46  ;;  %v3267_v4 = vcombine.low %v1981_v32, %v1985_v50 }
 0x36a   : >> { %v2914_v58 = vrot.slane %v2906_v42, %v6643_v8  ;;  %v3268_v5 = vcombine.low %v1989_v14, %v1993_v63  ;;  %4078 = vperm.xlu1 %5554, %v2971_v55   ;;  %v1781_v39 = vrot.slane %v6553_v34, %v6583_v27  ;;  %v1785_v19 = vrot.slane %v6553_v34, %v6586_v12 }
 0x36b   : >> { %v3269_v25 = vcombine.low %v1997_v36, %v2001_v41  ;;  %v3276_v43 = vrot.slane %v3266_v44, %v6643_v8  ;;  %v2921_v38 = vrot.slane %v2907_v23, %v6643_v8  ;;  %v3283_v2 = vrot.slane %v3267_v4, %v6643_v8 }
 0x36c   : >> { %v3290_v62 = vrot.slane %v3268_v5, %v6643_v8  ;;  %v1789_v30 = vrot.slane %v6553_v34, %v6589_v6  ;;  %v1793_v18 = vrot.slane %v6553_v34, %v6592_v24  ;;  %v1797_v49 = vrot.slane %v6553_v34, %v6595_v33 }
 0x36d   : >> { %v3297_v51 = vrot.slane %v3269_v25, %v6643_v8  ;;  %v1801_v11 = vrot.slane %v6553_v34, %v6598_v48  ;;  %v2922_v31 = vcombine.low %v2914_v58, %v2921_v38  ;;  %v3298_v20 = vcombine.low %v3276_v43, %v3283_v2 }
 0x36e   : >> { %v1805_v7 = vrot.slane %v6553_v34, %v6601_v45  ;;  %v1809_v32 = vrot.slane %v6553_v34, %v6604_v17  ;;  %v2972_v46 = vcombine.low %v1781_v39, %v1785_v19  ;;  %v2973_v42 = vcombine.low %v1789_v30, %v1793_v18 }
 0x36f   : >> { %v3299_v50 = vcombine.low %v3290_v62, %v3297_v51  ;;  %v2974_v14 = vcombine.low %v1797_v49, %v1801_v11  ;;  %4075 = vperm.xlu0 %5553, %v2922_v31   ;;  %v3306_v63 = vrot.slane %v3298_v20, %v6643_v8  ;;  %v2037_v36 = vrot.slane %v6511_v1, %v6583_v27 }
 0x370   : >> { %v2975_v55 = vcombine.low %v1805_v7, %v1809_v32  ;;  %v2041_v41 = vrot.slane %v6511_v1, %v6586_v12  ;;  %v2982_v23 = vrot.slane %v2972_v46, %v6643_v8  ;;  %v2989_v58 = vrot.slane %v2973_v42, %v6643_v8 }
 0x371   : >> { %v3313_v44 = vrot.slane %v3299_v50, %v6643_v8  ;;  %v2996_v4 = vrot.slane %v2974_v14, %v6643_v8  ;;  %v2045_v25 = vrot.slane %v6511_v1, %v6589_v6  ;;  %v2049_v43 = vrot.slane %v6511_v1, %v6592_v24 }
 0x372   : >> { %v3003_v5 = vrot.slane %v2975_v55, %v6643_v8  ;;  %v2053_v39 = vrot.slane %v6511_v1, %v6595_v33  ;;  %v3004_v38 = vcombine.low %v2982_v23, %v2989_v58  ;;  %v2057_v2 = vrot.slane %v6511_v1, %v6598_v48 }
 0x373   : >> { %v3314_v19 = vcombine.low %v3306_v63, %v3313_v44  ;;  %v2061_v62 = vrot.slane %v6511_v1, %v6601_v45  ;;  %v2065_v51 = vrot.slane %v6511_v1, %v6604_v17  ;;  %v3364_v18 = vcombine.low %v2037_v36, %v2041_v41 }
 0x374   : >> { %v3005_v30 = vcombine.low %v2996_v4, %v3003_v5  ;;  %v3365_v49 = vcombine.low %v2045_v25, %v2049_v43  ;;  %v3012_v11 = vrot.slane %v3004_v38, %v6643_v8  ;;  %v3366_v31 = vcombine.low %v2053_v39, %v2057_v2 }
 0x375   : >> { %4099 = vperm.xlu1 %5554, %v3314_v19   ;;  %v2005_v20 = vrot.slane %v6496_v61, %v6583_v27  ;;  %v2009_v7 = vrot.slane %v6496_v61, %v6586_v12  ;;  %v3367_v50 = vcombine.low %v2061_v62, %v2065_v51  ;;  %v3374_v46 = vrot.slane %v3364_v18, %v6643_v8 }
 0x376   : >> { %v3019_v32 = vrot.slane %v3005_v30, %v6643_v8  ;;  %v3381_v42 = vrot.slane %v3365_v49, %v6643_v8  ;;  %v3388_v14 = vrot.slane %v3366_v31, %v6643_v8  ;;  %v2013_v63 = vrot.slane %v6496_v61, %v6589_v6 }
 0x377   : >> { %v2017_v55 = vrot.slane %v6496_v61, %v6592_v24  ;;  %v2021_v36 = vrot.slane %v6496_v61, %v6595_v33  ;;  %v3395_v44 = vrot.slane %v3367_v50, %v6643_v8  ;;  %v2025_v58 = vrot.slane %v6496_v61, %v6598_v48 }
 0x378   : >> { %v3020_v41 = vcombine.low %v3012_v11, %v3019_v32  ;;  %v3396_v23 = vcombine.low %v3374_v46, %v3381_v42  ;;  %v2029_v4 = vrot.slane %v6496_v61, %v6601_v45  ;;  %v2033_v5 = vrot.slane %v6496_v61, %v6604_v17 }
 0x379   : >> { %v3315_v25 = vcombine.low %v2005_v20, %v2009_v7  ;;  %v3316_v43 = vcombine.low %v2013_v63, %v2017_v55  ;;  %v3397_v39 = vcombine.low %v3388_v14, %v3395_v44  ;;  %v3317_v38 = vcombine.low %v2021_v36, %v2025_v58 }
 0x37a   : >> { %4081 = vperm.xlu0 %5553, %v3020_v41   ;;  %v3404_v19 = vrot.slane %v3396_v23, %v6643_v8  ;;  %v2101_v2 = vrot.slane %v6523_v59, %v6583_v27  ;;  %v3318_v62 = vcombine.low %v2029_v4, %v2033_v5  ;;  %v2105_v18 = vrot.slane %v6523_v59, %v6586_v12 }
 0x37b   : >> { %v3325_v30 = vrot.slane %v3315_v25, %v6643_v8  ;;  %v3332_v51 = vrot.slane %v3316_v43, %v6643_v8  ;;  %v3411_v49 = vrot.slane %v3397_v39, %v6643_v8  ;;  %v3339_v11 = vrot.slane %v3317_v38, %v6643_v8 }
 0x37c   : >> { %v2109_v31 = vrot.slane %v6523_v59, %v6589_v6  ;;  %v2113_v20 = vrot.slane %v6523_v59, %v6592_v24  ;;  %v3346_v7 = vrot.slane %v3318_v62, %v6643_v8  ;;  %v2117_v50 = vrot.slane %v6523_v59, %v6595_v33 }
 0x37d   : >> { %v3347_v32 = vcombine.low %v3325_v30, %v3332_v51  ;;  %v2121_v46 = vrot.slane %v6523_v59, %v6598_v48  ;;  %v3412_v42 = vcombine.low %v3404_v19, %v3411_v49  ;;  %v2125_v14 = vrot.slane %v6523_v59, %v6601_v45 }
 0x37e   : >> { %v2129_v63 = vrot.slane %v6523_v59, %v6604_v17  ;;  %v3462_v55 = vcombine.low %v2101_v2, %v2105_v18  ;;  %v3348_v36 = vcombine.low %v3339_v11, %v3346_v7  ;;  %v3463_v44 = vcombine.low %v2109_v31, %v2113_v20 }
 0x37f   : >> { %v3355_v41 = vrot.slane %v3347_v32, %v6643_v8  ;;  %v3464_v23 = vcombine.low %v2117_v50, %v2121_v46  ;;  %4105 = vperm.xlu1 %5554, %v3412_v42   ;;  %v2069_v5 = vrot.slane %v6508_v40, %v6583_v27  ;;  %v2073_v25 = vrot.slane %v6508_v40, %v6586_v12 }
 0x380   : >> { %v3465_v58 = vcombine.low %v2125_v14, %v2129_v63  ;;  %v3472_v4 = vrot.slane %v3462_v55, %v6643_v8  ;;  %v3362_v43 = vrot.slane %v3348_v36, %v6643_v8  ;;  %v3479_v39 = vrot.slane %v3463_v44, %v6643_v8 }
 0x381   : >> { %v3486_v19 = vrot.slane %v3464_v23, %v6643_v8  ;;  %v2077_v38 = vrot.slane %v6508_v40, %v6589_v6  ;;  %v2081_v62 = vrot.slane %v6508_v40, %v6592_v24  ;;  %v2085_v30 = vrot.slane %v6508_v40, %v6595_v33 }
 0x382   : >> { %v3493_v2 = vrot.slane %v3465_v58, %v6643_v8  ;;  %v2089_v51 = vrot.slane %v6508_v40, %v6598_v48  ;;  %v3363_v18 = vcombine.low %v3355_v41, %v3362_v43  ;;  %v3494_v49 = vcombine.low %v3472_v4, %v3479_v39 }
 0x383   : >> { %v2093_v11 = vrot.slane %v6508_v40, %v6601_v45  ;;  %v2097_v31 = vrot.slane %v6508_v40, %v6604_v17  ;;  %v3413_v7 = vcombine.low %v2069_v5, %v2073_v25  ;;  %v3414_v32 = vcombine.low %v2077_v38, %v2081_v62 }
 0x384   : >> { %v3495_v20 = vcombine.low %v3486_v19, %v3493_v2  ;;  %v3415_v50 = vcombine.low %v2085_v30, %v2089_v51  ;;  %4102 = vperm.xlu0 %5553, %v3363_v18   ;;  %v3502_v46 = vrot.slane %v3494_v49, %v6643_v8  ;;  %v2165_v14 = vrot.slane %v6535_v26, %v6583_v27 }
 0x385   : >> { %v3416_v42 = vcombine.low %v2093_v11, %v2097_v31  ;;  %v2169_v63 = vrot.slane %v6535_v26, %v6586_v12  ;;  %v3423_v36 = vrot.slane %v3413_v7, %v6643_v8  ;;  %v3430_v41 = vrot.slane %v3414_v32, %v6643_v8 }
 0x386   : >> { %v3509_v55 = vrot.slane %v3495_v20, %v6643_v8  ;;  %v3437_v44 = vrot.slane %v3415_v50, %v6643_v8  ;;  %v2173_v58 = vrot.slane %v6535_v26, %v6589_v6  ;;  %v2177_v4 = vrot.slane %v6535_v26, %v6592_v24 }
 0x387   : >> { %v3444_v23 = vrot.slane %v3416_v42, %v6643_v8  ;;  %v2181_v5 = vrot.slane %v6535_v26, %v6595_v33  ;;  %v3445_v43 = vcombine.low %v3423_v36, %v3430_v41  ;;  %v2185_v39 = vrot.slane %v6535_v26, %v6598_v48 }
 0x388   : >> { %v3510_v25 = vcombine.low %v3502_v46, %v3509_v55  ;;  %v2189_v19 = vrot.slane %v6535_v26, %v6601_v45  ;;  %v2193_v2 = vrot.slane %v6535_v26, %v6604_v17  ;;  %v3560_v62 = vcombine.low %v2165_v14, %v2169_v63 }
 0x389   : >> { %v3446_v38 = vcombine.low %v3437_v44, %v3444_v23  ;;  %v3561_v30 = vcombine.low %v2173_v58, %v2177_v4  ;;  %v3453_v51 = vrot.slane %v3445_v43, %v6643_v8  ;;  %v3562_v18 = vcombine.low %v2181_v5, %v2185_v39 }
 0x38a   : >> { %4111 = vperm.xlu1 %5554, %v3510_v25   ;;  %v2133_v49 = vrot.slane %v6520_v35, %v6583_v27  ;;  %v2137_v11 = vrot.slane %v6520_v35, %v6586_v12  ;;  %v3563_v20 = vcombine.low %v2189_v19, %v2193_v2  ;;  %v3570_v7 = vrot.slane %v3560_v62, %v6643_v8 }
 0x38b   : >> { %v3460_v31 = vrot.slane %v3446_v38, %v6643_v8  ;;  %v3577_v32 = vrot.slane %v3561_v30, %v6643_v8  ;;  %v3584_v50 = vrot.slane %v3562_v18, %v6643_v8  ;;  %v2141_v46 = vrot.slane %v6520_v35, %v6589_v6 }
 0x38c   : >> { %v2145_v42 = vrot.slane %v6520_v35, %v6592_v24  ;;  %v2149_v14 = vrot.slane %v6520_v35, %v6595_v33  ;;  %v3591_v55 = vrot.slane %v3563_v20, %v6643_v8  ;;  %v2153_v41 = vrot.slane %v6520_v35, %v6598_v48 }
 0x38d   : >> { %v3461_v63 = vcombine.low %v3453_v51, %v3460_v31  ;;  %v3592_v36 = vcombine.low %v3570_v7, %v3577_v32  ;;  %v2157_v44 = vrot.slane %v6520_v35, %v6601_v45  ;;  %v2161_v23 = vrot.slane %v6520_v35, %v6604_v17 }
 0x38e   : >> { %v3511_v58 = vcombine.low %v2133_v49, %v2137_v11  ;;  %v3512_v4 = vcombine.low %v2141_v46, %v2145_v42  ;;  %v3593_v5 = vcombine.low %v3584_v50, %v3591_v55  ;;  %v3513_v43 = vcombine.low %v2149_v14, %v2153_v41 }
 0x38f   : >> { %4108 = vperm.xlu0 %5553, %v3461_v63   ;;  %v3600_v25 = vrot.slane %v3592_v36, %v6643_v8  ;;  %v2229_v39 = vrot.slane %v6547_v52, %v6583_v27  ;;  %v3514_v19 = vcombine.low %v2157_v44, %v2161_v23  ;;  %v2233_v62 = vrot.slane %v6547_v52, %v6586_v12 }
 0x390   : >> { %v3521_v38 = vrot.slane %v3511_v58, %v6643_v8  ;;  %v3528_v2 = vrot.slane %v3512_v4, %v6643_v8  ;;  %v3607_v30 = vrot.slane %v3593_v5, %v6643_v8  ;;  %v3535_v51 = vrot.slane %v3513_v43, %v6643_v8 }
 0x391   : >> { %v2237_v18 = vrot.slane %v6547_v52, %v6589_v6  ;;  %v2241_v49 = vrot.slane %v6547_v52, %v6592_v24  ;;  %v3542_v11 = vrot.slane %v3514_v19, %v6643_v8  ;;  %v2245_v20 = vrot.slane %v6547_v52, %v6595_v33 }
 0x392   : >> { %v3543_v31 = vcombine.low %v3521_v38, %v3528_v2  ;;  %v2249_v7 = vrot.slane %v6547_v52, %v6598_v48  ;;  %v3608_v32 = vcombine.low %v3600_v25, %v3607_v30  ;;  %v2253_v50 = vrot.slane %v6547_v52, %v6601_v45 }
 0x393   : >> { %v2257_v46 = vrot.slane %v6547_v52, %v6604_v17  ;;  %v3658_v42 = vcombine.low %v2229_v39, %v2233_v62  ;;  %v3544_v14 = vcombine.low %v3535_v51, %v3542_v11  ;;  %v3659_v55 = vcombine.low %v2237_v18, %v2241_v49 }
 0x394   : >> { %v3551_v63 = vrot.slane %v3543_v31, %v6643_v8  ;;  %v3660_v36 = vcombine.low %v2245_v20, %v2249_v7  ;;  %4117 = vperm.xlu1 %5554, %v3608_v32   ;;  %v2197_v23 = vrot.slane %v6532_v28, %v6583_v27  ;;  %v2201_v58 = vrot.slane %v6532_v28, %v6586_v12 }
 0x395   : >> { %v3661_v41 = vcombine.low %v2253_v50, %v2257_v46  ;;  %v3668_v44 = vrot.slane %v3658_v42, %v6643_v8  ;;  %v3558_v4 = vrot.slane %v3544_v14, %v6643_v8  ;;  %v3675_v5 = vrot.slane %v3659_v55, %v6643_v8 }
 0x396   : >> { %v3682_v25 = vrot.slane %v3660_v36, %v6643_v8  ;;  %v2205_v43 = vrot.slane %v6532_v28, %v6589_v6  ;;  %v2209_v19 = vrot.slane %v6532_v28, %v6592_v24  ;;  %v2213_v38 = vrot.slane %v6532_v28, %v6595_v33 }
 0x397   : >> { %v3689_v39 = vrot.slane %v3661_v41, %v6643_v8  ;;  %v2217_v2 = vrot.slane %v6532_v28, %v6598_v48  ;;  %v3559_v62 = vcombine.low %v3551_v63, %v3558_v4  ;;  %v3690_v30 = vcombine.low %v3668_v44, %v3675_v5 }
 0x398   : >> { %v2221_v51 = vrot.slane %v6532_v28, %v6601_v45  ;;  %v2225_v18 = vrot.slane %v6532_v28, %v6604_v17  ;;  %v3609_v11 = vcombine.low %v2197_v23, %v2201_v58  ;;  %v3610_v31 = vcombine.low %v2205_v43, %v2209_v19 }
 0x399   : >> { %v3691_v49 = vcombine.low %v3682_v25, %v3689_v39  ;;  %v3611_v20 = vcombine.low %v2213_v38, %v2217_v2  ;;  %4114 = vperm.xlu0 %5553, %v3559_v62   ;;  %v3698_v7 = vrot.slane %v3690_v30, %v6643_v8  ;;  %v2293_v50 = vrot.slane %v6559_v60, %v6583_v27 }
 0x39a   : >> { %v3612_v32 = vcombine.low %v2221_v51, %v2225_v18  ;;  %v2297_v46 = vrot.slane %v6559_v60, %v6586_v12  ;;  %v3619_v14 = vrot.slane %v3609_v11, %v6643_v8  ;;  %v3626_v63 = vrot.slane %v3610_v31, %v6643_v8 }
 0x39b   : >> { %v3705_v42 = vrot.slane %v3691_v49, %v6643_v8  ;;  %v3633_v55 = vrot.slane %v3611_v20, %v6643_v8  ;;  %v2301_v41 = vrot.slane %v6559_v60, %v6589_v6  ;;  %v2305_v44 = vrot.slane %v6559_v60, %v6592_v24 }
 0x39c   : >> { %v3640_v36 = vrot.slane %v3612_v32, %v6643_v8  ;;  %v2309_v23 = vrot.slane %v6559_v60, %v6595_v33  ;;  %v3641_v4 = vcombine.low %v3619_v14, %v3626_v63  ;;  %v2313_v5 = vrot.slane %v6559_v60, %v6598_v48 }
 0x39d   : >> { %v3706_v58 = vcombine.low %v3698_v7, %v3705_v42  ;;  %v2317_v25 = vrot.slane %v6559_v60, %v6601_v45  ;;  %v2321_v39 = vrot.slane %v6559_v60, %v6604_v17  ;;  %v3756_v19 = vcombine.low %v2293_v50, %v2297_v46 }
 0x39e   : >> { %v3642_v43 = vcombine.low %v3633_v55, %v3640_v36  ;;  %v3757_v38 = vcombine.low %v2301_v41, %v2305_v44  ;;  %v3649_v2 = vrot.slane %v3641_v4, %v6643_v8  ;;  %v3758_v62 = vcombine.low %v2309_v23, %v2313_v5 }
 0x39f   : >> { %4123 = vperm.xlu1 %5554, %v3706_v58   ;;  %v2261_v30 = vrot.slane %v6544_v9, %v6583_v27  ;;  %v2265_v51 = vrot.slane %v6544_v9, %v6586_v12  ;;  %v3759_v49 = vcombine.low %v2317_v25, %v2321_v39  ;;  %v3766_v11 = vrot.slane %v3756_v19, %v6643_v8 }
 0x3a0   : >> { %v3656_v18 = vrot.slane %v3642_v43, %v6643_v8  ;;  %v3773_v31 = vrot.slane %v3757_v38, %v6643_v8  ;;  %v3780_v20 = vrot.slane %v3758_v62, %v6643_v8  ;;  %v2269_v7 = vrot.slane %v6544_v9, %v6589_v6 }
 0x3a1   : >> { %v2273_v32 = vrot.slane %v6544_v9, %v6592_v24  ;;  %v2277_v50 = vrot.slane %v6544_v9, %v6595_v33  ;;  %v3787_v42 = vrot.slane %v3759_v49, %v6643_v8  ;;  %v2281_v63 = vrot.slane %v6544_v9, %v6598_v48 }
 0x3a2   : >> { %v3657_v46 = vcombine.low %v3649_v2, %v3656_v18  ;;  %v3788_v14 = vcombine.low %v3766_v11, %v3773_v31  ;;  %v2285_v55 = vrot.slane %v6544_v9, %v6601_v45  ;;  %v2289_v36 = vrot.slane %v6544_v9, %v6604_v17 }
 0x3a3   : >> { %v3707_v41 = vcombine.low %v2261_v30, %v2265_v51  ;;  %v3708_v44 = vcombine.low %v2269_v7, %v2273_v32  ;;  %v3789_v23 = vcombine.low %v3780_v20, %v3787_v42  ;;  %v3709_v4 = vcombine.low %v2277_v50, %v2281_v63 }
 0x3a4   : >> { %4120 = vperm.xlu0 %5553, %v3657_v46   ;;  %v3796_v58 = vrot.slane %v3788_v14, %v6643_v8  ;;  %v2325_v5 = vrot.slane %v6556_v0, %v6583_v27  ;;  %v3710_v25 = vcombine.low %v2285_v55, %v2289_v36  ;;  %v2329_v19 = vrot.slane %v6556_v0, %v6586_v12 }
 0x3a5   : >> { %v3717_v43 = vrot.slane %v3707_v41, %v6643_v8  ;;  %v3724_v39 = vrot.slane %v3708_v44, %v6643_v8  ;;  %v3803_v38 = vrot.slane %v3789_v23, %v6643_v8  ;;  %v3731_v2 = vrot.slane %v3709_v4, %v6643_v8 }
 0x3a6   : >> { %v2333_v62 = vrot.slane %v6556_v0, %v6589_v6  ;;  %v2337_v30 = vrot.slane %v6556_v0, %v6592_v24  ;;  %v3738_v51 = vrot.slane %v3710_v25, %v6643_v8  ;;  %v2341_v49 = vrot.slane %v6556_v0, %v6595_v33 }
 0x3a7   : >> { %v3739_v18 = vcombine.low %v3717_v43, %v3724_v39  ;;  %v2345_v11 = vrot.slane %v6556_v0, %v6598_v48  ;;  %v3804_v31 = vcombine.low %v3796_v58, %v3803_v38  ;;  %v2349_v20 = vrot.slane %v6556_v0, %v6601_v45 }
 0x3a8   : >> { %v2353_v7 = vrot.slane %v6556_v0, %v6604_v17  ;;  %v3805_v32 = vcombine.low %v2325_v5, %v2329_v19  ;;  %v3740_v50 = vcombine.low %v3731_v2, %v3738_v51  ;;  %v3806_v42 = vcombine.low %v2333_v62, %v2337_v30 }
 0x3a9   : >> { %v3747_v46 = vrot.slane %v3739_v18, %v6643_v8  ;;  %v3807_v14 = vcombine.low %v2341_v49, %v2345_v11  ;;  %4129 = vperm.xlu1 %5554, %v3804_v31   ;;  %v1813_v36 = vrot.slane %v6550_v22, %v6583_v27  ;;  %v1817_v41 = vrot.slane %v6550_v22, %v6586_v12 }
 0x3aa   : >> { %v3808_v63 = vcombine.low %v2349_v20, %v2353_v7  ;;  %v3815_v55 = vrot.slane %v3805_v32, %v6643_v8  ;;  %v3754_v44 = vrot.slane %v3740_v50, %v6643_v8  ;;  %v3822_v23 = vrot.slane %v3806_v42, %v6643_v8 }
 0x3ab   : >> { %v3829_v58 = vrot.slane %v3807_v14, %v6643_v8  ;;  %v1821_v4 = vrot.slane %v6550_v22, %v6589_v6  ;;  %v1825_v25 = vrot.slane %v6550_v22, %v6592_v24  ;;  %v1829_v43 = vrot.slane %v6550_v22, %v6595_v33 }
 0x3ac   : >> { %v3836_v5 = vrot.slane %v3808_v63, %v6643_v8  ;;  %v1833_v39 = vrot.slane %v6550_v22, %v6598_v48  ;;  %v3755_v19 = vcombine.low %v3747_v46, %v3754_v44  ;;  %v3837_v38 = vcombine.low %v3815_v55, %v3822_v23 }
 0x3ad   : >> { %v1837_v2 = vrot.slane %v6550_v22, %v6601_v45  ;;  %v1841_v62 = vrot.slane %v6550_v22, %v6604_v17  ;;  %v3021_v51 = vcombine.low %v1813_v36, %v1817_v41  ;;  %v3022_v18 = vcombine.low %v1821_v4, %v1825_v25 }
 0x3ae   : >> { %v3838_v30 = vcombine.low %v3829_v58, %v3836_v5  ;;  %v3023_v49 = vcombine.low %v1829_v43, %v1833_v39  ;;  %4126 = vperm.xlu0 %5553, %v3755_v19   ;;  %v3845_v11 = vrot.slane %v3837_v38, %v6643_v8  ;;  %v2357_v20 = vrot.slane %v6571_v29, %v6583_v27 }
 0x3af   : >> { %v3024_v31 = vcombine.low %v1837_v2, %v1841_v62  ;;  %v2361_v7 = vrot.slane %v6571_v29, %v6586_v12  ;;  %v3031_v50 = vrot.slane %v3021_v51, %v6643_v8  ;;  %v3038_v46 = vrot.slane %v3022_v18, %v6643_v8 }
 0x3b0   : >> { %v3852_v32 = vrot.slane %v3838_v30, %v6643_v8  ;;  %v3045_v42 = vrot.slane %v3023_v49, %v6643_v8  ;;  %v2365_v63 = vrot.slane %v6571_v29, %v6589_v6  ;;  %v2369_v55 = vrot.slane %v6571_v29, %v6592_v24 }
 0x3b1   : >> { %v3052_v14 = vrot.slane %v3024_v31, %v6643_v8  ;;  %v2373_v36 = vrot.slane %v6571_v29, %v6595_v33  ;;  %v3053_v44 = vcombine.low %v3031_v50, %v3038_v46  ;;  %v2377_v23 = vrot.slane %v6571_v29, %v6598_v48 }
 0x3b2   : >> { %v3853_v41 = vcombine.low %v3845_v11, %v3852_v32  ;;  %v2381_v58 = vrot.slane %v6571_v29, %v6601_v45  ;;  %v2385_v5 = vrot.slane %v6571_v29, %v6604_v17  ;;  %v3854_v25 = vcombine.low %v2357_v20, %v2361_v7 }
 0x3b3   : >> { %v3054_v4 = vcombine.low %v3045_v42, %v3052_v14  ;;  %v3855_v43 = vcombine.low %v2365_v63, %v2369_v55  ;;  %v3061_v39 = vrot.slane %v3053_v44, %v6643_v8  ;;  %v3856_v19 = vcombine.low %v2373_v36, %v2377_v23 }
 0x3b4   : >> { %4132 = vperm.xlu1 %5554, %v3853_v41   ;;  %v1845_v38 = vrot.slane %v6565_v10, %v6583_v27  ;;  %v1849_v2 = vrot.slane %v6565_v10, %v6586_v12  ;;  %v3857_v30 = vcombine.low %v2381_v58, %v2385_v5  ;;  %v3864_v51 = vrot.slane %v3854_v25, %v6643_v8 }
 0x3b5   : >> { %v3068_v62 = vrot.slane %v3054_v4, %v6643_v8  ;;  %v3871_v18 = vrot.slane %v3855_v43, %v6643_v8  ;;  %v3878_v49 = vrot.slane %v3856_v19, %v6643_v8  ;;  %v1853_v11 = vrot.slane %v6565_v10, %v6589_v6 }
 0x3b6   : >> { %v1857_v31 = vrot.slane %v6565_v10, %v6592_v24  ;;  %v1861_v20 = vrot.slane %v6565_v10, %v6595_v33  ;;  %v3885_v32 = vrot.slane %v3857_v30, %v6643_v8  ;;  %v1865_v46 = vrot.slane %v6565_v10, %v6598_v48 }
 0x3b7   : >> { %v3069_v7 = vcombine.low %v3061_v39, %v3068_v62  ;;  %v3886_v50 = vcombine.low %v3864_v51, %v3871_v18  ;;  %v1869_v42 = vrot.slane %v6565_v10, %v6601_v45  ;;  %v1873_v14 = vrot.slane %v6565_v10, %v6604_v17 }
 0x3b8   : >> { %v3070_v63 = vcombine.low %v1845_v38, %v1849_v2  ;;  %v3071_v55 = vcombine.low %v1853_v11, %v1857_v31  ;;  %v3887_v36 = vcombine.low %v3878_v49, %v3885_v32  ;;  %v3072_v44 = vcombine.low %v1861_v20, %v1865_v46 }
 0x3b9   : >> { %4084 = vperm.xlu0 %5553, %v3069_v7   ;;  %v3894_v41 = vrot.slane %v3886_v50, %v6643_v8  ;;  %v2389_v23 = vrot.slane %v6568_v16, %v6583_v27  ;;  %v3073_v58 = vcombine.low %v1869_v42, %v1873_v14  ;;  %v2393_v25 = vrot.slane %v6568_v16, %v6586_v12 }
 0x3ba   : >> { %v3080_v4 = vrot.slane %v3070_v63, %v6643_v8  ;;  %v3087_v5 = vrot.slane %v3071_v55, %v6643_v8  ;;  %v3901_v43 = vrot.slane %v3887_v36, %v6643_v8  ;;  %v3094_v39 = vrot.slane %v3072_v44, %v6643_v8 }
 0x3bb   : >> { %v2397_v19 = vrot.slane %v6568_v16, %v6589_v6  ;;  %v2401_v38 = vrot.slane %v6568_v16, %v6592_v24  ;;  %v3101_v2 = vrot.slane %v3073_v58, %v6643_v8  ;;  %v2405_v30 = vrot.slane %v6568_v16, %v6595_v33 }
 0x3bc   : >> { %v3102_v62 = vcombine.low %v3080_v4, %v3087_v5  ;;  %v2409_v51 = vrot.slane %v6568_v16, %v6598_v48  ;;  %v3902_v18 = vcombine.low %v3894_v41, %v3901_v43  ;;  %v2413_v49 = vrot.slane %v6568_v16, %v6601_v45 }
 0x3bd   : >> { %v2417_v11 = vrot.slane %v6568_v16, %v6604_v17  ;;  %v3903_v31 = vcombine.low %v2389_v23, %v2393_v25  ;;  %v3103_v20 = vcombine.low %v3094_v39, %v3101_v2  ;;  %v3904_v32 = vcombine.low %v2397_v19, %v2401_v38 }
 0x3be   : >> { %v3110_v7 = vrot.slane %v3102_v62, %v6643_v8  ;;  %v3905_v50 = vcombine.low %v2405_v30, %v2409_v51  ;;  %4135 = vperm.xlu1 %5554, %v3902_v18   ;;  %v1877_v14 = vrot.slane %v6562_v56, %v6583_v27  ;;  %v1881_v63 = vrot.slane %v6562_v56, %v6586_v12 }
 0x3bf   : >> { %v3906_v46 = vcombine.low %v2413_v49, %v2417_v11  ;;  %v3913_v42 = vrot.slane %v3903_v31, %v6643_v8  ;;  %v3117_v55 = vrot.slane %v3103_v20, %v6643_v8  ;;  %v3920_v36 = vrot.slane %v3904_v32, %v6643_v8  ;;  %v8095_v49 = vld [vmem:[#allocation80_spill] sm:$0xff] }
 0x3c0   : >> { %v3927_v41 = vrot.slane %v3905_v50, %v6643_v8  ;;  %v1885_v44 = vrot.slane %v6562_v56, %v6589_v6  ;;  %v1889_v58 = vrot.slane %v6562_v56, %v6592_v24  ;;  %v1893_v4 = vrot.slane %v6562_v56, %v6595_v33 }
 0x3c1   : >> { %v3934_v23 = vrot.slane %v3906_v46, %v6643_v8  ;;  %v1897_v5 = vrot.slane %v6562_v56, %v6598_v48  ;;  %v3118_v25 = vcombine.low %v3110_v7, %v3117_v55  ;;  %v3935_v43 = vcombine.low %v3913_v42, %v3920_v36 }
 0x3c2   : >> { %v1901_v39 = vrot.slane %v6562_v56, %v6601_v45  ;;  %v1905_v19 = vrot.slane %v6562_v56, %v6604_v17  ;;  %v3119_v2 = vcombine.low %v1877_v14, %v1881_v63  ;;  %v3120_v62 = vcombine.low %v1885_v44, %v1889_v58 }
 0x3c3   : >> { %v3936_v38 = vcombine.low %v3927_v41, %v3934_v23  ;;  %v3121_v30 = vcombine.low %v1893_v4, %v1897_v5  ;;  %4087 = vperm.xlu0 %5553, %v3118_v25   ;;  %v3943_v51 = vrot.slane %v3935_v43, %v6643_v8  ;;  %v2421_v11 = vrot.slane %v8095_v49, %v6583_v27 }
 0x3c4   : >> { %v3122_v18 = vcombine.low %v1901_v39, %v1905_v19  ;;  %v2425_v31 = vrot.slane %v8095_v49, %v6586_v12  ;;  %v3129_v7 = vrot.slane %v3119_v2, %v6643_v8  ;;  %v3136_v32 = vrot.slane %v3120_v62, %v6643_v8  ;;  %v8096_v39 = vld [vmem:[#allocation78_spill] sm:$0xff] }
 0x3c5   : >> { %v3950_v20 = vrot.slane %v3936_v38, %v6643_v8  ;;  %v3143_v50 = vrot.slane %v3121_v30, %v6643_v8  ;;  %v2429_v42 = vrot.slane %v8095_v49, %v6589_v6  ;;  %v2433_v14 = vrot.slane %v8095_v49, %v6592_v24 }
 0x3c6   : >> { %v3150_v46 = vrot.slane %v3122_v18, %v6643_v8  ;;  %v2437_v63 = vrot.slane %v8095_v49, %v6595_v33  ;;  %v3151_v36 = vcombine.low %v3129_v7, %v3136_v32  ;;  %v2441_v41 = vrot.slane %v8095_v49, %v6598_v48 }
 0x3c7   : >> { %v3951_v55 = vcombine.low %v3943_v51, %v3950_v20  ;;  %v2445_v44 = vrot.slane %v8095_v49, %v6601_v45  ;;  %v2449_v58 = vrot.slane %v8095_v49, %v6604_v17  ;;  %v3952_v4 = vcombine.low %v2421_v11, %v2425_v31 }
 0x3c8   : >> { %v3152_v23 = vcombine.low %v3143_v50, %v3150_v46  ;;  %v3953_v5 = vcombine.low %v2429_v42, %v2433_v14  ;;  %v3159_v25 = vrot.slane %v3151_v36, %v6643_v8  ;;  %v3954_v43 = vcombine.low %v2437_v63, %v2441_v41 }
 0x3c9   : >> { %4138 = vperm.xlu1 %5554, %v3951_v55   ;;  %v1909_v19 = vrot.slane %v8096_v39, %v6583_v27  ;;  %v1913_v38 = vrot.slane %v8096_v39, %v6586_v12  ;;  %v3955_v62 = vcombine.low %v2445_v44, %v2449_v58  ;;  %v3962_v30 = vrot.slane %v3952_v4, %v6643_v8  ;;  %v8097_v44 = vld [vmem:[#allocation79_spill] sm:$0xff] }
 0x3ca   : >> { %v3166_v2 = vrot.slane %v3152_v23, %v6643_v8  ;;  %v3969_v51 = vrot.slane %v3953_v5, %v6643_v8  ;;  %v3976_v18 = vrot.slane %v3954_v43, %v6643_v8  ;;  %v1917_v49 = vrot.slane %v8096_v39, %v6589_v6 }
 0x3cb   : >> { %v1921_v11 = vrot.slane %v8096_v39, %v6592_v24  ;;  %v1925_v31 = vrot.slane %v8096_v39, %v6595_v33  ;;  %v3983_v7 = vrot.slane %v3955_v62, %v6643_v8  ;;  %v1929_v50 = vrot.slane %v8096_v39, %v6598_v48 }
 0x3cc   : >> { %v3167_v20 = vcombine.low %v3159_v25, %v3166_v2  ;;  %v3984_v32 = vcombine.low %v3962_v30, %v3969_v51  ;;  %v1933_v46 = vrot.slane %v8096_v39, %v6601_v45  ;;  %v1937_v42 = vrot.slane %v8096_v39, %v6604_v17 }
 0x3cd   : >> { %v3168_v14 = vcombine.low %v1909_v19, %v1913_v38  ;;  %v3169_v63 = vcombine.low %v1917_v49, %v1921_v11  ;;  %v3985_v55 = vcombine.low %v3976_v18, %v3983_v7  ;;  %v3170_v41 = vcombine.low %v1925_v31, %v1929_v50 }
 0x3ce   : >> { %4090 = vperm.xlu0 %5553, %v3167_v20   ;;  %v3992_v36 = vrot.slane %v3984_v32, %v6643_v8  ;;  %v2453_v23 = vrot.slane %v8097_v44, %v6583_v27  ;;  %v3171_v58 = vcombine.low %v1933_v46, %v1937_v42  ;;  %v2457_v25 = vrot.slane %v8097_v44, %v6586_v12 }
 0x3cf   : >> { %v3178_v4 = vrot.slane %v3168_v14, %v6643_v8  ;;  %v3185_v5 = vrot.slane %v3169_v63, %v6643_v8  ;;  %v3999_v43 = vrot.slane %v3985_v55, %v6643_v8  ;;  %v3192_v39 = vrot.slane %v3170_v41, %v6643_v8  ;;  %v8098_v14 = vld [vmem:[#allocation77_spill] sm:$0xff] }
 0x3d0   : >> { %v2461_v19 = vrot.slane %v8097_v44, %v6589_v6  ;;  %v2465_v38 = vrot.slane %v8097_v44, %v6592_v24  ;;  %v3199_v2 = vrot.slane %v3171_v58, %v6643_v8  ;;  %v2469_v30 = vrot.slane %v8097_v44, %v6595_v33 }
 0x3d1   : >> { %v3200_v62 = vcombine.low %v3178_v4, %v3185_v5  ;;  %v2473_v51 = vrot.slane %v8097_v44, %v6598_v48  ;;  %v4000_v18 = vcombine.low %v3992_v36, %v3999_v43  ;;  %v2477_v49 = vrot.slane %v8097_v44, %v6601_v45 }
 0x3d2   : >> { %v2481_v11 = vrot.slane %v8097_v44, %v6604_v17  ;;  %v4001_v31 = vcombine.low %v2453_v23, %v2457_v25  ;;  %v3201_v20 = vcombine.low %v3192_v39, %v3199_v2  ;;  %v4002_v32 = vcombine.low %v2461_v19, %v2465_v38 }
 0x3d3   : >> { %v3208_v7 = vrot.slane %v3200_v62, %v6643_v8  ;;  %v4003_v50 = vcombine.low %v2469_v30, %v2473_v51  ;;  %4141 = vperm.xlu1 %5554, %v4000_v18   ;;  %v1941_v63 = vrot.slane %v8098_v14, %v6583_v27  ;;  %v1945_v55 = vrot.slane %v8098_v14, %v6586_v12 }
 0x3d4   : >> { %v4004_v46 = vcombine.low %v2477_v49, %v2481_v11  ;;  %v4011_v42 = vrot.slane %v4001_v31, %v6643_v8  ;;  %v3215_v36 = vrot.slane %v3201_v20, %v6643_v8  ;;  %v4018_v41 = vrot.slane %v4002_v32, %v6643_v8  ;;  %v4052_v32 = vpop.permute.xlu0 %4051 }
 0x3d5   : >> { %v4025_v44 = vrot.slane %v4003_v50, %v6643_v8  ;;  %v1949_v23 = vrot.slane %v8098_v14, %v6589_v6  ;;  %v1953_v4 = vrot.slane %v8098_v14, %v6592_v24  ;;  %v1957_v27 = vrot.slane %v8098_v14, %v6595_v33 }
 0x3d6   : >> { %v4032_v58 = vrot.slane %v4004_v46, %v6643_v8  ;;  %v1961_v12 = vrot.slane %v8098_v14, %v6598_v48  ;;  %v3216_v5 = vcombine.low %v3208_v7, %v3215_v36  ;;  %v4033_v25 = vcombine.low %v4011_v42, %v4018_v41  ;;  %v4058_v7 = vpop.permute.xlu1 %4057 }
 0x3d7   : >> { %v1965_v43 = vrot.slane %v8098_v14, %v6601_v45  ;;  %v1969_v39 = vrot.slane %v8098_v14, %v6604_v17  ;;  %v3217_v19 = vcombine.low %v1941_v63, %v1945_v55  ;;  %v3218_v38 = vcombine.low %v1949_v23, %v1953_v4 }
 0x3d8   : >> { %v4034_v6 = vcombine.low %v4025_v44, %v4032_v58  ;;  %v3219_v2 = vcombine.low %v1957_v27, %v1961_v12  ;;  %4093 = vperm.xlu0 %5553, %v3216_v5   ;;  %v4041_v24 = vrot.slane %v4033_v25, %v6643_v8  ;;  %v4055_v46 = vpop.permute.xlu0 %4054  ;;  %vm4169_vm13 = vcmask 261312  }
 0x3d9   : >> { %v3220_v62 = vcombine.low %v1965_v43, %v1969_v39  ;;  %v3227_v48 = vrot.slane %v3217_v19, %v6643_v8  ;;  %v3234_v30 = vrot.slane %v3218_v38, %v6643_v8  ;;  %v8099_v39 = vld [vmem:[#allocation4_spill] sm:$0xff]  ;;  %vm4176_vm14 = vcmask 326912  }
 0x3da   : >> { %v4048_v33 = vrot.slane %v4034_v6, %v6643_v8  ;;  %v3241_v51 = vrot.slane %v3219_v2, %v6643_v8  ;;  %v4061_v50 = vpop.permute.xlu1 %4060  ;;  %v4150_v6 = vadd.s32 4294967288, %v8099_v39  ;;  %v8100_v2 = vld [vmem:[#allocation3_spill] sm:$0xff]  ;;  %vm4183_vm15 = vcmask 392512  }
 0x3db   : >> { %v3248_v45 = vrot.slane %v3220_v62, %v6643_v8  ;;  %v3249_v17 = vcombine.low %v3227_v48, %v3234_v30  ;;  %v4157_v62 = vadd.s32 4294967280, %v8099_v39  ;;  %v4164_v30 = vadd.s32 4294967272, %v8099_v39 }
 0x3dc   : >> { %v4049_v18 = vcombine.low %v4041_v24, %v4048_v33  ;;  %v7315_v14 = vpop.permute.xlu0 %4063  ;;  %v4153_v24 = vsub.s32 %v4150_v6, %v8100_v2  ;;  %v4148_v33 = vsub.s32 %v8099_v39, %v8100_v2  ;;  %vm4190_vm1 = vcmask 458112  }
 0x3dd   : >> { %v3250_v49 = vcombine.low %v3241_v51, %v3248_v45  ;;  %v3257_v11 = vrot.slane %v3249_v17, %v6643_v8  ;;  %v4171_v17 = vadd.s32 4294967264, %v8099_v39  ;;  %vm4197_vm3 = vcmask 523712  }
 0x3de   : >> { %4144 = vperm.xlu1 %5554, %v4049_v18   ;;  %v7313_v42 = vpop.permute.xlu1 %4066  ;;  %v4154_v45 = vrot.slane %v4055_v46, %v4153_v24  ;;  %v4160_v18 = vsub.s32 %v4157_v62, %v8100_v2  ;;  %vm4204_vm4 = vcmask 589312   ;;  %vm4211_vm5 = vcmask 654912  }
 0x3df   : >> { %v3264_v31 = vrot.slane %v3250_v49, %v6643_v8  ;;  %v4174_v46 = vsub.s32 %v4171_v17, %v8100_v2  ;;  %vm4218_vm6 = vcmask 720512   ;;  %vm4225_vm7 = vcmask 786112  }
 0x3e0   : >> { %v7319_v55 = vpop.permute.xlu0 %4069  ;;  %v4161_v34 = vrot.slane %v4058_v7, %v4160_v18  ;;  %vm4232_vm8 = vcmask 851712   ;;  %vm4239_vm9 = vcmask 917312   ;;  %vm4246_vm10 = vcmask 982912  }
 0x3e1   : >> { %v3265_v20 = vcombine.low %v3257_v11, %v3264_v31  ;;  %v4149_v11 = vrot.slane %v4052_v32, %v4148_v33  ;;  %v4167_v31 = vsub.s32 %v4164_v30, %v8100_v2  ;;  %v4175_v7 = vrot.slane %v7315_v14, %v4174_v46 }
 0x3e2   : >> { %v7317_v63 = vpop.permute.xlu1 %4072 }
 0x3e3   : >> { %4096 = vperm.xlu0 %5553, %v3265_v20   ;;  %v4178_v20 = vadd.s32 4294967256, %v8099_v39  ;;  %v4156_v56 = vsel %vm4155_vm11, %v4154_v45, %v4149_v11 }
 0x3e4   : >> { %v4163_v32 = vsel %vm4162_vm12, %v4161_v34, %v4156_v56 }
 0x3e6   : >> { %v7321_v36 = vpop.permute.xlu1 %4078 }
 0x3ea   : >> { %v7323_v41 = vpop.permute.xlu0 %4075 }
 0x3f0   : >> { %v4100_v44 = vpop.permute.xlu1 %4099 }
 0x3f1   : >> { %v4258_v6 = vrot.slane %v4100_v44, %v4148_v33  ;;  %v4192_v44 = vadd.s32 4294967240, %v8099_v39  ;;  %v4168_v33 = vrot.slane %v4061_v50, %v4167_v31  ;;  %v4206_v50 = vadd.s32 4294967224, %v8099_v39 }
 0x3f3   : >> { %v4195_v56 = vsub.s32 %v4192_v44, %v8100_v2 }
 0x3f5   : >> { %v7325_v23 = vpop.permute.xlu0 %4081 }
 0x3fa   : >> { %v4106_v58 = vpop.permute.xlu1 %4105 }
 0x3fb   : >> { %v4267_v10 = vrot.slane %v4106_v58, %v4160_v18 }
 0x3ff   : >> { %v4103_v4 = vpop.permute.xlu0 %4102 }
 0x400   : >> { %v4262_v49 = vrot.slane %v4103_v4, %v4153_v24  ;;  %v4185_v4 = vadd.s32 4294967248, %v8099_v39  ;;  %v4181_v24 = vsub.s32 %v4178_v20, %v8100_v2  ;;  %v4220_v20 = vadd.s32 4294967208, %v8099_v39 }
 0x402   : >> { %v4263_v13 = vsel %vm4155_vm11, %v4262_v49, %v4258_v6  ;;  %v4188_v17 = vsub.s32 %v4185_v4, %v8100_v2  ;;  %v4199_v49 = vadd.s32 4294967232, %v8099_v39  ;;  %v4227_v4 = vadd.s32 4294967200, %v8099_v39 }
 0x403   : >> { %v4268_v30 = vsel %vm4162_vm12, %v4267_v10, %v4263_v13  ;;  %v4182_v13 = vrot.slane %v7313_v42, %v4181_v24  ;;  %v4196_v42 = vrot.slane %v7317_v63, %v4195_v56  ;;  %v4223_v63 = vsub.s32 %v4220_v20, %v8100_v2 }
 0x404   : >> { %v4189_v6 = vrot.slane %v7319_v55, %v4188_v17  ;;  %vm4253_vm11 = vcmask 1048512  }
 0x405   : >> { %v4112_v27 = vpop.permute.xlu1 %4111 }
 0x406   : >> { %v4277_v58 = vrot.slane %v4112_v27, %v4174_v46  ;;  %v4202_v46 = vsub.s32 %v4199_v49, %v8100_v2 }
 0x40a   : >> { %v4109_v12 = vpop.permute.xlu0 %4108 }
 0x40b   : >> { %v4272_v62 = vrot.slane %v4109_v12, %v4167_v31  ;;  %v4170_v12 = vsel %vm4169_vm13, %v4168_v33, %v4163_v32  ;;  %v4234_v32 = vadd.s32 4294967192, %v8099_v39  ;;  %v4241_v33 = vadd.s32 4294967184, %v8099_v39 }
 0x40d   : >> { %v4273_v45 = vsel %vm4169_vm13, %v4272_v62, %v4268_v30  ;;  %v4213_v62 = vadd.s32 4294967216, %v8099_v39  ;;  %v4237_v49 = vsub.s32 %v4234_v32, %v8100_v2 }
 0x40e   : >> { %v4278_v14 = vsel %vm4176_vm14, %v4277_v58, %v4273_v45  ;;  %v4248_v45 = vadd.s32 4294967176, %v8099_v39  ;;  %v4244_v39 = vsub.s32 %v4241_v33, %v8100_v2 }
 0x40f   : >> { %v7327_v5 = vpop.permute.xlu1 %4117 }
 0x410   : >> { %v4287_v10 = vrot.slane %v7327_v5, %v4188_v17  ;;  %v4209_v5 = vsub.s32 %v4206_v50, %v8100_v2  ;;  %v4230_v17 = vsub.s32 %v4227_v4, %v8100_v2 }
 0x414   : >> { %v4115_v25 = vpop.permute.xlu0 %4114 }
 0x415   : >> { %v4282_v18 = vrot.slane %v4115_v25, %v4181_v24  ;;  %v4177_v25 = vsel %vm4176_vm14, %v4175_v7, %v4170_v12  ;;  %v4203_v12 = vrot.slane %v7323_v41, %v4202_v46 }
 0x416   : >> { %v4184_v24 = vsel %vm4183_vm15, %v4182_v13, %v4177_v25 }
 0x417   : >> { %v4283_v11 = vsel %vm4183_vm15, %v4282_v18, %v4278_v14  ;;  %v4191_v18 = vsel %vm4190_vm1, %v4189_v6, %v4184_v24  ;;  %v4251_v14 = vsub.s32 %v4248_v45, %v8100_v2  ;;  %v8101_v45 = vlaneseq }
 0x418   : >> { %v4288_v44 = vsel %vm4190_vm1, %v4287_v10, %v4283_v11  ;;  %v4198_v13 = vsel %vm4197_vm3, %v4196_v42, %v4191_v18 }
 0x419   : >> { %v4205_v25 = vsel %vm4204_vm4, %v4203_v12, %v4198_v13  ;;  %vm4351_vm12 = vcmp.lt.s32.totalorder %v8101_v45, 256 }
 0x41a   : >> { %v7329_v43 = vpop.permute.xlu1 %4123 }
 0x41f   : >> { %v7332_v19 = vpop.permute.xlu0 %4120 }
 0x420   : >> { %v4292_v31 = vrot.slane %v7332_v19, %v4195_v56  ;;  %v4297_v19 = vrot.slane %v7329_v43, %v4202_v46  ;;  %v4216_v43 = vsub.s32 %v4213_v62, %v8100_v2 }
 0x422   : >> { %v4293_v58 = vsel %vm4197_vm3, %v4292_v31, %v4288_v44  ;;  %v4217_v11 = vrot.slane %v7325_v23, %v4216_v43 }
 0x423   : >> { %v4298_v50 = vsel %vm4204_vm4, %v4297_v19, %v4293_v58 }
 0x424   : >> { %v7334_v38 = vpop.permute.xlu1 %4129 }
 0x425   : >> { %v4307_v56 = vrot.slane %v7334_v38, %v4216_v43 }
 0x429   : >> { %v7340_v48 = vpop.permute.xlu0 %4126 }
 0x42a   : >> { %v4302_v30 = vrot.slane %v7340_v48, %v4209_v5  ;;  %v4210_v48 = vrot.slane %v7321_v36, %v4209_v5 }
 0x42c   : >> { %v4303_v41 = vsel %vm4211_vm5, %v4302_v30, %v4298_v50  ;;  %v4212_v62 = vsel %vm4211_vm5, %v4210_v48, %v4205_v25 }
 0x42d   : >> { %v4308_v46 = vsel %vm4218_vm6, %v4307_v56, %v4303_v41  ;;  %v4219_v42 = vsel %vm4218_vm6, %v4217_v11, %v4212_v62 }
 0x42f   : >> { %v7343_v51 = vpop.permute.xlu1 %4132 }
 0x430   : >> { %v4312_v10 = vrot.slane %v7343_v51, %v4223_v63 }
 0x432   : >> { %v4313_v23 = vsel %vm4225_vm7, %v4312_v10, %v4308_v46 }
 0x434   : >> { %v7349_v22 = vpop.permute.xlu0 %4084 }
 0x435   : >> { %v4224_v38 = vrot.slane %v7349_v22, %v4223_v63 }
 0x439   : >> { %v7352_v54 = vpop.permute.xlu1 %4135 }
 0x43a   : >> { %v4317_v31 = vrot.slane %v7352_v54, %v4230_v17 }
 0x43c   : >> { %v4318_v22 = vsel %vm4232_vm8, %v4317_v31, %v4313_v23 }
 0x43e   : >> { %v7362_v34 = vpop.permute.xlu0 %4087 }
 0x43f   : >> { %v4231_v51 = vrot.slane %v7362_v34, %v4230_v17 }
 0x444   : >> { %v7366_v27 = vpop.permute.xlu1 %4138 }
 0x445   : >> { %v4322_v20 = vrot.slane %v7366_v27, %v4237_v49  ;;  %v4226_v27 = vsel %vm4225_vm7, %v4224_v38, %v4219_v42 }
 0x446   : >> { %v4233_v34 = vsel %vm4232_vm8, %v4231_v51, %v4226_v27 }
 0x447   : >> { %v4323_v32 = vsel %vm4239_vm9, %v4322_v20, %v4318_v22 }
 0x449   : >> { %v4091_v55 = vpop.permute.xlu0 %4090 }
 0x44a   : >> { %v4238_v4 = vrot.slane %v4091_v55, %v4237_v49 }
 0x44c   : >> { %v4240_v44 = vsel %vm4239_vm9, %v4238_v4, %v4233_v34 }
 0x44e   : >> { %v4142_v7 = vpop.permute.xlu1 %4141 }
 0x44f   : >> { %v4327_v2 = vrot.slane %v4142_v7, %v4244_v39 }
 0x451   : >> { %v4328_v24 = vsel %vm4246_vm10, %v4327_v2, %v4323_v32 }
 0x453   : >> { %v4094_v36 = vpop.permute.xlu0 %4093 }
 0x454   : >> { %v4245_v5 = vrot.slane %v4094_v36, %v4244_v39 }
 0x456   : >> { %v4247_v58 = vsel %vm4246_vm10, %v4245_v5, %v4240_v44 }
 0x459   : >> { %v4145_v6 = vpop.permute.xlu1 %4144 }
 0x45a   : >> { %v4332_v54 = vrot.slane %v4145_v6, %v4251_v14 }
 0x45c   : >> { %v4333_v55 = vsel %vm4253_vm11, %v4332_v54, %v4328_v24 }
 0x45e   : >> { %v4097_v19 = vpop.permute.xlu0 %4096 }
 0x45f   : >> { %v4252_v33 = vrot.slane %v4097_v19, %v4251_v14 }
 0x461   : >> { %v4254_v30 = vsel %vm4253_vm11, %v4252_v33, %v4247_v58 }
 0x462   : >> { %v4334_v63 = vcombine.low %v4254_v30, %v4333_v55 }
 0x464   : >> { %v4341_v7 = vrot.slane %v4334_v63, %v6643_v8 }
 0x466   : >> { %v4348_v18 = vrot.slane %v4341_v7, %v6643_v8 }
 0x468   : >> { %4353 = vst.msk [vmem:[%s5691_s18] sm:$0x3] %vm4351_vm12, %v4348_v18 }
 0x469 PF: >> { %p5190_p5 = scmp.ge.s32.totalorder %s5603_s23, 9 }
 0x46b   : >> { %4357 = sbr.rel (%p5190_p5) target bundleno = 1563 (0x61b), region = 43 }
 0x470   : >> { %v8102_v12 = vld [vmem:[#allocation52_spill] sm:$0xff]  ;;  %v8104_v17 = vld [vmem:[#allocation51_spill] sm:$0xff]  ;;  %v8106_v56 = vld [vmem:[#allocation34_spill] sm:$0xff]  ;;  %vm4367_vm13 = vcmask 130112   ;;  %vm4374_vm14 = vcmask 195712   ;;  %vm4381_vm15 = vcmask 261312  }
 0x471   : >> { %5307 = vmatprep.subr.mxu0 %v8102_v12  ;;  %5499 = vmatprep.subr.mxu1 %v8102_v12  ;;  %v8103_v43 = vld [vmem:[#allocation36_spill] sm:$0xff]  ;;  %v8107_v41 = vld [vmem:[#allocation50_spill] sm:$0xff]  ;;  %v8108_v25 = vld [vmem:[#allocation33_spill] sm:$0xff]  ;;  %vm4388_vm1 = vcmask 326912   ;;  %vm4395_vm3 = vcmask 392512   ;;  %vm4402_vm4 = vcmask 458112  }
 0x472   : >> { %5308 = vmatpush3.msra.mxu0 %v8103_v43  ;;  %5515 = vmatpush3.msra.mxu1 %v8103_v43  ;;  %v8105_v49 = vld [vmem:[#allocation4_spill] sm:$0xff]  ;;  %v8109_v11 = vld [vmem:[#allocation3_spill] sm:$0xff]  ;;  %v8110_v20 = vld [vmem:[#allocation49_spill] sm:$0xff]  ;;  %vm4409_vm5 = vcmask 523712   ;;  %vm4416_vm6 = vcmask 589312   ;;  %vm4423_vm7 = vcmask 654912  }
 0x473   : >> { %5309 = vmatprep.subr.mxu0 %v8104_v17  ;;  %5500 = vmatprep.subr.mxu1 %v8104_v17  ;;  %v4362_v48 = vadd.s32 4294967288, %v8105_v49  ;;  %v4369_v8 = vadd.s32 4294967280, %v8105_v49  ;;  %v4376_v50 = vadd.s32 4294967272, %v8105_v49  ;;  %v4383_v39 = vadd.s32 4294967264, %v8105_v49  ;;  %v8111_v2 = vld [vmem:[#allocation32_spill] sm:$0xff]  ;;  %v8113_v34 = vld [vmem:[#allocation31_spill] sm:$0xff] }
 0x474   : >> { %5310 = vmatpush3.msra.mxu0 %v8106_v56  ;;  %5516 = vmatpush3.msra.mxu1 %v8106_v56  ;;  %v4390_v13 = vadd.s32 4294967256, %v8105_v49  ;;  %v4397_v10 = vadd.s32 4294967248, %v8105_v49  ;;  %v4404_v14 = vadd.s32 4294967240, %v8105_v49  ;;  %v7442_v31 = vsub.s32 %v8105_v49, %v8109_v11  ;;  %v8112_v42 = vld [vmem:[#allocation48_spill] sm:$0xff]  ;;  %v8114_v33 = vld [vmem:[#allocation47_spill] sm:$0xff]  ;;  %v8115_v45 = vld [vmem:[#allocation30_spill] sm:$0xff] }
 0x475   : >> { %5311 = vmatprep.subr.mxu0 %v8107_v41  ;;  %5501 = vmatprep.subr.mxu1 %v8107_v41  ;;  %v4411_v36 = vadd.s32 4294967232, %v8105_v49  ;;  %v4418_v38 = vadd.s32 4294967224, %v8105_v49  ;;  %v7449_v6 = vsub.s32 %v4362_v48, %v8109_v11  ;;  %v7452_v46 = vsub.s32 %v4369_v8, %v8109_v11  ;;  %v8116_v17 = vld [vmem:[#allocation46_spill] sm:$0xff]  ;;  %v8117_v56 = vld [vmem:[#allocation29_spill] sm:$0xff] }
 0x476   : >> { %5312 = vmatpush3.msra.mxu0 %v8108_v25  ;;  %5517 = vmatpush3.msra.mxu1 %v8108_v25  ;;  %v4425_v51 = vadd.s32 4294967216, %v8105_v49  ;;  %v7458_v62 = vsub.s32 %v4376_v50, %v8109_v11  ;;  %v7461_v23 = vsub.s32 %v4383_v39, %v8109_v11  ;;  %v7464_v4 = vsub.s32 %v4390_v13, %v8109_v11  ;;  %v8118_v39 = vld [vmem:[#allocation45_spill] sm:$0xff]  ;;  %v8119_v41 = vld [vmem:[#allocation26_spill] sm:$0xff] }
 0x477   : >> { %5313 = vmatprep.subr.mxu0 %v8110_v20  ;;  %5502 = vmatprep.subr.mxu1 %v8110_v20  ;;  %v4432_v54 = vadd.s32 4294967208, %v8105_v49  ;;  %v7470_v22 = vsub.s32 %v4397_v10, %v8109_v11  ;;  %v7473_v5 = vsub.s32 %v4404_v14, %v8109_v11  ;;  %v4439_v27 = vadd.s32 4294967200, %v8105_v49  ;;  %v8120_v14 = vld [vmem:[#allocation44_spill] sm:$0xff]  ;;  %v8122_v20 = vld [vmem:[#allocation43_spill] sm:$0xff] }
 0x478   : >> { %5314 = vmatpush3.msra.mxu0 %v8111_v2  ;;  %5518 = vmatpush3.msra.mxu1 %v8111_v2  ;;  %v4446_v32 = vadd.s32 4294967192, %v8105_v49  ;;  %v7480_v24 = vsub.s32 %v4411_v36, %v8109_v11  ;;  %v7483_v19 = vsub.s32 %v4418_v38, %v8109_v11  ;;  %v7486_v44 = vsub.s32 %v4425_v51, %v8109_v11  ;;  %v8121_v36 = vld [vmem:[#allocation25_spill] sm:$0xff]  ;;  %v8124_v2 = vld [vmem:[#allocation79_spill] sm:$0xff] }
 0x479   : >> { %5315 = vmatprep.subr.mxu0 %v8112_v42  ;;  %5503 = vmatprep.subr.mxu1 %v8112_v42  ;;  %v4453_v55 = vadd.s32 4294967184, %v8105_v49  ;;  %v7492_v58 = vsub.s32 %v4432_v54, %v8109_v11  ;;  %v7495_v30 = vsub.s32 %v4439_v27, %v8109_v11  ;;  %v4460_v7 = vadd.s32 4294967176, %v8105_v49  ;;  %v8125_v42 = vld [vmem:[#allocation24_spill] sm:$0xff] }
 0x47a   : >> { %5316 = vmatpush3.msra.mxu0 %v8113_v34  ;;  %5519 = vmatpush3.msra.mxu1 %v8113_v34  ;;  %v7498_v63 = vsub.s32 %v4446_v32, %v8109_v11  ;;  %v4470_v12 = vrot.slane %v6499_v15, %v7442_v31  ;;  %v4474_v43 = vrot.slane %v6496_v61, %v7449_v6  ;;  %vm4430_vm8 = vcmask 720512   ;;  %v8127_v34 = vld [vmem:[#allocation42_spill] sm:$0xff] }
 0x47b   : >> { %5317 = vmatprep.subr.mxu0 %v8114_v33  ;;  %5504 = vmatprep.subr.mxu1 %v8114_v33  ;;  %v7504_v18 = vsub.s32 %v4453_v55, %v8109_v11  ;;  %v7513_v49 = vsub.s32 %v4460_v7, %v8109_v11  ;;  %v4479_v48 = vrot.slane %v6511_v1, %v7452_v46  ;;  %vm4437_vm9 = vcmask 786112   ;;  %v8128_v33 = vld [vmem:[#allocation71_spill] sm:$0xff] }
 0x47c   : >> { %5318 = vmatpush3.msra.mxu0 %v8115_v45  ;;  %5520 = vmatpush3.msra.mxu1 %v8115_v45  ;;  %v4484_v8 = vrot.slane %v6508_v40, %v7458_v62  ;;  %v4475_v61 = vsel %vm4367_vm13, %v4474_v43, %v4470_v12  ;;  %v4489_v15 = vrot.slane %v6523_v59, %v7461_v23  ;;  %v8129_v12 = vld [vmem:[#allocation20_spill] sm:$0xff]  ;;  %vm4444_vm10 = vcmask 851712   ;;  %v8130_v43 = vld [vmem:[#allocation41_spill] sm:$0xff] }
 0x47d   : >> { %5319 = vmatprep.subr.mxu0 %v8116_v17  ;;  %5505 = vmatprep.subr.mxu1 %v8116_v17  ;;  %v4494_v50 = vrot.slane %v6520_v35, %v7464_v4  ;;  %v4480_v40 = vsel %vm4374_vm14, %v4479_v48, %v4475_v61  ;;  %v4499_v1 = vrot.slane %v6535_v26, %v7470_v22  ;;  %vm4451_vm11 = vcmask 917312   ;;  %v8131_v17 = vld [vmem:[#allocation19_spill] sm:$0xff]  ;;  %v8133_v61 = vld [vmem:[#allocation18_spill] sm:$0xff] }
 0x47e   : >> { %5320 = vmatpush3.msra.mxu0 %v8117_v56  ;;  %5521 = vmatpush3.msra.mxu1 %v8117_v56  ;;  %v4504_v13 = vrot.slane %v6532_v28, %v7473_v5  ;;  %v4485_v35 = vsel %vm4381_vm15, %v4484_v8, %v4480_v40  ;;  %v4509_v59 = vrot.slane %v6547_v52, %v7480_v24  ;;  %vm4458_vm12 = vcmask 982912   ;;  %v8132_v8 = vld [vmem:[#allocation40_spill] sm:$0xff] }
 0x47f   : >> { %5321 = vmatprep.subr.mxu0 %v8118_v39  ;;  %5506 = vmatprep.subr.mxu1 %v8118_v39  ;;  %v4514_v10 = vrot.slane %v6544_v9, %v7483_v19  ;;  %v4490_v28 = vsel %vm4388_vm1, %v4489_v15, %v4485_v35  ;;  %v4519_v26 = vrot.slane %v6559_v60, %v7486_v44  ;;  %v8123_v60 = vld [vmem:[#allocation80_spill] sm:$0xff]  ;;  %v8135_v39 = vld [vmem:[#allocation39_spill] sm:$0xff]  ;;  %v8138_v35 = vld [vmem:[#allocation74_spill] sm:$0xff] }
 0x480   : >> { %5322 = vmatpush3.msra.mxu0 %v8119_v41  ;;  %5522 = vmatpush3.msra.mxu1 %v8119_v41  ;;  %v4524_v25 = vrot.slane %v6556_v0, %v7492_v58  ;;  %v4495_v9 = vsel %vm4395_vm3, %v4494_v50, %v4490_v28  ;;  %v4529_v52 = vrot.slane %v6571_v29, %v7495_v30  ;;  %v8126_v29 = vld [vmem:[#allocation69_spill] sm:$0xff]  ;;  %v8141_v28 = vld [vmem:[#allocation14_spill] sm:$0xff] }
 0x481   : >> { %5323 = vmatprep.subr.mxu0 %v8120_v14  ;;  %5507 = vmatprep.subr.mxu1 %v8120_v14  ;;  %v4534_v38 = vrot.slane %v6568_v16, %v7498_v63  ;;  %v4500_v0 = vsel %vm4402_vm4, %v4499_v1, %v4495_v9  ;;  %v4539_v51 = vrot.slane %v8123_v60, %v7504_v18  ;;  %v8146_v60 = vld [vmem:[#allocation78_spill] sm:$0xff] }
 0x482   : >> { %5324 = vmatpush3.msra.mxu0 %v8121_v36  ;;  %5523 = vmatpush3.msra.mxu1 %v8121_v36  ;;  %v4544_v54 = vrot.slane %v8124_v2, %v7513_v49  ;;  %v4505_v16 = vsel %vm4409_vm5, %v4504_v13, %v4500_v0  ;;  %v4361_v27 = vrot.slane %v8126_v29, %v7442_v31  ;;  %v8137_v13 = vld [vmem:[#allocation15_spill] sm:$0xff]  ;;  %v8143_v36 = vld [vmem:[#allocation76_spill] sm:$0xff]  ;;  %v8147_v2 = vld [vmem:[#allocation13_spill] sm:$0xff] }
 0x483   : >> { %5325 = vmatprep.subr.mxu0 %v8122_v20  ;;  %5508 = vmatprep.subr.mxu1 %v8122_v20  ;;  %v4366_v32 = vrot.slane %v6489_v47, %v7449_v6  ;;  %v4510_v55 = vsel %vm4416_vm6, %v4509_v59, %v4505_v16  ;;  %v4373_v7 = vrot.slane %v8128_v33, %v7452_v46  ;;  %v8145_v20 = vld [vmem:[#allocation75_spill] sm:$0xff]  ;;  %v8155_v33 = vld [vmem:[#allocation8_spill] sm:$0xff] }
 0x484   : >> { %5326 = vmatpush3.msra.mxu0 %v8125_v42  ;;  %5524 = vmatpush3.msra.mxu1 %v8125_v42  ;;  %v4380_v45 = vrot.slane %v6502_v57, %v7458_v62  ;;  %v4515_v47 = vsel %vm4423_vm7, %v4514_v10, %v4510_v55  ;;  %v4387_v6 = vrot.slane %v6517_v3, %v7461_v23  ;;  %v8139_v10 = vld [vmem:[#allocation38_spill] sm:$0xff]  ;;  %v5608_v42 = vmov 1.0   ;;  %v8154_v55 = vld [vmem:[#allocation21_spill] sm:$0xff] }
 0x485   : >> { %5327 = vmatprep.subr.mxu0 %v8127_v34  ;;  %5509 = vmatprep.subr.mxu1 %v8127_v34  ;;  %v4368_v31 = vsel %vm4367_vm13, %v4366_v32, %v4361_v27  ;;  %v4520_v46 = vsel %vm4430_vm8, %v4519_v26, %v4515_v47  ;;  %v4394_v62 = vrot.slane %v6514_v37, %v7464_v4  ;;  %vm4465_vm13 = vcmask 1048512   ;;  %v8150_v27 = vld [vmem:[#allocation5_spill] sm:$0xff]  ;;  %v8151_v32 = vld [vmem:[#allocation6_spill] sm:$0xff] }
 0x486   : >> { %5328 = vmatpush3.msra.mxu0 %v8129_v12  ;;  %5525 = vmatpush3.msra.mxu1 %v8129_v12  ;;  %v4375_v57 = vsel %vm4374_vm14, %v4373_v7, %v4368_v31  ;;  %v4525_v48 = vsel %vm4437_vm9, %v4524_v25, %v4520_v46  ;;  %v4401_v23 = vrot.slane %v6529_v21, %v7470_v22  ;;  %v8134_v22 = vld [vmem:[#allocation73_spill] sm:$0xff]  ;;  %v8156_v7 = vld [vmem:[#allocation22_spill] sm:$0xff]  ;;  %v8158_v12 = vld [vmem:[#allocation23_spill] sm:$0xff]  ;;  %v5609_v46 = vmov 32  }
 0x487   : >> { %5329 = vmatprep.subr.mxu0 %v8130_v43  ;;  %5510 = vmatprep.subr.mxu1 %v8130_v43  ;;  %v4382_v3 = vsel %vm4381_vm15, %v4380_v45, %v4375_v57  ;;  %v4530_v56 = vsel %vm4444_vm10, %v4529_v52, %v4525_v48  ;;  %v4408_v4 = vrot.slane %v6526_v53, %v7473_v5  ;;  %v8136_v53 = vld [vmem:[#allocation70_spill] sm:$0xff]  ;;  %v8144_v52 = vld [vmem:[#allocation37_spill] sm:$0xff]  ;;  %v8160_v31 = vld [vmem:[#allocation27_spill] sm:$0xff] }
 0x488   : >> { %5330 = vmatpush3.msra.mxu0 %v8131_v17  ;;  %5526 = vmatpush3.msra.mxu1 %v8131_v17  ;;  %v4389_v37 = vsel %vm4388_vm1, %v4387_v6, %v4382_v3  ;;  %v4535_v15 = vsel %vm4451_vm11, %v4534_v38, %v4530_v56  ;;  %v4415_v50 = vrot.slane %v8134_v22, %v7480_v24  ;;  %v8152_v34 = vld [vmem:[#allocation17_spill] sm:$0xff]  ;;  %v8159_v47 = vld [vmem:[#allocation10_spill] sm:$0xff]  ;;  %v8161_v6 = vld [vmem:[#allocation11_spill] sm:$0xff] }
 0x489   : >> { %5331 = vmatprep.subr.mxu0 %v8132_v8  ;;  %5511 = vmatprep.subr.mxu1 %v8132_v8  ;;  %v4396_v21 = vsel %vm4395_vm3, %v4394_v62, %v4389_v37  ;;  %v4540_v40 = vsel %vm4458_vm12, %v4539_v51, %v4535_v15  ;;  %v4422_v5 = vrot.slane %v8136_v53, %v7483_v19  ;;  %v8140_v19 = vld [vmem:[#allocation12_spill] sm:$0xff]  ;;  %v8157_v45 = vld [vmem:[#allocation9_spill] sm:$0xff] }
 0x48a   : >> { %5332 = vmatpush3.msra.mxu0 %v8133_v61  ;;  %5527 = vmatpush3.msra.mxu1 %v8133_v61  ;;  %v4403_v1 = vsel %vm4402_vm4, %v4401_v23, %v4396_v21  ;;  %v7614_v41 = vsel %vm4465_vm13, %v4544_v54, %v4540_v40  ;;  %v4429_v59 = vrot.slane %v8138_v35, %v7486_v44  ;;  %v8142_v44 = vld [vmem:[#allocation72_spill] sm:$0xff] }
 0x48b   : >> { %5333 = vmatprep.subr.mxu0 %v8135_v39  ;;  %5512 = vmatprep.subr.mxu1 %v8135_v39  ;;  %v4410_v24 = vsel %vm4409_vm5, %v4408_v4, %v4403_v1  ;;  %vm4565_vm14 = vcmp.eq.s32.totalorder %v8109_v11, %v7614_v41  ;;  %vm4581_vm15 = vcmp.eq.s32.totalorder %v8140_v19, %v7614_v41  ;;  %v8162_v43 = vld [vmem:[#allocation28_spill] sm:$0xff] }
 0x48c   : >> { %5334 = vmatpush3.msra.mxu0 %v8137_v13  ;;  %5528 = vmatpush3.msra.mxu1 %v8137_v13  ;;  %v4417_v14 = vsel %vm4416_vm6, %v4415_v50, %v4410_v24  ;;  %v4436_v25 = vrot.slane %v8142_v44, %v7492_v58  ;;  %v4443_v9 = vrot.slane %v8143_v36, %v7495_v30  ;;  %v8148_v30 = vld [vmem:[#allocation77_spill] sm:$0xff]  ;;  %v5610_v13 = vmov 0  }
 0x48d   : >> { %5335 = vmatprep.subr.mxu0 %v8139_v10  ;;  %5513 = vmatprep.subr.mxu1 %v8139_v10  ;;  %v4424_v26 = vsel %vm4423_vm7, %v4422_v5, %v4417_v14  ;;  %v4450_v0 = vrot.slane %v8145_v20, %v7498_v63  ;;  %v4457_v51 = vrot.slane %v8146_v60, %v7504_v18 }
 0x48e   : >> { %5336 = vmatpush3.msra.mxu0 %v8141_v28  ;;  %5529 = vmatpush3.msra.mxu1 %v8141_v28  ;;  %v4431_v38 = vsel %vm4430_vm8, %v4429_v59, %v4424_v26  ;;  %v4464_v54 = vrot.slane %v8148_v30, %v7513_v49  ;;  %v8149_v49 = vld [vmem:[#allocation16_spill] sm:$0xff]  ;;  %vm4567_vm3 = vcmp.eq.s32.totalorder %v8150_v27, %v7614_v41 }
 0x48f   : >> { %5337 = vmatprep.subr.mxu0 %v8144_v52  ;;  %5514 = vmatprep.subr.mxu1 %v8144_v52  ;;  %v4438_v58 = vsel %vm4437_vm9, %v4436_v25, %v4431_v38  ;;  %vm4583_vm1 = vcmp.eq.s32.totalorder %v8149_v49, %v7614_v41  ;;  %vm4569_vm8 = vcmp.eq.s32.totalorder %v8151_v32, %v7614_v41 }
 0x490   : >> { %5338 = vmatpush3.msra.mxu0 %v8147_v2  ;;  %5530 = vmatpush3.msra.mxu1 %v8147_v2  ;;  %v4445_v63 = vsel %vm4444_vm10, %v4443_v9, %v4438_v58  ;;  %vm4585_vm9 = vcmp.eq.s32.totalorder %v8152_v34, %v7614_v41 }
 0x491   : >> { %5223 = vmatprep.mubr.msk.f32.mxu0 %vm4565_vm14, %v5608_v42  ;;  %5239 = vmatprep.mubr.msk.f32.mxu1 %vm4581_vm15, %v5608_v42  ;;  %v4452_v18 = vsel %vm4451_vm11, %v4450_v0, %v4445_v63 }
 0x492   : >> { %v4459_v16 = vsel %vm4458_vm12, %v4457_v51, %v4452_v18  ;;  %5555 = vset.pattern.permute.xlu0 %v5609_v46  ;;  %5556 = vset.pattern.permute.xlu1 %v5609_v46 }
 0x493   : >> { %v4466_v29 = vsel %vm4465_vm13, %v4464_v54, %v4459_v16  ;;  %vm4587_vm13 = vcmp.eq.s32.totalorder %v8154_v55, %v7614_v41 }
 0x494   : >> { %vm4564_vm4 = vcmp.eq.s32.totalorder %v8109_v11, %v4466_v29  ;;  %vm4580_vm5 = vcmp.eq.s32.totalorder %v8140_v19, %v4466_v29  ;;  %vm4582_vm6 = vcmp.eq.s32.totalorder %v8149_v49, %v4466_v29  ;;  %vm4566_vm7 = vcmp.eq.s32.totalorder %v8150_v27, %v4466_v29  ;;  %v8153_v11 = vld [vmem:[#allocation7_spill] sm:$0xff] }
 0x495   : >> { %5224 = vmatmul.mubr.msk.f32.vlgmr.msra.gmra.mxu0 %vm4564_vm4, %v5608_v42  ;;  %5240 = vmatmul.mubr.msk.f32.vlgmr.msra.gmra.mxu1 %vm4580_vm5, %v5608_v42  ;;  %vm4568_vm10 = vcmp.eq.s32.totalorder %v8151_v32, %v4466_v29  ;;  %vm4584_vm11 = vcmp.eq.s32.totalorder %v8152_v34, %v4466_v29  ;;  %vm4571_vm12 = vcmp.eq.s32.totalorder %v8153_v11, %v7614_v41 }
 0x496   : >> { %5241 = vmatprep.mubr.msk.f32.mxu1 %vm4583_vm1, %v5608_v42  ;;  %5225 = vmatprep.mubr.msk.f32.mxu0 %vm4567_vm3, %v5608_v42  ;;  %vm4570_vm14 = vcmp.eq.s32.totalorder %v8153_v11, %v4466_v29  ;;  %vm4586_vm15 = vcmp.eq.s32.totalorder %v8154_v55, %v4466_v29  ;;  %vm4573_vm1 = vcmp.eq.s32.totalorder %v8155_v33, %v7614_v41 }
 0x497   : >> { %vm4589_vm3 = vcmp.eq.s32.totalorder %v8156_v7, %v7614_v41  ;;  %vm4572_vm4 = vcmp.eq.s32.totalorder %v8155_v33, %v4466_v29  ;;  %vm4588_vm5 = vcmp.eq.s32.totalorder %v8156_v7, %v4466_v29 }
 0x499   : >> { %5242 = vmatmul.mubr.msk.f32.gmra.mxu1 %vm4582_vm6, %v5608_v42  ;;  %5226 = vmatmul.mubr.msk.f32.gmra.mxu0 %vm4566_vm7, %v5608_v42  ;;  %vm4575_vm6 = vcmp.eq.s32.totalorder %v8157_v45, %v7614_v41  ;;  %vm4591_vm7 = vcmp.eq.s32.totalorder %v8158_v12, %v7614_v41 }
 0x49a   : >> { %5227 = vmatprep.mubr.msk.f32.mxu0 %vm4569_vm8, %v5608_v42  ;;  %5243 = vmatprep.mubr.msk.f32.mxu1 %vm4585_vm9, %v5608_v42  ;;  %vm4574_vm8 = vcmp.eq.s32.totalorder %v8157_v45, %v4466_v29  ;;  %vm4590_vm9 = vcmp.eq.s32.totalorder %v8158_v12, %v4466_v29 }
 0x49d   : >> { %5228 = vmatmul.mubr.msk.f32.gmra.mxu0 %vm4568_vm10, %v5608_v42  ;;  %5244 = vmatmul.mubr.msk.f32.gmra.mxu1 %vm4584_vm11, %v5608_v42  ;;  %vm4577_vm10 = vcmp.eq.s32.totalorder %v8159_v47, %v7614_v41  ;;  %vm4593_vm11 = vcmp.eq.s32.totalorder %v8160_v31, %v7614_v41 }
 0x49e   : >> { %5229 = vmatprep.mubr.msk.f32.mxu0 %vm4571_vm12, %v5608_v42  ;;  %5245 = vmatprep.mubr.msk.f32.mxu1 %vm4587_vm13, %v5608_v42  ;;  %vm4576_vm12 = vcmp.eq.s32.totalorder %v8159_v47, %v4466_v29  ;;  %vm4592_vm13 = vcmp.eq.s32.totalorder %v8160_v31, %v4466_v29 }
 0x4a1   : >> { %5230 = vmatmul.mubr.msk.f32.gmra.mxu0 %vm4570_vm14, %v5608_v42  ;;  %5246 = vmatmul.mubr.msk.f32.gmra.mxu1 %vm4586_vm15, %v5608_v42  ;;  %vm4579_vm14 = vcmp.eq.s32.totalorder %v8161_v6, %v7614_v41  ;;  %vm4595_vm15 = vcmp.eq.s32.totalorder %v8162_v43, %v7614_v41 }
 0x4a2   : >> { %5231 = vmatprep.mubr.msk.f32.mxu0 %vm4573_vm1, %v5608_v42  ;;  %5247 = vmatprep.mubr.msk.f32.mxu1 %vm4589_vm3, %v5608_v42  ;;  %vm4578_vm1 = vcmp.eq.s32.totalorder %v8161_v6, %v4466_v29  ;;  %vm4594_vm3 = vcmp.eq.s32.totalorder %v8162_v43, %v4466_v29 }
 0x4a5   : >> { %5232 = vmatmul.mubr.msk.f32.gmra.mxu0 %vm4572_vm4, %v5608_v42  ;;  %5248 = vmatmul.mubr.msk.f32.gmra.mxu1 %vm4588_vm5, %v5608_v42 }
 0x4a6   : >> { %5233 = vmatprep.mubr.msk.f32.mxu0 %vm4575_vm6, %v5608_v42  ;;  %5249 = vmatprep.mubr.msk.f32.mxu1 %vm4591_vm7, %v5608_v42 }
 0x4a9   : >> { %5234 = vmatmul.mubr.msk.f32.gmra.mxu0 %vm4574_vm8, %v5608_v42  ;;  %5250 = vmatmul.mubr.msk.f32.gmra.mxu1 %vm4590_vm9, %v5608_v42 }
 0x4aa   : >> { %5235 = vmatprep.mubr.msk.f32.mxu0 %vm4577_vm10, %v5608_v42  ;;  %5251 = vmatprep.mubr.msk.f32.mxu1 %vm4593_vm11, %v5608_v42 }
 0x4ad   : >> { %5236 = vmatmul.mubr.msk.f32.gmra.mxu0 %vm4576_vm12, %v5608_v42  ;;  %5252 = vmatmul.mubr.msk.f32.gmra.mxu1 %vm4592_vm13, %v5608_v42 }
 0x4ae   : >> { %5237 = vmatprep.mubr.msk.f32.mxu0 %vm4579_vm14, %v5608_v42  ;;  %5253 = vmatprep.mubr.msk.f32.mxu1 %vm4595_vm15, %v5608_v42 }
 0x4b1   : >> { %5238 = vmatmul.mubr.msk.f32.gmra.mxu0 %vm4578_vm1, %v5608_v42  ;;  %5254 = vmatmul.mubr.msk.f32.gmra.mxu1 %vm4594_vm3, %v5608_v42 }
 0x555   : >> { %v5339_v57 = vpop.f32.mrf.mxu0  ;;  %v5363_v62 = vpop.f32.mrf.mxu1 }
 0x557   : >> { %v5340_v17 = vpop.f32.mrf.mxu0  ;;  %v5364_v48 = vpop.f32.mrf.mxu1 }
 0x558   : >> { %v7731_v3 = vadd.f32 %v5340_v17, %v5339_v57  ;;  %v7733_v56 = vadd.f32 %v5364_v48, %v5363_v62 }
 0x559   : >> { %v5366_v23 = vpop.f32.mrf.mxu1  ;;  %v5342_v8 = vpop.f32.mrf.mxu0 }
 0x55a   : >> { %v4821_v37 = vmax.f32 %v7731_v3, 1.0  ;;  %v4829_v40 = vmax.f32 %v7733_v56, 1.0  ;;  %vm4805_vm5 = vcmp.gt.f32.partialorder %v7731_v3, 0.0  ;;  %vm4813_vm7 = vcmp.gt.f32.partialorder %v7733_v56, 0.0 }
 0x55b   : >> { %v5367_v4 = vpop.f32.mrf.mxu1  ;;  %v5343_v61 = vpop.f32.mrf.mxu0  ;;  %v4949_v24 = vsel %vm4805_vm5, 1, %v5610_v13  ;;  %v4957_v26 = vsel %vm4813_vm7, 1, %v5610_v13 }
 0x55c   : >> { %v7736_v15 = vadd.f32 %v5367_v4, %v5366_v23  ;;  %4839 = vperm.xlu0 %5555, %v4821_v37   ;;  %v7738_v21 = vadd.f32 %v5343_v61, %v5342_v8 }
 0x55d   : >> { %v5345_v22 = vpop.f32.mrf.mxu0  ;;  %v5369_v50 = vpop.f32.mrf.mxu1 }
 0x55e   : >> { %v4830_v39 = vmax.f32 %v7736_v15, 1.0  ;;  %vm4806_vm4 = vcmp.gt.f32.partialorder %v7738_v21, 0.0  ;;  %vm4814_vm6 = vcmp.gt.f32.partialorder %v7736_v15, 0.0  ;;  %v4822_v20 = vmax.f32 %v7738_v21, 1.0 }
 0x55f   : >> { %v5346_v1 = vpop.f32.mrf.mxu0  ;;  %v5370_v53 = vpop.f32.mrf.mxu1  ;;  %v4950_v41 = vsel %vm4806_vm4, 1, %v5610_v13  ;;  %v4958_v28 = vsel %vm4814_vm6, 1, %v5610_v13 }
 0x560   : >> { %4884 = vperm.xlu1 %5556, %v4830_v39   ;;  %4879 = vperm.xlu0 %5555, %v4829_v40   ;;  %v7748_v14 = vadd.f32 %v5346_v1, %v5345_v22  ;;  %v7754_v52 = vadd.f32 %v5370_v53, %v5369_v50 }
 0x561   : >> { %v5348_v5 = vpop.f32.mrf.mxu0  ;;  %v5372_v59 = vpop.f32.mrf.mxu1 }
 0x562   : >> { %v4823_v38 = vmax.f32 %v7748_v14, 1.0  ;;  %v4831_v58 = vmax.f32 %v7754_v52, 1.0  ;;  %vm4807_vm8 = vcmp.gt.f32.partialorder %v7748_v14, 0.0  ;;  %vm4815_vm12 = vcmp.gt.f32.partialorder %v7754_v52, 0.0 }
 0x563   : >> { %v5349_v35 = vpop.f32.mrf.mxu0  ;;  %v5373_v44 = vpop.f32.mrf.mxu1  ;;  %v4951_v18 = vsel %vm4807_vm8, 1, %v5610_v13 }
 0x564   : >> { %4969 = vperm.xlu1 %5556, %v4950_v41   ;;  %4966 = vperm.xlu0 %5555, %v4949_v24   ;;  %v7752_v9 = vadd.f32 %v5349_v35, %v5348_v5  ;;  %v7758_v51 = vadd.f32 %v5373_v44, %v5372_v59 }
 0x565   : >> { %v5351_v10 = vpop.f32.mrf.mxu0  ;;  %v5375_v36 = vpop.f32.mrf.mxu1 }
 0x566   : >> { %v4824_v2 = vmax.f32 %v7752_v9, 1.0  ;;  %v4832_v63 = vmax.f32 %v7758_v51, 1.0  ;;  %vm4808_vm9 = vcmp.gt.f32.partialorder %v7752_v9, 0.0  ;;  %vm4816_vm13 = vcmp.gt.f32.partialorder %v7758_v51, 0.0 }
 0x567   : >> { %v5352_v25 = vpop.f32.mrf.mxu0  ;;  %v5376_v60 = vpop.f32.mrf.mxu1  ;;  %v4952_v17 = vsel %vm4808_vm9, 1, %v5610_v13 }
 0x568   : >> { %4993 = vperm.xlu1 %5556, %v4958_v28   ;;  %4990 = vperm.xlu0 %5555, %v4957_v26   ;;  %v7763_v42 = vadd.f32 %v5352_v25, %v5351_v10  ;;  %v7770_v57 = vadd.f32 %v5376_v60, %v5375_v36  ;;  %v4959_v25 = vsel %vm4815_vm12, 1, %v5610_v13  ;;  %v4960_v36 = vsel %vm4816_vm13, 1, %v5610_v13 }
 0x569   : >> { %v5354_v0 = vpop.f32.mrf.mxu0  ;;  %v5378_v54 = vpop.f32.mrf.mxu1 }
 0x56a   : >> { %v4825_v62 = vmax.f32 %v7763_v42, 1.0  ;;  %v4833_v4 = vmax.f32 %v7770_v57, 1.0  ;;  %vm4809_vm10 = vcmp.gt.f32.partialorder %v7763_v42, 0.0  ;;  %vm4817_vm1 = vcmp.gt.f32.partialorder %v7770_v57, 0.0 }
 0x56b   : >> { %v5355_v30 = vpop.f32.mrf.mxu0  ;;  %v5379_v29 = vpop.f32.mrf.mxu1  ;;  %v4953_v40 = vsel %vm4809_vm10, 1, %v5610_v13 }
 0x56c   : >> { %4849 = vperm.xlu1 %5556, %v4823_v38   ;;  %4844 = vperm.xlu0 %5555, %v4822_v20   ;;  %v7768_v46 = vadd.f32 %v5355_v30, %v5354_v0  ;;  %v7774_v8 = vadd.f32 %v5379_v29, %v5378_v54  ;;  %v4961_v0 = vsel %vm4817_vm1, 1, %v5610_v13 }
 0x56d   : >> { %v5357_v16 = vpop.f32.mrf.mxu0  ;;  %v5381_v23 = vpop.f32.mrf.mxu1 }
 0x56e   : >> { %v4826_v37 = vmax.f32 %v7768_v46, 1.0  ;;  %v4834_v39 = vmax.f32 %v7774_v8, 1.0  ;;  %vm4810_vm11 = vcmp.gt.f32.partialorder %v7768_v46, 0.0  ;;  %vm4818_vm15 = vcmp.gt.f32.partialorder %v7774_v8, 0.0 }
 0x56f   : >> { %v5358_v48 = vpop.f32.mrf.mxu0  ;;  %v5382_v22 = vpop.f32.mrf.mxu1  ;;  %v4954_v35 = vsel %vm4810_vm11, 1, %v5610_v13  ;;  %v4962_v20 = vsel %vm4818_vm15, 1, %v5610_v13 }
 0x570   : >> { %4854 = vperm.xlu1 %5556, %v4824_v2   ;;  %4889 = vperm.xlu0 %5555, %v4831_v58   ;;  %v7779_v50 = vadd.f32 %v5358_v48, %v5357_v16  ;;  %v7786_v41 = vadd.f32 %v5382_v22, %v5381_v23 }
 0x571   : >> { %v5360_v61 = vpop.f32.mrf.mxu0  ;;  %v5384_v53 = vpop.f32.mrf.mxu1 }
 0x572   : >> { %v4827_v24 = vmax.f32 %v7779_v50, 1.0  ;;  %v4835_v26 = vmax.f32 %v7786_v41, 1.0  ;;  %vm4811_vm14 = vcmp.gt.f32.partialorder %v7779_v50, 0.0  ;;  %vm4819_vm4 = vcmp.gt.f32.partialorder %v7786_v41, 0.0 }
 0x573   : >> { %v5361_v1 = vpop.f32.mrf.mxu0  ;;  %v5385_v59 = vpop.f32.mrf.mxu1  ;;  %v4955_v38 = vsel %vm4811_vm14, 1, %v5610_v13  ;;  %v4963_v2 = vsel %vm4819_vm4, 1, %v5610_v13 }
 0x574   : >> { %4894 = vperm.xlu1 %5556, %v4832_v63   ;;  %4972 = vperm.xlu0 %5555, %v4951_v18   ;;  %v7784_v5 = vadd.f32 %v5361_v1, %v5360_v61  ;;  %v7790_v10 = vadd.f32 %v5385_v59, %v5384_v53 }
 0x576   : >> { %v4828_v28 = vmax.f32 %v7784_v5, 1.0  ;;  %v4836_v44 = vmax.f32 %v7790_v10, 1.0  ;;  %vm4812_vm3 = vcmp.gt.f32.partialorder %v7784_v5, 0.0  ;;  %vm4820_vm5 = vcmp.gt.f32.partialorder %v7790_v10, 0.0 }
 0x577   : >> { %v4956_v60 = vsel %vm4812_vm3, 1, %v5610_v13  ;;  %v4964_v58 = vsel %vm4820_vm5, 1, %v5610_v13 }
 0x578   : >> { %4975 = vperm.xlu1 %5556, %v4952_v17   ;;  %4859 = vperm.xlu0 %5555, %v4825_v62  }
 0x57c   : >> { %4864 = vperm.xlu1 %5556, %v4826_v37   ;;  %4899 = vperm.xlu0 %5555, %v4833_v4   ;;  %v8163_v4 = vld [vmem:[#allocation68_spill] sm:$0xff] }
 0x580   : >> { %4904 = vperm.xlu1 %5556, %v4834_v39   ;;  %4978 = vperm.xlu0 %5555, %v4953_v40  }
 0x584   : >> { %4981 = vperm.xlu1 %5556, %v4954_v35   ;;  %4869 = vperm.xlu0 %5555, %v4827_v24   ;;  %v8164_v24 = vld [vmem:[#allocation59_spill] sm:$0xff]  ;;  %v8165_v35 = vld [vmem:[#allocation60_spill] sm:$0xff] }
 0x588   : >> { %4874 = vperm.xlu1 %5556, %v4828_v28   ;;  %4909 = vperm.xlu0 %5555, %v4835_v26  }
 0x58c   : >> { %4914 = vperm.xlu1 %5556, %v4836_v44   ;;  %4996 = vperm.xlu0 %5555, %v4959_v25  }
 0x590   : >> { %4999 = vperm.xlu1 %5556, %v4960_v36   ;;  %4984 = vperm.xlu0 %5555, %v4955_v38  }
 0x594   : >> { %5005 = vperm.xlu1 %5556, %v4962_v20   ;;  %5002 = vperm.xlu0 %5555, %v4961_v0  }
 0x598   : >> { %4987 = vperm.xlu1 %5556, %v4956_v60   ;;  %5008 = vperm.xlu0 %5555, %v4963_v2   ;;  %v8166_v60 = vld [vmem:[#allocation66_spill] sm:$0xff] }
 0x59c   : >> { %5011 = vperm.xlu1 %5556, %v4964_v58  }
 0x5d7   : >> { %v4840_v30 = vpop.permute.xlu0 %4839 }
 0x5d8   : >> { %5557 = vrcp.f32 %v4840_v30  ;;  %v8167_v30 = vld [vmem:[#allocation67_spill] sm:$0xff] }
 0x5db   : >> { %v4885_v54 = vpop.permute.xlu1 %4884  ;;  %v4880_v63 = vpop.permute.xlu0 %4879 }
 0x5dc   : >> { %5559 = vrcp.f32 %v4885_v54 }
 0x5dd   : >> { %5561 = vrcp.f32 %v4880_v63 }
 0x5df   : >> { %v4970_v18 = vpop.permute.xlu1 %4969  ;;  %v4967_v16 = vpop.permute.xlu0 %4966 }
 0x5e0   : >> { %vm5013_vm6 = vcmp.eq.s32.totalorder %v4967_v16, 1  ;;  %vm5014_vm10 = vcmp.eq.s32.totalorder %v4970_v18, 1  ;;  %v8168_v16 = vld [vmem:[#allocation65_spill] sm:$0xff] }
 0x5e3   : >> { %v4994_v29 = vpop.permute.xlu1 %4993  ;;  %v4991_v62 = vpop.permute.xlu0 %4990 }
 0x5e4   : >> { %vm5022_vm7 = vcmp.eq.s32.totalorder %v4994_v29, 1  ;;  %vm5021_vm8 = vcmp.eq.s32.totalorder %v4991_v62, 1 }
 0x5e5   : >> { %v5558_v17 = vpop.eup %5557 }
 0x5e6   : >> { %v4918_v48 = vmul.f32 %v5558_v17, %v7731_v3 }
 0x5e7   : >> { %v4850_v23 = vpop.permute.xlu1 %4849  ;;  %v4845_v37 = vpop.permute.xlu0 %4844 }
 0x5e8   : >> { %v5029_v61 = vsel %vm5013_vm6, %v4918_v48, %v8163_v4  ;;  %5563 = vrcp.f32 %v4850_v23  ;;  %v8169_v4 = vld [vmem:[#allocation64_spill] sm:$0xff] }
 0x5e9   : >> { %v5560_v13 = vpop.eup %5559  ;;  %5045 = vst.msk [vmem:[#allocation2] sm:$0xff] %vm210_vm2, %v5029_v61  ;;  %5565 = vrcp.f32 %v4845_v37 }
 0x5ea   : >> { %v5562_v22 = vpop.eup %5561  ;;  %v4936_v39 = vmul.f32 %v5560_v13, %v7736_v15 }
 0x5eb   : >> { %v4934_v40 = vmul.f32 %v5562_v22, %v7733_v56  ;;  %v4855_v1 = vpop.permute.xlu1 %4854  ;;  %v4890_v53 = vpop.permute.xlu0 %4889 }
 0x5ec   : >> { %v5038_v3 = vsel %vm5022_vm7, %v4936_v39, %v8164_v24  ;;  %5567 = vrcp.f32 %v4855_v1 }
 0x5ed   : >> { %5054 = vst.msk [vmem:[#allocation2 + $0x48] sm:$0xff] %vm210_vm2, %v5038_v3  ;;  %v5037_v59 = vsel %vm5021_vm8, %v4934_v40, %v8165_v35  ;;  %v8171_v3 = vld [vmem:[#allocation58_spill] sm:$0xff] }
 0x5ee   : >> { %5053 = vst.msk [vmem:[#allocation2 + $0x40] sm:$0xff] %vm210_vm2, %v5037_v59 }
 0x5ef   : >> { %v4895_v28 = vpop.permute.xlu1 %4894  ;;  %v4973_v26 = vpop.permute.xlu0 %4972 }
 0x5f0   : >> { %vm5015_vm9 = vcmp.eq.s32.totalorder %v4973_v26, 1 }
 0x5f3   : >> { %v4976_v44 = vpop.permute.xlu1 %4975  ;;  %v4860_v25 = vpop.permute.xlu0 %4859 }
 0x5f4   : >> { %5569 = vrcp.f32 %v4860_v25  ;;  %vm5016_vm11 = vcmp.eq.s32.totalorder %v4976_v44, 1  ;;  %v8172_v25 = vld [vmem:[#allocation57_spill] sm:$0xff] }
 0x5f5   : >> { %v5564_v15 = vpop.eup %5563  ;;  %5571 = vrcp.f32 %v4890_v53 }
 0x5f6   : >> { %v5566_v36 = vpop.eup %5565  ;;  %v4922_v56 = vmul.f32 %v5564_v15, %v7748_v14 }
 0x5f7   : >> { %v4920_v38 = vmul.f32 %v5566_v36, %v7738_v21  ;;  %v4865_v20 = vpop.permute.xlu1 %4864  ;;  %v4900_v0 = vpop.permute.xlu0 %4899 }
 0x5f8   : >> { %v5031_v2 = vsel %vm5015_vm9, %v4922_v56, %v8166_v60  ;;  %5573 = vrcp.f32 %v4865_v20  ;;  %v8173_v60 = vld [vmem:[#allocation62_spill] sm:$0xff] }
 0x5f9   : >> { %v5568_v58 = vpop.eup %5567  ;;  %v5030_v54 = vsel %vm5014_vm10, %v4920_v38, %v8167_v30  ;;  %5047 = vst.msk [vmem:[#allocation2 + $0x10] sm:$0xff] %vm210_vm2, %v5031_v2  ;;  %5575 = vrcp.f32 %v4895_v28 }
 0x5fa   : >> { %5046 = vst.msk [vmem:[#allocation2 + $0x8] sm:$0xff] %vm210_vm2, %v5030_v54  ;;  %v4924_v63 = vmul.f32 %v5568_v58, %v7752_v9  ;;  %5577 = vrcp.f32 %v4900_v0  ;;  %v8174_v58 = vld [vmem:[#allocation55_spill] sm:$0xff]  ;;  %v8175_v54 = vld [vmem:[#allocation56_spill] sm:$0xff] }
 0x5fb   : >> { %v4905_v21 = vpop.permute.xlu1 %4904  ;;  %v4979_v14 = vpop.permute.xlu0 %4978 }
 0x5fc   : >> { %v5032_v29 = vsel %vm5016_vm11, %v4924_v63, %v8168_v16  ;;  %5579 = vrcp.f32 %v4905_v21  ;;  %vm5017_vm12 = vcmp.eq.s32.totalorder %v4979_v14, 1 }
 0x5fd   : >> { %5048 = vst.msk [vmem:[#allocation2 + $0x18] sm:$0xff] %vm210_vm2, %v5032_v29  ;;  %v8176_v29 = vld [vmem:[#allocation61_spill] sm:$0xff] }
 0x5ff   : >> { %v4982_v18 = vpop.permute.xlu1 %4981  ;;  %v4870_v62 = vpop.permute.xlu0 %4869 }
 0x600   : >> { %5581 = vrcp.f32 %v4870_v62  ;;  %vm5018_vm13 = vcmp.eq.s32.totalorder %v4982_v18, 1  ;;  %v8177_v62 = vld [vmem:[#allocation54_spill] sm:$0xff] }
 0x601   : >> { %v5570_v17 = vpop.eup %5569 }
 0x602   : >> { %v4926_v48 = vmul.f32 %v5570_v17, %v7763_v42  ;;  %v5572_v9 = vpop.eup %5571  ;;  %v8170_v42 = vld [vmem:[#allocation63_spill] sm:$0xff] }
 0x603   : >> { %v4875_v23 = vpop.permute.xlu1 %4874  ;;  %v4910_v37 = vpop.permute.xlu0 %4909  ;;  %v4938_v40 = vmul.f32 %v5572_v9, %v7754_v52 }
 0x604   : >> { %v5033_v61 = vsel %vm5017_vm12, %v4926_v48, %v8169_v4  ;;  %5583 = vrcp.f32 %v4875_v23 }
 0x605   : >> { %v5574_v13 = vpop.eup %5573  ;;  %5049 = vst.msk [vmem:[#allocation2 + $0x20] sm:$0xff] %vm210_vm2, %v5033_v61  ;;  %5585 = vrcp.f32 %v4910_v37 }
 0x606   : >> { %v4928_v22 = vmul.f32 %v5574_v13, %v7768_v46  ;;  %v5576_v53 = vpop.eup %5575 }
 0x607   : >> { %v4915_v39 = vpop.permute.xlu1 %4914  ;;  %v4997_v1 = vpop.permute.xlu0 %4996  ;;  %v4940_v28 = vmul.f32 %v5576_v53, %v7758_v51 }
 0x608   : >> { %v5034_v24 = vsel %vm5018_vm13, %v4928_v22, %v8170_v42  ;;  %5587 = vrcp.f32 %v4915_v39  ;;  %vm5023_vm14 = vcmp.eq.s32.totalorder %v4997_v1, 1  ;;  %v5578_v59 = vpop.eup %5577 }
 0x609   : >> { %5050 = vst.msk [vmem:[#allocation2 + $0x28] sm:$0xff] %vm210_vm2, %v5034_v24  ;;  %v5039_v35 = vsel %vm5023_vm14, %v4938_v40, %v8171_v3  ;;  %v5580_v44 = vpop.eup %5579  ;;  %v4942_v20 = vmul.f32 %v5578_v59, %v7770_v57 }
 0x60a   : >> { %5055 = vst.msk [vmem:[#allocation2 + $0x50] sm:$0xff] %vm210_vm2, %v5039_v35  ;;  %v4944_v56 = vmul.f32 %v5580_v44, %v7774_v8 }
 0x60b   : >> { %v5000_v46 = vpop.permute.xlu1 %4999  ;;  %v4985_v26 = vpop.permute.xlu0 %4984 }
 0x60c   : >> { %vm5024_vm15 = vcmp.eq.s32.totalorder %v5000_v46, 1  ;;  %vm5019_vm1 = vcmp.eq.s32.totalorder %v4985_v26, 1 }
 0x60d   : >> { %v5582_v52 = vpop.eup %5581  ;;  %v5040_v15 = vsel %vm5024_vm15, %v4940_v28, %v8172_v25 }
 0x60e   : >> { %5056 = vst.msk [vmem:[#allocation2 + $0x58] sm:$0xff] %vm210_vm2, %v5040_v15  ;;  %v4930_v36 = vmul.f32 %v5582_v52, %v7779_v50 }
 0x60f   : >> { %v5006_v38 = vpop.permute.xlu1 %5005  ;;  %v5003_v0 = vpop.permute.xlu0 %5002 }
 0x610   : >> { %v5035_v51 = vsel %vm5019_vm1, %v4930_v36, %v8173_v60  ;;  %vm5026_vm3 = vcmp.eq.s32.totalorder %v5006_v38, 1  ;;  %vm5025_vm4 = vcmp.eq.s32.totalorder %v5003_v0, 1 }
 0x611   : >> { %v5584_v2 = vpop.eup %5583  ;;  %5051 = vst.msk [vmem:[#allocation2 + $0x30] sm:$0xff] %vm210_vm2, %v5035_v51  ;;  %v5042_v30 = vsel %vm5026_vm3, %v4944_v56, %v8174_v58  ;;  %v5041_v63 = vsel %vm5025_vm4, %v4942_v20, %v8175_v54 }
 0x612   : >> { %v5586_v21 = vpop.eup %5585  ;;  %5058 = vst.msk [vmem:[#allocation2 + $0x68] sm:$0xff] %vm210_vm2, %v5042_v30  ;;  %5057 = vst.msk [vmem:[#allocation2 + $0x60] sm:$0xff] %vm210_vm2, %v5041_v63  ;;  %v4932_v8 = vmul.f32 %v5584_v2, %v7784_v5  ;;  %v8178_v5 = vld [vmem:[#allocation53_spill] sm:$0xff] }
 0x613   : >> { %v4988_v57 = vpop.permute.xlu1 %4987  ;;  %v4946_v50 = vmul.f32 %v5586_v21, %v7786_v41  ;;  %v5009_v14 = vpop.permute.xlu0 %5008 }
 0x614   : >> { %vm5020_vm5 = vcmp.eq.s32.totalorder %v4988_v57, 1  ;;  %vm5027_vm6 = vcmp.eq.s32.totalorder %v5009_v14, 1 }
 0x615   : >> { %v5588_v16 = vpop.eup %5587  ;;  %v5036_v18 = vsel %vm5020_vm5, %v4932_v8, %v8176_v29  ;;  %v5043_v17 = vsel %vm5027_vm6, %v4946_v50, %v8177_v62 }
 0x616   : >> { %5052 = vst.msk [vmem:[#allocation2 + $0x38] sm:$0xff] %vm210_vm2, %v5036_v18  ;;  %5059 = vst.msk [vmem:[#allocation2 + $0x70] sm:$0xff] %vm210_vm2, %v5043_v17  ;;  %v4948_v48 = vmul.f32 %v5588_v16, %v7790_v10 }
 0x617   : >> { %v5012_v23 = vpop.permute.xlu1 %5011 }
 0x618   : >> { %vm5028_vm7 = vcmp.eq.s32.totalorder %v5012_v23, 1 }
 0x619   : >> { %v5044_v37 = vsel %vm5028_vm7, %v4948_v48, %v8178_v5 }
 0x61a   : >> { %5060 = vst.msk [vmem:[#allocation2 + $0x78] sm:$0xff] %vm210_vm2, %v5044_v37 }
 0x61b PF: >> { %s284_s23 = sadd.s32 1, %s5603_s23  }
 0x61c   : >> { %p281_p6 = scmp.ge.s32.totalorder %s284_s23, 10  }
 0x61e   : > { %283 = sbr.rel (!%p281_p6) target bundleno = 48 (0x30), region = 76 }
 0x623 PF: > { %s12_s9 = sadd.s32 1, %s5599_s9  }
 0x624   : > { %p9_p7 = scmp.ge.s32.totalorder %s12_s9, 4  }
 0x626   :  { %11 = sbr.rel (!%p9_p7) target bundleno = 1 (0x1), region = 87 }

</bundles_post_ra>
